<compile_context>
chip_gen: v5e
topology: v5e:2x2
jax: 0.10.0
libtpu: 0.0.40
codegen_flags: <defaults>
</compile_context>

<pallas_src>
import math
import jax
import jax.numpy as jnp
from jax import lax
from jax.experimental import pallas as pl
from jax.experimental.pallas import tpu as pltpu


# ------------------------------------------------------------ in-kernel helpers

def _mm(a, b):
    """MXU matmul: bf16 operands, f32 accumulation."""
    return jnp.dot(a.astype(jnp.bfloat16), b.astype(jnp.bfloat16),
                   preferred_element_type=jnp.float32)


def _mm_f32(a, b):
    """Exact f32 matmul (used for the tiny row-selection gathers in merge)."""
    return jnp.dot(a, b, preferred_element_type=jnp.float32)


def _layernorm(x, gamma, beta, eps=1e-5):
    mu = jnp.mean(x, axis=-1, keepdims=True)
    xc = x - mu
    var = jnp.mean(xc * xc, axis=-1, keepdims=True)
    return xc * lax.rsqrt(var + eps) * gamma + beta


def _gelu_tanh(x):
    # tanh-approximate GELU (EUP tanh); ~1e-3 deviation from exact erf GELU.
    c = math.sqrt(2.0 / math.pi)
    return 0.5 * x * (1.0 + jnp.tanh(c * (x + 0.044715 * x * x * x)))


# Per-block ref consumption order (mirrored exactly by prepare_params()).
_BLOCK_KEYS = ('qw', 'qb', 'kw', 'kb', 'vw', 'vb', 'ls', 'bias', 'pw', 'pb',
               'g1', 'b1', 'w1', 'b1m', 'w2', 'b2m', 'g2', 'be2')


def _attention(x, rf, nh):
    """Cosine multi-head attention + proj + res-post-norm residual (Swin-v2 style)."""
    L, C = x.shape
    ls = rf['ls'][...]                               # (1, nh), already clamp().exp()'ed
    y = jnp.zeros((L, C), jnp.float32)
    for h in range(nh):                              # static unroll, no lane slicing
        q = _mm(x, rf['qw'][h]) + rf['qb'][h]        # (L, hd)
        k = _mm(x, rf['kw'][h]) + rf['kb'][h]
        v = _mm(x, rf['vw'][h]) + rf['vb'][h]
        qn = q * lax.rsqrt(jnp.maximum(jnp.sum(q * q, -1, keepdims=True), 1e-24))
        kn = k * lax.rsqrt(jnp.maximum(jnp.sum(k * k, -1, keepdims=True), 1e-24))
        attn = lax.dot_general(qn.astype(jnp.bfloat16), kn.astype(jnp.bfloat16),
                               (((1,), (1,)), ((), ())),
                               preferred_element_type=jnp.float32)        # (L, L)
        attn = attn * ls[:, h:h + 1] + rf['bias'][h]
        attn = attn - jnp.max(attn, axis=-1, keepdims=True)
        p = jnp.exp(attn)
        p = p * pl.reciprocal(jnp.sum(p, axis=-1, keepdims=True), approx=True)
        oh = _mm(p, v)                               # (L, hd)
        y = y + _mm(oh, rf['pw'][h])                 # head-concat folded into proj
    y = y + rf['pb'][...]
    return x + _layernorm(y, rf['g1'][...], rf['b1'][...])


def _mlp(x, rf, extra_norm):
    h = _mm(x, rf['w1'][...]) + rf['b1m'][...]
    h = _gelu_tanh(h)
    y = _mm(h, rf['w2'][...]) + rf['b2m'][...]
    out = x + _layernorm(y, rf['g2'][...], rf['be2'][...])
    if extra_norm:
        out = _layernorm(out, rf['g3'][...], rf['be3'][...])
    return out


def _patch_merge(x, p_ref, a_ref, cg_ref, cb_ref):
    """LayerNorm(channel-major 4x merge) @ reduction, without forming merged tensor.

    x: (L, C) -> (L/4, 2C).  p_ref[j] selects rows 4m+j; a_ref[j] are the
    gamma-folded reduction-weight slices; cg/cb are gamma@W and beta@W.
    """
    L, C = x.shape
    L4 = L // 4
    c_out = a_ref.shape[-1]
    acc = jnp.zeros((L4, c_out), jnp.float32)
    gsum = jnp.zeros((L4, 1), jnp.float32)
    gsq = jnp.zeros((L4, 1), jnp.float32)
    for j in range(4):
        xj = _mm_f32(p_ref[j], x)                    # (L4, C) == x[j::4, :]
        gsum = gsum + jnp.sum(xj, axis=-1, keepdims=True)
        gsq = gsq + jnp.sum(xj * xj, axis=-1, keepdims=True)
        acc = acc + _mm(xj, a_ref[j])
    inv = 1.0 / (4.0 * C)
    mu = gsum * inv
    var = gsq * inv - mu * mu
    rstd = lax.rsqrt(var + 1e-5)
    return rstd * (acc - mu * cg_ref[...]) + cb_ref[...]


# ------------------------------------------------------------ fused kernel

def make_fused_kernel(cfg):
    """cfg is pure-Python static structure: stages -> merge flag + per-block (nh, extra_norm)."""
    def kernel(*refs):
        o_ref = refs[-1]
        it = iter(refs[:-1])
        nx = lambda: next(it)

        # --- patch embed (Conv1d k=s=patch expressed as matmul) + LayerNorm
        x_in = nx()
        pe_w, pe_b, pe_g, pe_be = nx(), nx(), nx(), nx()
        x = _layernorm(_mm(x_in[0], pe_w[...]) + pe_b[...], pe_g[...], pe_be[...])

        # --- stages
        for st in cfg['stages']:
            if st['merge']:
                p_ref, a_ref, cg_ref, cb_ref = nx(), nx(), nx(), nx()
                x = _patch_merge(x, p_ref, a_ref, cg_ref, cb_ref)
            for bk in st['blocks']:
                rf = {k: nx() for k in _BLOCK_KEYS}
                if bk['extra_norm']:
                    rf['g3'] = nx()
                    rf['be3'] = nx()
                x = _attention(x, rf, bk['nh'])      # x + norm1(attn(x))
                x = _mlp(x, rf, bk['extra_norm'])    # x + norm2(mlp(x)) [+ norm3]

        # --- head: AdaptiveAvgPool1d(1) over L + classifier
        hw, hb = nx(), nx()
        L = x.shape[0]
        pooled = jnp.sum(x, axis=0, keepdims=True) * (1.0 / L)     # (1, C)
        o_ref[0] = (_mm(pooled, hw[...]) + hb[...]).astype(o_ref.dtype)
    return kernel


def _const_spec(a):
    nd = a.ndim
    return pl.BlockSpec(a.shape, lambda i, _n=nd: (0,) * _n)


def fft_forward(x, prep):
    # x: (B, Cin, L) NCL spectrum input
    B, Cin, L = x.shape
    patch = prep['patch_size']
    G = L // patch
    # Conv1d(kernel=stride=patch) == patch-flatten + matmul (one tiny XLA op).
    xp = x.reshape(B, Cin, G, patch).transpose(0, 2, 1, 3).reshape(B, G, Cin * patch)
    arrays = prep['arrays']
    NC = prep['num_classes']
    out = pl.pallas_call(
        make_fused_kernel(prep['cfg']),
        out_shape=jax.ShapeDtypeStruct((B, 1, NC), jnp.float32),
        grid=(B,),
        in_specs=[pl.BlockSpec((1, G, Cin * patch), lambda i: (i, 0, 0))]
                 + [_const_spec(a) for a in arrays],
        out_specs=pl.BlockSpec((1, 1, NC), lambda i: (i, 0, 0)),
        compiler_params=pltpu.CompilerParams(
            dimension_semantics=("parallel",)),      # v7x: shard B over both TCs
    )(xp, *arrays)
    return out.reshape(B, NC)


# ------------------------------------------------ one-time parameter preparation

def relative_position_bias(W, blk):
    # data-independent meta-MLP positional bias (parameters only) -> hoisted to prep
    coords = jnp.stack([jnp.zeros((W,), jnp.float32),
                        jnp.arange(W, dtype=jnp.float32)], axis=0)      # (2, W)
    rel = coords[:, :, None] - coords[:, None, :]                        # (2, W, W)
    rel = jnp.transpose(rel, (1, 2, 0)).reshape(-1, 2)                   # (W*W, 2)
    rel_log = jnp.sign(rel) * jnp.log1p(jnp.abs(rel))
    h = jax.nn.relu(rel_log @ blk['meta1_w'] + blk['meta1_b'])
    out = h @ blk['meta2_w'] + blk['meta2_b']                            # (W*W, nh)
    return out.T.reshape(blk['nh'], W, W).astype(jnp.float32)


def _split_head_w(w, nh):
    C, cout = w.shape
    hd = cout // nh
    return w.reshape(C, nh, hd).transpose(1, 0, 2)           # (nh, C, hd)


def _split_head_b(b, nh):
    cout = b.shape[-1]
    hd = cout // nh
    return b.reshape(nh, 1, hd)                               # (nh, 1, hd)


def _prep_merge(gamma, beta, red_w, L_in):
    # merged[m, c*4+j] = x[4m+j, c]  (torch channel-major flatten)
    fourC, c_out = red_w.shape
    C = fourC // 4
    gw = gamma.reshape(fourC, 1) * red_w                      # gamma-folded weight
    A = gw.reshape(C, 4, c_out).transpose(1, 0, 2)            # A[j, c, :] = gw[c*4+j, :]
    cg = gamma.reshape(1, fourC) @ red_w                      # (1, 2C)
    cb = beta.reshape(1, fourC) @ red_w                       # (1, 2C)
    L4 = L_in // 4
    rows = jnp.arange(L4)[:, None]
    cols = jnp.arange(L_in)[None, :]
    P = jnp.stack([(cols == 4 * rows + j).astype(jnp.float32) for j in range(4)],
                  axis=0)                                     # (4, L4, L_in)
    return P, A, cg, cb


def prepare_params(params):
    """One-time transform of torch-style params into kernel-ready flat arrays.

    Hoists everything parameter-only out of the forward: per-head qkv/proj
    splits, clamped+exp'ed logit scale, meta-MLP relative-position bias and
    the gamma-folded patch-merge decomposition.
    """
    arrays = []
    cfg = {'stages': []}
    pe = params['patch_embed']
    arrays += [pe['w'], pe['b'], pe['gamma'], pe['beta']]
    res = params['grid_size']
    for stage in params['stages']:
        st_cfg = {'merge': stage['merge'] is not None, 'blocks': []}
        if stage['merge'] is not None:
            m = stage['merge']
            P, A, cg, cb = _prep_merge(m['gamma'], m['beta'], m['red_w'], res)
            arrays += [P, A, cg, cb]
            res = res // 4
        for blk in stage['blocks']:
            nh = blk['nh']
            C = blk['qkv_w'].shape[0]
            assert C % nh == 0
            hd = C // nh
            qkv_w, qkv_b = blk['qkv_w'], blk['qkv_b']
            entry = dict(
                qw=_split_head_w(qkv_w[:, 0:C], nh),
                qb=_split_head_b(qkv_b[:, 0:C], nh),
                kw=_split_head_w(qkv_w[:, C:2 * C], nh),
                kb=_split_head_b(qkv_b[:, C:2 * C], nh),
                vw=_split_head_w(qkv_w[:, 2 * C:3 * C], nh),
                vb=_split_head_b(qkv_b[:, 2 * C:3 * C], nh),
                ls=jnp.exp(jnp.minimum(blk['logit_scale'], math.log(1.0 / 0.01))),
                bias=relative_position_bias(res, blk),
                pw=blk['proj_w'].reshape(nh, hd, C),
                pb=blk['proj_b'],
                g1=blk['g1'], b1=blk['b1'],
                w1=blk['mlp_w1'], b1m=blk['mlp_b1'],
                w2=blk['mlp_w2'], b2m=blk['mlp_b2'],
                g2=blk['g2'], be2=blk['be2'])
            arrays += [entry[k] for k in _BLOCK_KEYS]
            if blk['extra_norm']:
                arrays += [blk['g3'], blk['be3']]
            st_cfg['blocks'].append({'nh': nh, 'extra_norm': blk['extra_norm']})
        cfg['stages'].append(st_cfg)
    arrays += [params['head_w'], params['head_b']]
    return dict(arrays=arrays, cfg=cfg, patch_size=params['patch_size'],
                num_classes=params['head_w'].shape[1])


# ------------------------------------------------------------------ synthetic init

class KeyGen:
    def __init__(self, key):
        self.key = key

    def __call__(self):
        self.key, sub = jax.random.split(self.key)
        return sub


def xavier(key, shape):
    fan_in, fan_out = shape[0], shape[-1]
    lim = math.sqrt(6.0 / (fan_in + fan_out))
    return jax.random.uniform(key, shape, jnp.float32, minval=-lim, maxval=lim)


def small(key, shape):
    return 0.02 * jax.random.normal(key, shape, jnp.float32)


def make_block_params(kg, C, nh, L, mlp_ratio, extra_norm):
    Hm = int(C * mlp_ratio)
    meta_h = L * 4
    return dict(
        nh=nh, extra_norm=extra_norm,
        qkv_w=xavier(kg(), (C, 3 * C)), qkv_b=small(kg(), (1, 3 * C)),
        proj_w=xavier(kg(), (C, C)), proj_b=small(kg(), (1, C)),
        logit_scale=jnp.full((1, nh), math.log(10.0), jnp.float32),
        meta1_w=xavier(kg(), (2, meta_h)), meta1_b=small(kg(), (meta_h,)),
        meta2_w=xavier(kg(), (meta_h, nh)), meta2_b=small(kg(), (nh,)),
        # NOTE: module default init_values=0.0 would zero norm1/norm2 scales;
        # gamma=1 here (synthetic init) so the kernels compute non-trivially.
        g1=jnp.ones((1, C), jnp.float32), b1=jnp.zeros((1, C), jnp.float32),
        mlp_w1=xavier(kg(), (C, Hm)), mlp_b1=small(kg(), (1, Hm)),
        mlp_w2=xavier(kg(), (Hm, C)), mlp_b2=small(kg(), (1, C)),
        g2=jnp.ones((1, C), jnp.float32), be2=jnp.zeros((1, C), jnp.float32),
        g3=jnp.ones((1, C), jnp.float32), be3=jnp.zeros((1, C), jnp.float32),
    )


def init_params(key, *, spectrum=64, patch=4, in_chans=1, embed_dim=16,
                depths=(1, 1), num_heads=(2, 4), mlp_ratio=2.0, num_classes=8):
    kg = KeyGen(key)
    G = spectrum // patch
    params = dict(patch_size=patch, grid_size=G)
    params['patch_embed'] = dict(
        # (Cin*P, E) == reshaped Conv1d(kernel=stride=patch) weight
        w=xavier(kg(), (in_chans * patch, embed_dim)),
        b=small(kg(), (1, embed_dim)),
        gamma=jnp.ones((1, embed_dim), jnp.float32),
        beta=jnp.zeros((1, embed_dim), jnp.float32),
    )
    stages = []
    dim = embed_dim
    res = G
    n_stages = len(depths)
    for si, (depth, nh) in enumerate(zip(depths, num_heads)):
        stage = {}
        if si != 0:
            stage['merge'] = dict(
                gamma=jnp.ones((1, 4 * dim), jnp.float32),
                beta=jnp.zeros((1, 4 * dim), jnp.float32),
                red_w=xavier(kg(), (4 * dim, 2 * dim)),
            )
            dim = dim * 2
            res = res // 4
        else:
            stage['merge'] = None
        blocks = []
        for bi in range(depth):
            extra = (si + 1 == n_stages) and (bi + 1 == depth)  # extra_norm_stage on last stage
            blocks.append(make_block_params(kg, dim, nh, res, mlp_ratio, extra))
        stage['blocks'] = blocks
        stages.append(stage)
    params['stages'] = stages
    params['head_w'] = xavier(kg(), (dim, num_classes))   # synthetic (torch zero-inits head)
    params['head_b'] = small(kg(), (1, num_classes))
    return params


# ------------------------------------------------------------------------- main

if __name__ == "__main__":
    B, CIN, LSPEC = 2, 1, 64
    key = jax.random.PRNGKey(0)
    pkey, xkey = jax.random.split(key)
    params = init_params(pkey, spectrum=LSPEC, patch=4, in_chans=CIN,
                         embed_dim=16, depths=(1, 1), num_heads=(2, 4),
                         mlp_ratio=2.0, num_classes=8)
    prep = prepare_params(params)          # one-time: bias hoist, head splits, merge fold
    x = jax.random.normal(xkey, (B, CIN, LSPEC), jnp.float32)

    logits = fft_forward(x, prep)
    logits = jax.block_until_ready(logits)

    assert logits.shape == (B, 8), logits.shape
    assert bool(jnp.all(jnp.isfinite(logits)))
    print("KERNEL_OK")
</pallas_src>

<mosaic_0001>
module attributes {stable_mosaic.version = 11 : i64} {
  func.func @kernel(%arg0: i32, %arg1: memref<1x16x4xf32, #tpu.memory_space<vmem>>, %arg2: memref<4x16xf32, #tpu.memory_space<vmem>>, %arg3: memref<1x16xf32, #tpu.memory_space<vmem>>, %arg4: memref<1x16xf32, #tpu.memory_space<vmem>>, %arg5: memref<1x16xf32, #tpu.memory_space<vmem>>, %arg6: memref<2x16x8xf32, #tpu.memory_space<vmem>>, %arg7: memref<2x1x8xf32, #tpu.memory_space<vmem>>, %arg8: memref<2x16x8xf32, #tpu.memory_space<vmem>>, %arg9: memref<2x1x8xf32, #tpu.memory_space<vmem>>, %arg10: memref<2x16x8xf32, #tpu.memory_space<vmem>>, %arg11: memref<2x1x8xf32, #tpu.memory_space<vmem>>, %arg12: memref<1x2xf32, #tpu.memory_space<vmem>>, %arg13: memref<2x16x16xf32, #tpu.memory_space<vmem>>, %arg14: memref<2x8x16xf32, #tpu.memory_space<vmem>>, %arg15: memref<1x16xf32, #tpu.memory_space<vmem>>, %arg16: memref<1x16xf32, #tpu.memory_space<vmem>>, %arg17: memref<1x16xf32, #tpu.memory_space<vmem>>, %arg18: memref<16x32xf32, #tpu.memory_space<vmem>>, %arg19: memref<1x32xf32, #tpu.memory_space<vmem>>, %arg20: memref<32x16xf32, #tpu.memory_space<vmem>>, %arg21: memref<1x16xf32, #tpu.memory_space<vmem>>, %arg22: memref<1x16xf32, #tpu.memory_space<vmem>>, %arg23: memref<1x16xf32, #tpu.memory_space<vmem>>, %arg24: memref<4x4x16xf32, #tpu.memory_space<vmem>>, %arg25: memref<4x16x32xf32, #tpu.memory_space<vmem>>, %arg26: memref<1x32xf32, #tpu.memory_space<vmem>>, %arg27: memref<1x32xf32, #tpu.memory_space<vmem>>, %arg28: memref<4x32x8xf32, #tpu.memory_space<vmem>>, %arg29: memref<4x1x8xf32, #tpu.memory_space<vmem>>, %arg30: memref<4x32x8xf32, #tpu.memory_space<vmem>>, %arg31: memref<4x1x8xf32, #tpu.memory_space<vmem>>, %arg32: memref<4x32x8xf32, #tpu.memory_space<vmem>>, %arg33: memref<4x1x8xf32, #tpu.memory_space<vmem>>, %arg34: memref<1x4xf32, #tpu.memory_space<vmem>>, %arg35: memref<4x4x4xf32, #tpu.memory_space<vmem>>, %arg36: memref<4x8x32xf32, #tpu.memory_space<vmem>>, %arg37: memref<1x32xf32, #tpu.memory_space<vmem>>, %arg38: memref<1x32xf32, #tpu.memory_space<vmem>>, %arg39: memref<1x32xf32, #tpu.memory_space<vmem>>, %arg40: memref<32x64xf32, #tpu.memory_space<vmem>>, %arg41: memref<1x64xf32, #tpu.memory_space<vmem>>, %arg42: memref<64x32xf32, #tpu.memory_space<vmem>>, %arg43: memref<1x32xf32, #tpu.memory_space<vmem>>, %arg44: memref<1x32xf32, #tpu.memory_space<vmem>>, %arg45: memref<1x32xf32, #tpu.memory_space<vmem>>, %arg46: memref<1x32xf32, #tpu.memory_space<vmem>>, %arg47: memref<1x32xf32, #tpu.memory_space<vmem>>, %arg48: memref<32x8xf32, #tpu.memory_space<vmem>>, %arg49: memref<1x8xf32, #tpu.memory_space<vmem>>, %arg50: memref<1x1x8xf32, #tpu.memory_space<vmem>>) attributes {dimension_semantics = [#tpu.dimension_semantics<parallel>], iteration_bounds = array<i64: 2>, scalar_prefetch = 0 : i64, scratch_operands = 0 : i64, tpu.core_type = #tpu.core_type<tc>, window_params = [{transform_indices = @transform_0, window_bounds = array<i64: 1, 16, 4>}, {pipeline_mode = #tpu.pipeline_mode<synchronous>, transform_indices = @transform_1, window_bounds = array<i64: 4, 16>}, {pipeline_mode = #tpu.pipeline_mode<synchronous>, transform_indices = @transform_2, window_bounds = array<i64: 1, 16>}, {pipeline_mode = #tpu.pipeline_mode<synchronous>, transform_indices = @transform_3, window_bounds = array<i64: 1, 16>}, {pipeline_mode = #tpu.pipeline_mode<synchronous>, transform_indices = @transform_4, window_bounds = array<i64: 1, 16>}, {pipeline_mode = #tpu.pipeline_mode<synchronous>, transform_indices = @transform_5, window_bounds = array<i64: 2, 16, 8>}, {pipeline_mode = #tpu.pipeline_mode<synchronous>, transform_indices = @transform_6, window_bounds = array<i64: 2, 1, 8>}, {pipeline_mode = #tpu.pipeline_mode<synchronous>, transform_indices = @transform_7, window_bounds = array<i64: 2, 16, 8>}, {pipeline_mode = #tpu.pipeline_mode<synchronous>, transform_indices = @transform_8, window_bounds = array<i64: 2, 1, 8>}, {pipeline_mode = #tpu.pipeline_mode<synchronous>, transform_indices = @transform_9, window_bounds = array<i64: 2, 16, 8>}, {pipeline_mode = #tpu.pipeline_mode<synchronous>, transform_indices = @transform_10, window_bounds = array<i64: 2, 1, 8>}, {pipeline_mode = #tpu.pipeline_mode<synchronous>, transform_indices = @transform_11, window_bounds = array<i64: 1, 2>}, {pipeline_mode = #tpu.pipeline_mode<synchronous>, transform_indices = @transform_12, window_bounds = array<i64: 2, 16, 16>}, {pipeline_mode = #tpu.pipeline_mode<synchronous>, transform_indices = @transform_13, window_bounds = array<i64: 2, 8, 16>}, {pipeline_mode = #tpu.pipeline_mode<synchronous>, transform_indices = @transform_14, window_bounds = array<i64: 1, 16>}, {pipeline_mode = #tpu.pipeline_mode<synchronous>, transform_indices = @transform_15, window_bounds = array<i64: 1, 16>}, {pipeline_mode = #tpu.pipeline_mode<synchronous>, transform_indices = @transform_16, window_bounds = array<i64: 1, 16>}, {pipeline_mode = #tpu.pipeline_mode<synchronous>, transform_indices = @transform_17, window_bounds = array<i64: 16, 32>}, {pipeline_mode = #tpu.pipeline_mode<synchronous>, transform_indices = @transform_18, window_bounds = array<i64: 1, 32>}, {pipeline_mode = #tpu.pipeline_mode<synchronous>, transform_indices = @transform_19, window_bounds = array<i64: 32, 16>}, {pipeline_mode = #tpu.pipeline_mode<synchronous>, transform_indices = @transform_20, window_bounds = array<i64: 1, 16>}, {pipeline_mode = #tpu.pipeline_mode<synchronous>, transform_indices = @transform_21, window_bounds = array<i64: 1, 16>}, {pipeline_mode = #tpu.pipeline_mode<synchronous>, transform_indices = @transform_22, window_bounds = array<i64: 1, 16>}, {pipeline_mode = #tpu.pipeline_mode<synchronous>, transform_indices = @transform_23, window_bounds = array<i64: 4, 4, 16>}, {pipeline_mode = #tpu.pipeline_mode<synchronous>, transform_indices = @transform_24, window_bounds = array<i64: 4, 16, 32>}, {pipeline_mode = #tpu.pipeline_mode<synchronous>, transform_indices = @transform_25, window_bounds = array<i64: 1, 32>}, {pipeline_mode = #tpu.pipeline_mode<synchronous>, transform_indices = @transform_26, window_bounds = array<i64: 1, 32>}, {pipeline_mode = #tpu.pipeline_mode<synchronous>, transform_indices = @transform_27, window_bounds = array<i64: 4, 32, 8>}, {pipeline_mode = #tpu.pipeline_mode<synchronous>, transform_indices = @transform_28, window_bounds = array<i64: 4, 1, 8>}, {pipeline_mode = #tpu.pipeline_mode<synchronous>, transform_indices = @transform_29, window_bounds = array<i64: 4, 32, 8>}, {pipeline_mode = #tpu.pipeline_mode<synchronous>, transform_indices = @transform_30, window_bounds = array<i64: 4, 1, 8>}, {pipeline_mode = #tpu.pipeline_mode<synchronous>, transform_indices = @transform_31, window_bounds = array<i64: 4, 32, 8>}, {pipeline_mode = #tpu.pipeline_mode<synchronous>, transform_indices = @transform_32, window_bounds = array<i64: 4, 1, 8>}, {pipeline_mode = #tpu.pipeline_mode<synchronous>, transform_indices = @transform_33, window_bounds = array<i64: 1, 4>}, {pipeline_mode = #tpu.pipeline_mode<synchronous>, transform_indices = @transform_34, window_bounds = array<i64: 4, 4, 4>}, {pipeline_mode = #tpu.pipeline_mode<synchronous>, transform_indices = @transform_35, window_bounds = array<i64: 4, 8, 32>}, {pipeline_mode = #tpu.pipeline_mode<synchronous>, transform_indices = @transform_36, window_bounds = array<i64: 1, 32>}, {pipeline_mode = #tpu.pipeline_mode<synchronous>, transform_indices = @transform_37, window_bounds = array<i64: 1, 32>}, {pipeline_mode = #tpu.pipeline_mode<synchronous>, transform_indices = @transform_38, window_bounds = array<i64: 1, 32>}, {pipeline_mode = #tpu.pipeline_mode<synchronous>, transform_indices = @transform_39, window_bounds = array<i64: 32, 64>}, {pipeline_mode = #tpu.pipeline_mode<synchronous>, transform_indices = @transform_40, window_bounds = array<i64: 1, 64>}, {pipeline_mode = #tpu.pipeline_mode<synchronous>, transform_indices = @transform_41, window_bounds = array<i64: 64, 32>}, {pipeline_mode = #tpu.pipeline_mode<synchronous>, transform_indices = @transform_42, window_bounds = array<i64: 1, 32>}, {pipeline_mode = #tpu.pipeline_mode<synchronous>, transform_indices = @transform_43, window_bounds = array<i64: 1, 32>}, {pipeline_mode = #tpu.pipeline_mode<synchronous>, transform_indices = @transform_44, window_bounds = array<i64: 1, 32>}, {pipeline_mode = #tpu.pipeline_mode<synchronous>, transform_indices = @transform_45, window_bounds = array<i64: 1, 32>}, {pipeline_mode = #tpu.pipeline_mode<synchronous>, transform_indices = @transform_46, window_bounds = array<i64: 1, 32>}, {pipeline_mode = #tpu.pipeline_mode<synchronous>, transform_indices = @transform_47, window_bounds = array<i64: 32, 8>}, {pipeline_mode = #tpu.pipeline_mode<synchronous>, transform_indices = @transform_48, window_bounds = array<i64: 1, 8>}, {transform_indices = @transform_49, window_bounds = array<i64: 1, 1, 8>}]} {
    %c0 = arith.constant 0 : index
    %c0_0 = arith.constant 0 : index
    %c0_1 = arith.constant 0 : index
    %0 = vector.load %arg1[%c0, %c0_0, %c0_1] : memref<1x16x4xf32, #tpu.memory_space<vmem>>, vector<1x16x4xf32>
    %1 = vector.shape_cast %0 : vector<1x16x4xf32> to vector<16x4xf32>
    %c0_2 = arith.constant 0 : index
    %c0_3 = arith.constant 0 : index
    %2 = vector.load %arg2[%c0_2, %c0_3] : memref<4x16xf32, #tpu.memory_space<vmem>>, vector<4x16xf32>
    %3 = arith.truncf %1 : vector<16x4xf32> to vector<16x4xbf16>
    %4 = arith.truncf %2 : vector<4x16xf32> to vector<4x16xbf16>
    %cst = arith.constant dense<0.000000e+00> : vector<16x16xf32>
    %5 = tpu.matmul %3, %4, %cst {dimension_numbers = #tpu.dot_dimension_numbers<[1], [0], [0], [1], [0, 0, 1, 1], [], []>} : vector<16x4xbf16>, vector<4x16xbf16>, vector<16x16xf32> -> vector<16x16xf32>
    %c0_4 = arith.constant 0 : index
    %c0_5 = arith.constant 0 : index
    %6 = vector.load %arg3[%c0_4, %c0_5] : memref<1x16xf32, #tpu.memory_space<vmem>>, vector<1x16xf32>
    %7 = vector.broadcast %6 : vector<1x16xf32> to vector<16x16xf32>
    %8 = arith.addf %5, %7 : vector<16x16xf32>
    %c0_6 = arith.constant 0 : index
    %c0_7 = arith.constant 0 : index
    %9 = vector.load %arg4[%c0_6, %c0_7] : memref<1x16xf32, #tpu.memory_space<vmem>>, vector<1x16xf32>
    %c0_8 = arith.constant 0 : index
    %c0_9 = arith.constant 0 : index
    %10 = vector.load %arg5[%c0_8, %c0_9] : memref<1x16xf32, #tpu.memory_space<vmem>>, vector<1x16xf32>
    %cst_10 = arith.constant dense<0.000000e+00> : vector<16xf32>
    %11 = vector.multi_reduction <add>, %8, %cst_10 [1] : vector<16x16xf32> to vector<16xf32>
    %12 = vector.shape_cast %11 : vector<16xf32> to vector<16x1xf32>
    %cst_11 = arith.constant 1.600000e+01 : f32
    %13 = vector.broadcast %cst_11 : f32 to vector<16x1xf32>
    %14 = arith.divf %12, %13 : vector<16x1xf32>
    %15 = vector.broadcast %14 : vector<16x1xf32> to vector<16x16xf32>
    %16 = arith.subf %8, %15 : vector<16x16xf32>
    %17 = arith.mulf %16, %16 : vector<16x16xf32>
    %cst_12 = arith.constant dense<0.000000e+00> : vector<16xf32>
    %18 = vector.multi_reduction <add>, %17, %cst_12 [1] : vector<16x16xf32> to vector<16xf32>
    %19 = vector.shape_cast %18 : vector<16xf32> to vector<16x1xf32>
    %cst_13 = arith.constant 1.600000e+01 : f32
    %20 = vector.broadcast %cst_13 : f32 to vector<16x1xf32>
    %21 = arith.divf %19, %20 : vector<16x1xf32>
    %cst_14 = arith.constant 9.99999974E-6 : f32
    %22 = vector.broadcast %cst_14 : f32 to vector<16x1xf32>
    %23 = arith.addf %21, %22 : vector<16x1xf32>
    %24 = math.rsqrt %23 : vector<16x1xf32>
    %25 = vector.broadcast %24 : vector<16x1xf32> to vector<16x16xf32>
    %26 = arith.mulf %16, %25 : vector<16x16xf32>
    %27 = vector.broadcast %9 : vector<1x16xf32> to vector<16x16xf32>
    %28 = arith.mulf %26, %27 : vector<16x16xf32>
    %29 = vector.broadcast %10 : vector<1x16xf32> to vector<16x16xf32>
    %30 = arith.addf %28, %29 : vector<16x16xf32>
    %c0_15 = arith.constant 0 : index
    %c0_16 = arith.constant 0 : index
    %31 = vector.load %arg12[%c0_15, %c0_16] : memref<1x2xf32, #tpu.memory_space<vmem>>, vector<1x2xf32>
    %cst_17 = arith.constant 0.000000e+00 : f32
    %32 = vector.broadcast %cst_17 : f32 to vector<16x16xf32>
    %c0_18 = arith.constant 0 : index
    %c0_19 = arith.constant 0 : index
    %c0_20 = arith.constant 0 : index
    %33 = vector.load %arg6[%c0_18, %c0_19, %c0_20] : memref<2x16x8xf32, #tpu.memory_space<vmem>>, vector<1x16x8xf32>
    %34 = vector.shape_cast %33 : vector<1x16x8xf32> to vector<16x8xf32>
    %35 = arith.truncf %30 : vector<16x16xf32> to vector<16x16xbf16>
    %36 = arith.truncf %34 : vector<16x8xf32> to vector<16x8xbf16>
    %cst_21 = arith.constant dense<0.000000e+00> : vector<16x8xf32>
    %37 = tpu.matmul %35, %36, %cst_21 {dimension_numbers = #tpu.dot_dimension_numbers<[1], [0], [0], [1], [0, 0, 1, 1], [], []>} : vector<16x16xbf16>, vector<16x8xbf16>, vector<16x8xf32> -> vector<16x8xf32>
    %c0_22 = arith.constant 0 : index
    %c0_23 = arith.constant 0 : index
    %c0_24 = arith.constant 0 : index
    %38 = vector.load %arg7[%c0_22, %c0_23, %c0_24] : memref<2x1x8xf32, #tpu.memory_space<vmem>>, vector<1x1x8xf32>
    %39 = vector.shape_cast %38 : vector<1x1x8xf32> to vector<1x8xf32>
    %40 = vector.broadcast %39 : vector<1x8xf32> to vector<16x8xf32>
    %41 = arith.addf %37, %40 : vector<16x8xf32>
    %c0_25 = arith.constant 0 : index
    %c0_26 = arith.constant 0 : index
    %c0_27 = arith.constant 0 : index
    %42 = vector.load %arg8[%c0_25, %c0_26, %c0_27] : memref<2x16x8xf32, #tpu.memory_space<vmem>>, vector<1x16x8xf32>
    %43 = vector.shape_cast %42 : vector<1x16x8xf32> to vector<16x8xf32>
    %44 = arith.truncf %30 : vector<16x16xf32> to vector<16x16xbf16>
    %45 = arith.truncf %43 : vector<16x8xf32> to vector<16x8xbf16>
    %cst_28 = arith.constant dense<0.000000e+00> : vector<16x8xf32>
    %46 = tpu.matmul %44, %45, %cst_28 {dimension_numbers = #tpu.dot_dimension_numbers<[1], [0], [0], [1], [0, 0, 1, 1], [], []>} : vector<16x16xbf16>, vector<16x8xbf16>, vector<16x8xf32> -> vector<16x8xf32>
    %c0_29 = arith.constant 0 : index
    %c0_30 = arith.constant 0 : index
    %c0_31 = arith.constant 0 : index
    %47 = vector.load %arg9[%c0_29, %c0_30, %c0_31] : memref<2x1x8xf32, #tpu.memory_space<vmem>>, vector<1x1x8xf32>
    %48 = vector.shape_cast %47 : vector<1x1x8xf32> to vector<1x8xf32>
    %49 = vector.broadcast %48 : vector<1x8xf32> to vector<16x8xf32>
    %50 = arith.addf %46, %49 : vector<16x8xf32>
    %c0_32 = arith.constant 0 : index
    %c0_33 = arith.constant 0 : index
    %c0_34 = arith.constant 0 : index
    %51 = vector.load %arg10[%c0_32, %c0_33, %c0_34] : memref<2x16x8xf32, #tpu.memory_space<vmem>>, vector<1x16x8xf32>
    %52 = vector.shape_cast %51 : vector<1x16x8xf32> to vector<16x8xf32>
    %53 = arith.truncf %30 : vector<16x16xf32> to vector<16x16xbf16>
    %54 = arith.truncf %52 : vector<16x8xf32> to vector<16x8xbf16>
    %cst_35 = arith.constant dense<0.000000e+00> : vector<16x8xf32>
    %55 = tpu.matmul %53, %54, %cst_35 {dimension_numbers = #tpu.dot_dimension_numbers<[1], [0], [0], [1], [0, 0, 1, 1], [], []>} : vector<16x16xbf16>, vector<16x8xbf16>, vector<16x8xf32> -> vector<16x8xf32>
    %c0_36 = arith.constant 0 : index
    %c0_37 = arith.constant 0 : index
    %c0_38 = arith.constant 0 : index
    %56 = vector.load %arg11[%c0_36, %c0_37, %c0_38] : memref<2x1x8xf32, #tpu.memory_space<vmem>>, vector<1x1x8xf32>
    %57 = vector.shape_cast %56 : vector<1x1x8xf32> to vector<1x8xf32>
    %58 = vector.broadcast %57 : vector<1x8xf32> to vector<16x8xf32>
    %59 = arith.addf %55, %58 : vector<16x8xf32>
    %60 = arith.mulf %41, %41 : vector<16x8xf32>
    %cst_39 = arith.constant dense<0.000000e+00> : vector<16xf32>
    %61 = vector.multi_reduction <add>, %60, %cst_39 [1] : vector<16x8xf32> to vector<16xf32>
    %62 = vector.shape_cast %61 : vector<16xf32> to vector<16x1xf32>
    %cst_40 = arith.constant 1.000000e-24 : f32
    %63 = vector.broadcast %cst_40 : f32 to vector<16x1xf32>
    %64 = arith.maximumf %62, %63 : vector<16x1xf32>
    %65 = math.rsqrt %64 : vector<16x1xf32>
    %66 = vector.broadcast %65 : vector<16x1xf32> to vector<16x8xf32>
    %67 = arith.mulf %41, %66 : vector<16x8xf32>
    %68 = arith.mulf %50, %50 : vector<16x8xf32>
    %cst_41 = arith.constant dense<0.000000e+00> : vector<16xf32>
    %69 = vector.multi_reduction <add>, %68, %cst_41 [1] : vector<16x8xf32> to vector<16xf32>
    %70 = vector.shape_cast %69 : vector<16xf32> to vector<16x1xf32>
    %cst_42 = arith.constant 1.000000e-24 : f32
    %71 = vector.broadcast %cst_42 : f32 to vector<16x1xf32>
    %72 = arith.maximumf %70, %71 : vector<16x1xf32>
    %73 = math.rsqrt %72 : vector<16x1xf32>
    %74 = vector.broadcast %73 : vector<16x1xf32> to vector<16x8xf32>
    %75 = arith.mulf %50, %74 : vector<16x8xf32>
    %76 = arith.truncf %67 : vector<16x8xf32> to vector<16x8xbf16>
    %77 = arith.truncf %75 : vector<16x8xf32> to vector<16x8xbf16>
    %cst_43 = arith.constant dense<0.000000e+00> : vector<16x16xf32>
    %78 = tpu.matmul %76, %77, %cst_43 {dimension_numbers = #tpu.dot_dimension_numbers<[1], [1], [0], [0], [0, 0, 1, 0], [], []>} : vector<16x8xbf16>, vector<16x8xbf16>, vector<16x16xf32> -> vector<16x16xf32>
    %79 = vector.extract_strided_slice %31 {offsets = [0, 0], sizes = [1, 1], strides = [1, 1]} : vector<1x2xf32> to vector<1x1xf32>
    %80 = vector.broadcast %79 : vector<1x1xf32> to vector<16x16xf32>
    %81 = arith.mulf %78, %80 : vector<16x16xf32>
    %c0_44 = arith.constant 0 : index
    %c0_45 = arith.constant 0 : index
    %c0_46 = arith.constant 0 : index
    %82 = vector.load %arg13[%c0_44, %c0_45, %c0_46] : memref<2x16x16xf32, #tpu.memory_space<vmem>>, vector<1x16x16xf32>
    %83 = vector.shape_cast %82 : vector<1x16x16xf32> to vector<16x16xf32>
    %84 = arith.addf %81, %83 : vector<16x16xf32>
    %cst_47 = arith.constant dense<0xFF800000> : vector<16xf32>
    %85 = vector.multi_reduction <maximumf>, %84, %cst_47 [1] : vector<16x16xf32> to vector<16xf32>
    %86 = vector.shape_cast %85 : vector<16xf32> to vector<16x1xf32>
    %87 = vector.broadcast %86 : vector<16x1xf32> to vector<16x16xf32>
    %88 = arith.subf %84, %87 : vector<16x16xf32>
    %89 = math.exp %88 : vector<16x16xf32>
    %cst_48 = arith.constant dense<0.000000e+00> : vector<16xf32>
    %90 = vector.multi_reduction <add>, %89, %cst_48 [1] : vector<16x16xf32> to vector<16xf32>
    %91 = vector.shape_cast %90 : vector<16xf32> to vector<16x1xf32>
    %92 = tpu.reciprocal %91 {approx = true} : vector<16x1xf32> -> vector<16x1xf32>
    %93 = vector.broadcast %92 : vector<16x1xf32> to vector<16x16xf32>
    %94 = arith.mulf %89, %93 : vector<16x16xf32>
    %95 = arith.truncf %94 : vector<16x16xf32> to vector<16x16xbf16>
    %96 = arith.truncf %59 : vector<16x8xf32> to vector<16x8xbf16>
    %cst_49 = arith.constant dense<0.000000e+00> : vector<16x8xf32>
    %97 = tpu.matmul %95, %96, %cst_49 {dimension_numbers = #tpu.dot_dimension_numbers<[1], [0], [0], [1], [0, 0, 1, 1], [], []>} : vector<16x16xbf16>, vector<16x8xbf16>, vector<16x8xf32> -> vector<16x8xf32>
    %c0_50 = arith.constant 0 : index
    %c0_51 = arith.constant 0 : index
    %c0_52 = arith.constant 0 : index
    %98 = vector.load %arg14[%c0_50, %c0_51, %c0_52] : memref<2x8x16xf32, #tpu.memory_space<vmem>>, vector<1x8x16xf32>
    %99 = vector.shape_cast %98 : vector<1x8x16xf32> to vector<8x16xf32>
    %100 = arith.truncf %97 : vector<16x8xf32> to vector<16x8xbf16>
    %101 = arith.truncf %99 : vector<8x16xf32> to vector<8x16xbf16>
    %cst_53 = arith.constant dense<0.000000e+00> : vector<16x16xf32>
    %102 = tpu.matmul %100, %101, %cst_53 {dimension_numbers = #tpu.dot_dimension_numbers<[1], [0], [0], [1], [0, 0, 1, 1], [], []>} : vector<16x8xbf16>, vector<8x16xbf16>, vector<16x16xf32> -> vector<16x16xf32>
    %103 = arith.addf %32, %102 : vector<16x16xf32>
    %c1 = arith.constant 1 : index
    %c0_54 = arith.constant 0 : index
    %c0_55 = arith.constant 0 : index
    %104 = vector.load %arg6[%c1, %c0_54, %c0_55] : memref<2x16x8xf32, #tpu.memory_space<vmem>>, vector<1x16x8xf32>
    %105 = vector.shape_cast %104 : vector<1x16x8xf32> to vector<16x8xf32>
    %106 = arith.truncf %30 : vector<16x16xf32> to vector<16x16xbf16>
    %107 = arith.truncf %105 : vector<16x8xf32> to vector<16x8xbf16>
    %cst_56 = arith.constant dense<0.000000e+00> : vector<16x8xf32>
    %108 = tpu.matmul %106, %107, %cst_56 {dimension_numbers = #tpu.dot_dimension_numbers<[1], [0], [0], [1], [0, 0, 1, 1], [], []>} : vector<16x16xbf16>, vector<16x8xbf16>, vector<16x8xf32> -> vector<16x8xf32>
    %c1_57 = arith.constant 1 : index
    %c0_58 = arith.constant 0 : index
    %c0_59 = arith.constant 0 : index
    %109 = vector.load %arg7[%c1_57, %c0_58, %c0_59] : memref<2x1x8xf32, #tpu.memory_space<vmem>>, vector<1x1x8xf32>
    %110 = vector.shape_cast %109 : vector<1x1x8xf32> to vector<1x8xf32>
    %111 = vector.broadcast %110 : vector<1x8xf32> to vector<16x8xf32>
    %112 = arith.addf %108, %111 : vector<16x8xf32>
    %c1_60 = arith.constant 1 : index
    %c0_61 = arith.constant 0 : index
    %c0_62 = arith.constant 0 : index
    %113 = vector.load %arg8[%c1_60, %c0_61, %c0_62] : memref<2x16x8xf32, #tpu.memory_space<vmem>>, vector<1x16x8xf32>
    %114 = vector.shape_cast %113 : vector<1x16x8xf32> to vector<16x8xf32>
    %115 = arith.truncf %30 : vector<16x16xf32> to vector<16x16xbf16>
    %116 = arith.truncf %114 : vector<16x8xf32> to vector<16x8xbf16>
    %cst_63 = arith.constant dense<0.000000e+00> : vector<16x8xf32>
    %117 = tpu.matmul %115, %116, %cst_63 {dimension_numbers = #tpu.dot_dimension_numbers<[1], [0], [0], [1], [0, 0, 1, 1], [], []>} : vector<16x16xbf16>, vector<16x8xbf16>, vector<16x8xf32> -> vector<16x8xf32>
    %c1_64 = arith.constant 1 : index
    %c0_65 = arith.constant 0 : index
    %c0_66 = arith.constant 0 : index
    %118 = vector.load %arg9[%c1_64, %c0_65, %c0_66] : memref<2x1x8xf32, #tpu.memory_space<vmem>>, vector<1x1x8xf32>
    %119 = vector.shape_cast %118 : vector<1x1x8xf32> to vector<1x8xf32>
    %120 = vector.broadcast %119 : vector<1x8xf32> to vector<16x8xf32>
    %121 = arith.addf %117, %120 : vector<16x8xf32>
    %c1_67 = arith.constant 1 : index
    %c0_68 = arith.constant 0 : index
    %c0_69 = arith.constant 0 : index
    %122 = vector.load %arg10[%c1_67, %c0_68, %c0_69] : memref<2x16x8xf32, #tpu.memory_space<vmem>>, vector<1x16x8xf32>
    %123 = vector.shape_cast %122 : vector<1x16x8xf32> to vector<16x8xf32>
    %124 = arith.truncf %30 : vector<16x16xf32> to vector<16x16xbf16>
    %125 = arith.truncf %123 : vector<16x8xf32> to vector<16x8xbf16>
    %cst_70 = arith.constant dense<0.000000e+00> : vector<16x8xf32>
    %126 = tpu.matmul %124, %125, %cst_70 {dimension_numbers = #tpu.dot_dimension_numbers<[1], [0], [0], [1], [0, 0, 1, 1], [], []>} : vector<16x16xbf16>, vector<16x8xbf16>, vector<16x8xf32> -> vector<16x8xf32>
    %c1_71 = arith.constant 1 : index
    %c0_72 = arith.constant 0 : index
    %c0_73 = arith.constant 0 : index
    %127 = vector.load %arg11[%c1_71, %c0_72, %c0_73] : memref<2x1x8xf32, #tpu.memory_space<vmem>>, vector<1x1x8xf32>
    %128 = vector.shape_cast %127 : vector<1x1x8xf32> to vector<1x8xf32>
    %129 = vector.broadcast %128 : vector<1x8xf32> to vector<16x8xf32>
    %130 = arith.addf %126, %129 : vector<16x8xf32>
    %131 = arith.mulf %112, %112 : vector<16x8xf32>
    %cst_74 = arith.constant dense<0.000000e+00> : vector<16xf32>
    %132 = vector.multi_reduction <add>, %131, %cst_74 [1] : vector<16x8xf32> to vector<16xf32>
    %133 = vector.shape_cast %132 : vector<16xf32> to vector<16x1xf32>
    %cst_75 = arith.constant 1.000000e-24 : f32
    %134 = vector.broadcast %cst_75 : f32 to vector<16x1xf32>
    %135 = arith.maximumf %133, %134 : vector<16x1xf32>
    %136 = math.rsqrt %135 : vector<16x1xf32>
    %137 = vector.broadcast %136 : vector<16x1xf32> to vector<16x8xf32>
    %138 = arith.mulf %112, %137 : vector<16x8xf32>
    %139 = arith.mulf %121, %121 : vector<16x8xf32>
    %cst_76 = arith.constant dense<0.000000e+00> : vector<16xf32>
    %140 = vector.multi_reduction <add>, %139, %cst_76 [1] : vector<16x8xf32> to vector<16xf32>
    %141 = vector.shape_cast %140 : vector<16xf32> to vector<16x1xf32>
    %cst_77 = arith.constant 1.000000e-24 : f32
    %142 = vector.broadcast %cst_77 : f32 to vector<16x1xf32>
    %143 = arith.maximumf %141, %142 : vector<16x1xf32>
    %144 = math.rsqrt %143 : vector<16x1xf32>
    %145 = vector.broadcast %144 : vector<16x1xf32> to vector<16x8xf32>
    %146 = arith.mulf %121, %145 : vector<16x8xf32>
    %147 = arith.truncf %138 : vector<16x8xf32> to vector<16x8xbf16>
    %148 = arith.truncf %146 : vector<16x8xf32> to vector<16x8xbf16>
    %cst_78 = arith.constant dense<0.000000e+00> : vector<16x16xf32>
    %149 = tpu.matmul %147, %148, %cst_78 {dimension_numbers = #tpu.dot_dimension_numbers<[1], [1], [0], [0], [0, 0, 1, 0], [], []>} : vector<16x8xbf16>, vector<16x8xbf16>, vector<16x16xf32> -> vector<16x16xf32>
    %150 = vector.extract_strided_slice %31 {offsets = [0, 1], sizes = [1, 1], strides = [1, 1]} : vector<1x2xf32> to vector<1x1xf32>
    %151 = vector.broadcast %150 : vector<1x1xf32> to vector<16x16xf32>
    %152 = arith.mulf %149, %151 : vector<16x16xf32>
    %c1_79 = arith.constant 1 : index
    %c0_80 = arith.constant 0 : index
    %c0_81 = arith.constant 0 : index
    %153 = vector.load %arg13[%c1_79, %c0_80, %c0_81] : memref<2x16x16xf32, #tpu.memory_space<vmem>>, vector<1x16x16xf32>
    %154 = vector.shape_cast %153 : vector<1x16x16xf32> to vector<16x16xf32>
    %155 = arith.addf %152, %154 : vector<16x16xf32>
    %cst_82 = arith.constant dense<0xFF800000> : vector<16xf32>
    %156 = vector.multi_reduction <maximumf>, %155, %cst_82 [1] : vector<16x16xf32> to vector<16xf32>
    %157 = vector.shape_cast %156 : vector<16xf32> to vector<16x1xf32>
    %158 = vector.broadcast %157 : vector<16x1xf32> to vector<16x16xf32>
    %159 = arith.subf %155, %158 : vector<16x16xf32>
    %160 = math.exp %159 : vector<16x16xf32>
    %cst_83 = arith.constant dense<0.000000e+00> : vector<16xf32>
    %161 = vector.multi_reduction <add>, %160, %cst_83 [1] : vector<16x16xf32> to vector<16xf32>
    %162 = vector.shape_cast %161 : vector<16xf32> to vector<16x1xf32>
    %163 = tpu.reciprocal %162 {approx = true} : vector<16x1xf32> -> vector<16x1xf32>
    %164 = vector.broadcast %163 : vector<16x1xf32> to vector<16x16xf32>
    %165 = arith.mulf %160, %164 : vector<16x16xf32>
    %166 = arith.truncf %165 : vector<16x16xf32> to vector<16x16xbf16>
    %167 = arith.truncf %130 : vector<16x8xf32> to vector<16x8xbf16>
    %cst_84 = arith.constant dense<0.000000e+00> : vector<16x8xf32>
    %168 = tpu.matmul %166, %167, %cst_84 {dimension_numbers = #tpu.dot_dimension_numbers<[1], [0], [0], [1], [0, 0, 1, 1], [], []>} : vector<16x16xbf16>, vector<16x8xbf16>, vector<16x8xf32> -> vector<16x8xf32>
    %c1_85 = arith.constant 1 : index
    %c0_86 = arith.constant 0 : index
    %c0_87 = arith.constant 0 : index
    %169 = vector.load %arg14[%c1_85, %c0_86, %c0_87] : memref<2x8x16xf32, #tpu.memory_space<vmem>>, vector<1x8x16xf32>
    %170 = vector.shape_cast %169 : vector<1x8x16xf32> to vector<8x16xf32>
    %171 = arith.truncf %168 : vector<16x8xf32> to vector<16x8xbf16>
    %172 = arith.truncf %170 : vector<8x16xf32> to vector<8x16xbf16>
    %cst_88 = arith.constant dense<0.000000e+00> : vector<16x16xf32>
    %173 = tpu.matmul %171, %172, %cst_88 {dimension_numbers = #tpu.dot_dimension_numbers<[1], [0], [0], [1], [0, 0, 1, 1], [], []>} : vector<16x8xbf16>, vector<8x16xbf16>, vector<16x16xf32> -> vector<16x16xf32>
    %174 = arith.addf %103, %173 : vector<16x16xf32>
    %c0_89 = arith.constant 0 : index
    %c0_90 = arith.constant 0 : index
    %175 = vector.load %arg15[%c0_89, %c0_90] : memref<1x16xf32, #tpu.memory_space<vmem>>, vector<1x16xf32>
    %176 = vector.broadcast %175 : vector<1x16xf32> to vector<16x16xf32>
    %177 = arith.addf %174, %176 : vector<16x16xf32>
    %c0_91 = arith.constant 0 : index
    %c0_92 = arith.constant 0 : index
    %178 = vector.load %arg16[%c0_91, %c0_92] : memref<1x16xf32, #tpu.memory_space<vmem>>, vector<1x16xf32>
    %c0_93 = arith.constant 0 : index
    %c0_94 = arith.constant 0 : index
    %179 = vector.load %arg17[%c0_93, %c0_94] : memref<1x16xf32, #tpu.memory_space<vmem>>, vector<1x16xf32>
    %cst_95 = arith.constant dense<0.000000e+00> : vector<16xf32>
    %180 = vector.multi_reduction <add>, %177, %cst_95 [1] : vector<16x16xf32> to vector<16xf32>
    %181 = vector.shape_cast %180 : vector<16xf32> to vector<16x1xf32>
    %cst_96 = arith.constant 1.600000e+01 : f32
    %182 = vector.broadcast %cst_96 : f32 to vector<16x1xf32>
    %183 = arith.divf %181, %182 : vector<16x1xf32>
    %184 = vector.broadcast %183 : vector<16x1xf32> to vector<16x16xf32>
    %185 = arith.subf %177, %184 : vector<16x16xf32>
    %186 = arith.mulf %185, %185 : vector<16x16xf32>
    %cst_97 = arith.constant dense<0.000000e+00> : vector<16xf32>
    %187 = vector.multi_reduction <add>, %186, %cst_97 [1] : vector<16x16xf32> to vector<16xf32>
    %188 = vector.shape_cast %187 : vector<16xf32> to vector<16x1xf32>
    %cst_98 = arith.constant 1.600000e+01 : f32
    %189 = vector.broadcast %cst_98 : f32 to vector<16x1xf32>
    %190 = arith.divf %188, %189 : vector<16x1xf32>
    %cst_99 = arith.constant 9.99999974E-6 : f32
    %191 = vector.broadcast %cst_99 : f32 to vector<16x1xf32>
    %192 = arith.addf %190, %191 : vector<16x1xf32>
    %193 = math.rsqrt %192 : vector<16x1xf32>
    %194 = vector.broadcast %193 : vector<16x1xf32> to vector<16x16xf32>
    %195 = arith.mulf %185, %194 : vector<16x16xf32>
    %196 = vector.broadcast %178 : vector<1x16xf32> to vector<16x16xf32>
    %197 = arith.mulf %195, %196 : vector<16x16xf32>
    %198 = vector.broadcast %179 : vector<1x16xf32> to vector<16x16xf32>
    %199 = arith.addf %197, %198 : vector<16x16xf32>
    %200 = arith.addf %30, %199 : vector<16x16xf32>
    %c0_100 = arith.constant 0 : index
    %c0_101 = arith.constant 0 : index
    %201 = vector.load %arg18[%c0_100, %c0_101] : memref<16x32xf32, #tpu.memory_space<vmem>>, vector<16x32xf32>
    %202 = arith.truncf %200 : vector<16x16xf32> to vector<16x16xbf16>
    %203 = arith.truncf %201 : vector<16x32xf32> to vector<16x32xbf16>
    %cst_102 = arith.constant dense<0.000000e+00> : vector<16x32xf32>
    %204 = tpu.matmul %202, %203, %cst_102 {dimension_numbers = #tpu.dot_dimension_numbers<[1], [0], [0], [1], [0, 0, 1, 1], [], []>} : vector<16x16xbf16>, vector<16x32xbf16>, vector<16x32xf32> -> vector<16x32xf32>
    %c0_103 = arith.constant 0 : index
    %c0_104 = arith.constant 0 : index
    %205 = vector.load %arg19[%c0_103, %c0_104] : memref<1x32xf32, #tpu.memory_space<vmem>>, vector<1x32xf32>
    %206 = vector.broadcast %205 : vector<1x32xf32> to vector<16x32xf32>
    %207 = arith.addf %204, %206 : vector<16x32xf32>
    %cst_105 = arith.constant 5.000000e-01 : f32
    %208 = vector.broadcast %cst_105 : f32 to vector<16x32xf32>
    %209 = arith.mulf %208, %207 : vector<16x32xf32>
    %cst_106 = arith.constant 4.471500e-02 : f32
    %210 = vector.broadcast %cst_106 : f32 to vector<16x32xf32>
    %211 = arith.mulf %210, %207 : vector<16x32xf32>
    %212 = arith.mulf %211, %207 : vector<16x32xf32>
    %213 = arith.mulf %212, %207 : vector<16x32xf32>
    %214 = arith.addf %207, %213 : vector<16x32xf32>
    %cst_107 = arith.constant 0.797884583 : f32
    %215 = vector.broadcast %cst_107 : f32 to vector<16x32xf32>
    %216 = arith.mulf %215, %214 : vector<16x32xf32>
    %217 = math.tanh %216 : vector<16x32xf32>
    %cst_108 = arith.constant 1.000000e+00 : f32
    %218 = vector.broadcast %cst_108 : f32 to vector<16x32xf32>
    %219 = arith.addf %218, %217 : vector<16x32xf32>
    %220 = arith.mulf %209, %219 : vector<16x32xf32>
    %c0_109 = arith.constant 0 : index
    %c0_110 = arith.constant 0 : index
    %221 = vector.load %arg20[%c0_109, %c0_110] : memref<32x16xf32, #tpu.memory_space<vmem>>, vector<32x16xf32>
    %222 = arith.truncf %220 : vector<16x32xf32> to vector<16x32xbf16>
    %223 = arith.truncf %221 : vector<32x16xf32> to vector<32x16xbf16>
    %cst_111 = arith.constant dense<0.000000e+00> : vector<16x16xf32>
    %224 = tpu.matmul %222, %223, %cst_111 {dimension_numbers = #tpu.dot_dimension_numbers<[1], [0], [0], [1], [0, 0, 1, 1], [], []>} : vector<16x32xbf16>, vector<32x16xbf16>, vector<16x16xf32> -> vector<16x16xf32>
    %c0_112 = arith.constant 0 : index
    %c0_113 = arith.constant 0 : index
    %225 = vector.load %arg21[%c0_112, %c0_113] : memref<1x16xf32, #tpu.memory_space<vmem>>, vector<1x16xf32>
    %226 = vector.broadcast %225 : vector<1x16xf32> to vector<16x16xf32>
    %227 = arith.addf %224, %226 : vector<16x16xf32>
    %c0_114 = arith.constant 0 : index
    %c0_115 = arith.constant 0 : index
    %228 = vector.load %arg22[%c0_114, %c0_115] : memref<1x16xf32, #tpu.memory_space<vmem>>, vector<1x16xf32>
    %c0_116 = arith.constant 0 : index
    %c0_117 = arith.constant 0 : index
    %229 = vector.load %arg23[%c0_116, %c0_117] : memref<1x16xf32, #tpu.memory_space<vmem>>, vector<1x16xf32>
    %cst_118 = arith.constant dense<0.000000e+00> : vector<16xf32>
    %230 = vector.multi_reduction <add>, %227, %cst_118 [1] : vector<16x16xf32> to vector<16xf32>
    %231 = vector.shape_cast %230 : vector<16xf32> to vector<16x1xf32>
    %cst_119 = arith.constant 1.600000e+01 : f32
    %232 = vector.broadcast %cst_119 : f32 to vector<16x1xf32>
    %233 = arith.divf %231, %232 : vector<16x1xf32>
    %234 = vector.broadcast %233 : vector<16x1xf32> to vector<16x16xf32>
    %235 = arith.subf %227, %234 : vector<16x16xf32>
    %236 = arith.mulf %235, %235 : vector<16x16xf32>
    %cst_120 = arith.constant dense<0.000000e+00> : vector<16xf32>
    %237 = vector.multi_reduction <add>, %236, %cst_120 [1] : vector<16x16xf32> to vector<16xf32>
    %238 = vector.shape_cast %237 : vector<16xf32> to vector<16x1xf32>
    %cst_121 = arith.constant 1.600000e+01 : f32
    %239 = vector.broadcast %cst_121 : f32 to vector<16x1xf32>
    %240 = arith.divf %238, %239 : vector<16x1xf32>
    %cst_122 = arith.constant 9.99999974E-6 : f32
    %241 = vector.broadcast %cst_122 : f32 to vector<16x1xf32>
    %242 = arith.addf %240, %241 : vector<16x1xf32>
    %243 = math.rsqrt %242 : vector<16x1xf32>
    %244 = vector.broadcast %243 : vector<16x1xf32> to vector<16x16xf32>
    %245 = arith.mulf %235, %244 : vector<16x16xf32>
    %246 = vector.broadcast %228 : vector<1x16xf32> to vector<16x16xf32>
    %247 = arith.mulf %245, %246 : vector<16x16xf32>
    %248 = vector.broadcast %229 : vector<1x16xf32> to vector<16x16xf32>
    %249 = arith.addf %247, %248 : vector<16x16xf32>
    %250 = arith.addf %200, %249 : vector<16x16xf32>
    %cst_123 = arith.constant 0.000000e+00 : f32
    %251 = vector.broadcast %cst_123 : f32 to vector<4x32xf32>
    %cst_124 = arith.constant 0.000000e+00 : f32
    %252 = vector.broadcast %cst_124 : f32 to vector<4x1xf32>
    %cst_125 = arith.constant 0.000000e+00 : f32
    %253 = vector.broadcast %cst_125 : f32 to vector<4x1xf32>
    %c0_126 = arith.constant 0 : index
    %c0_127 = arith.constant 0 : index
    %c0_128 = arith.constant 0 : index
    %254 = vector.load %arg24[%c0_126, %c0_127, %c0_128] : memref<4x4x16xf32, #tpu.memory_space<vmem>>, vector<1x4x16xf32>
    %255 = vector.shape_cast %254 : vector<1x4x16xf32> to vector<4x16xf32>
    %cst_129 = arith.constant dense<0.000000e+00> : vector<4x16xf32>
    %256 = tpu.matmul %255, %250, %cst_129 {dimension_numbers = #tpu.dot_dimension_numbers<[1], [0], [0], [1], [0, 0, 1, 1], [], []>} : vector<4x16xf32>, vector<16x16xf32>, vector<4x16xf32> -> vector<4x16xf32>
    %cst_130 = arith.constant dense<0.000000e+00> : vector<4xf32>
    %257 = vector.multi_reduction <add>, %256, %cst_130 [1] : vector<4x16xf32> to vector<4xf32>
    %258 = vector.shape_cast %257 : vector<4xf32> to vector<4x1xf32>
    %259 = arith.addf %252, %258 : vector<4x1xf32>
    %260 = arith.mulf %256, %256 : vector<4x16xf32>
    %cst_131 = arith.constant dense<0.000000e+00> : vector<4xf32>
    %261 = vector.multi_reduction <add>, %260, %cst_131 [1] : vector<4x16xf32> to vector<4xf32>
    %262 = vector.shape_cast %261 : vector<4xf32> to vector<4x1xf32>
    %263 = arith.addf %253, %262 : vector<4x1xf32>
    %c0_132 = arith.constant 0 : index
    %c0_133 = arith.constant 0 : index
    %c0_134 = arith.constant 0 : index
    %264 = vector.load %arg25[%c0_132, %c0_133, %c0_134] : memref<4x16x32xf32, #tpu.memory_space<vmem>>, vector<1x16x32xf32>
    %265 = vector.shape_cast %264 : vector<1x16x32xf32> to vector<16x32xf32>
    %266 = arith.truncf %256 : vector<4x16xf32> to vector<4x16xbf16>
    %267 = arith.truncf %265 : vector<16x32xf32> to vector<16x32xbf16>
    %cst_135 = arith.constant dense<0.000000e+00> : vector<4x32xf32>
    %268 = tpu.matmul %266, %267, %cst_135 {dimension_numbers = #tpu.dot_dimension_numbers<[1], [0], [0], [1], [0, 0, 1, 1], [], []>} : vector<4x16xbf16>, vector<16x32xbf16>, vector<4x32xf32> -> vector<4x32xf32>
    %269 = arith.addf %251, %268 : vector<4x32xf32>
    %c1_136 = arith.constant 1 : index
    %c0_137 = arith.constant 0 : index
    %c0_138 = arith.constant 0 : index
    %270 = vector.load %arg24[%c1_136, %c0_137, %c0_138] : memref<4x4x16xf32, #tpu.memory_space<vmem>>, vector<1x4x16xf32>
    %271 = vector.shape_cast %270 : vector<1x4x16xf32> to vector<4x16xf32>
    %cst_139 = arith.constant dense<0.000000e+00> : vector<4x16xf32>
    %272 = tpu.matmul %271, %250, %cst_139 {dimension_numbers = #tpu.dot_dimension_numbers<[1], [0], [0], [1], [0, 0, 1, 1], [], []>} : vector<4x16xf32>, vector<16x16xf32>, vector<4x16xf32> -> vector<4x16xf32>
    %cst_140 = arith.constant dense<0.000000e+00> : vector<4xf32>
    %273 = vector.multi_reduction <add>, %272, %cst_140 [1] : vector<4x16xf32> to vector<4xf32>
    %274 = vector.shape_cast %273 : vector<4xf32> to vector<4x1xf32>
    %275 = arith.addf %259, %274 : vector<4x1xf32>
    %276 = arith.mulf %272, %272 : vector<4x16xf32>
    %cst_141 = arith.constant dense<0.000000e+00> : vector<4xf32>
    %277 = vector.multi_reduction <add>, %276, %cst_141 [1] : vector<4x16xf32> to vector<4xf32>
    %278 = vector.shape_cast %277 : vector<4xf32> to vector<4x1xf32>
    %279 = arith.addf %263, %278 : vector<4x1xf32>
    %c1_142 = arith.constant 1 : index
    %c0_143 = arith.constant 0 : index
    %c0_144 = arith.constant 0 : index
    %280 = vector.load %arg25[%c1_142, %c0_143, %c0_144] : memref<4x16x32xf32, #tpu.memory_space<vmem>>, vector<1x16x32xf32>
    %281 = vector.shape_cast %280 : vector<1x16x32xf32> to vector<16x32xf32>
    %282 = arith.truncf %272 : vector<4x16xf32> to vector<4x16xbf16>
    %283 = arith.truncf %281 : vector<16x32xf32> to vector<16x32xbf16>
    %cst_145 = arith.constant dense<0.000000e+00> : vector<4x32xf32>
    %284 = tpu.matmul %282, %283, %cst_145 {dimension_numbers = #tpu.dot_dimension_numbers<[1], [0], [0], [1], [0, 0, 1, 1], [], []>} : vector<4x16xbf16>, vector<16x32xbf16>, vector<4x32xf32> -> vector<4x32xf32>
    %285 = arith.addf %269, %284 : vector<4x32xf32>
    %c2 = arith.constant 2 : index
    %c0_146 = arith.constant 0 : index
    %c0_147 = arith.constant 0 : index
    %286 = vector.load %arg24[%c2, %c0_146, %c0_147] : memref<4x4x16xf32, #tpu.memory_space<vmem>>, vector<1x4x16xf32>
    %287 = vector.shape_cast %286 : vector<1x4x16xf32> to vector<4x16xf32>
    %cst_148 = arith.constant dense<0.000000e+00> : vector<4x16xf32>
    %288 = tpu.matmul %287, %250, %cst_148 {dimension_numbers = #tpu.dot_dimension_numbers<[1], [0], [0], [1], [0, 0, 1, 1], [], []>} : vector<4x16xf32>, vector<16x16xf32>, vector<4x16xf32> -> vector<4x16xf32>
    %cst_149 = arith.constant dense<0.000000e+00> : vector<4xf32>
    %289 = vector.multi_reduction <add>, %288, %cst_149 [1] : vector<4x16xf32> to vector<4xf32>
    %290 = vector.shape_cast %289 : vector<4xf32> to vector<4x1xf32>
    %291 = arith.addf %275, %290 : vector<4x1xf32>
    %292 = arith.mulf %288, %288 : vector<4x16xf32>
    %cst_150 = arith.constant dense<0.000000e+00> : vector<4xf32>
    %293 = vector.multi_reduction <add>, %292, %cst_150 [1] : vector<4x16xf32> to vector<4xf32>
    %294 = vector.shape_cast %293 : vector<4xf32> to vector<4x1xf32>
    %295 = arith.addf %279, %294 : vector<4x1xf32>
    %c2_151 = arith.constant 2 : index
    %c0_152 = arith.constant 0 : index
    %c0_153 = arith.constant 0 : index
    %296 = vector.load %arg25[%c2_151, %c0_152, %c0_153] : memref<4x16x32xf32, #tpu.memory_space<vmem>>, vector<1x16x32xf32>
    %297 = vector.shape_cast %296 : vector<1x16x32xf32> to vector<16x32xf32>
    %298 = arith.truncf %288 : vector<4x16xf32> to vector<4x16xbf16>
    %299 = arith.truncf %297 : vector<16x32xf32> to vector<16x32xbf16>
    %cst_154 = arith.constant dense<0.000000e+00> : vector<4x32xf32>
    %300 = tpu.matmul %298, %299, %cst_154 {dimension_numbers = #tpu.dot_dimension_numbers<[1], [0], [0], [1], [0, 0, 1, 1], [], []>} : vector<4x16xbf16>, vector<16x32xbf16>, vector<4x32xf32> -> vector<4x32xf32>
    %301 = arith.addf %285, %300 : vector<4x32xf32>
    %c3 = arith.constant 3 : index
    %c0_155 = arith.constant 0 : index
    %c0_156 = arith.constant 0 : index
    %302 = vector.load %arg24[%c3, %c0_155, %c0_156] : memref<4x4x16xf32, #tpu.memory_space<vmem>>, vector<1x4x16xf32>
    %303 = vector.shape_cast %302 : vector<1x4x16xf32> to vector<4x16xf32>
    %cst_157 = arith.constant dense<0.000000e+00> : vector<4x16xf32>
    %304 = tpu.matmul %303, %250, %cst_157 {dimension_numbers = #tpu.dot_dimension_numbers<[1], [0], [0], [1], [0, 0, 1, 1], [], []>} : vector<4x16xf32>, vector<16x16xf32>, vector<4x16xf32> -> vector<4x16xf32>
    %cst_158 = arith.constant dense<0.000000e+00> : vector<4xf32>
    %305 = vector.multi_reduction <add>, %304, %cst_158 [1] : vector<4x16xf32> to vector<4xf32>
    %306 = vector.shape_cast %305 : vector<4xf32> to vector<4x1xf32>
    %307 = arith.addf %291, %306 : vector<4x1xf32>
    %308 = arith.mulf %304, %304 : vector<4x16xf32>
    %cst_159 = arith.constant dense<0.000000e+00> : vector<4xf32>
    %309 = vector.multi_reduction <add>, %308, %cst_159 [1] : vector<4x16xf32> to vector<4xf32>
    %310 = vector.shape_cast %309 : vector<4xf32> to vector<4x1xf32>
    %311 = arith.addf %295, %310 : vector<4x1xf32>
    %c3_160 = arith.constant 3 : index
    %c0_161 = arith.constant 0 : index
    %c0_162 = arith.constant 0 : index
    %312 = vector.load %arg25[%c3_160, %c0_161, %c0_162] : memref<4x16x32xf32, #tpu.memory_space<vmem>>, vector<1x16x32xf32>
    %313 = vector.shape_cast %312 : vector<1x16x32xf32> to vector<16x32xf32>
    %314 = arith.truncf %304 : vector<4x16xf32> to vector<4x16xbf16>
    %315 = arith.truncf %313 : vector<16x32xf32> to vector<16x32xbf16>
    %cst_163 = arith.constant dense<0.000000e+00> : vector<4x32xf32>
    %316 = tpu.matmul %314, %315, %cst_163 {dimension_numbers = #tpu.dot_dimension_numbers<[1], [0], [0], [1], [0, 0, 1, 1], [], []>} : vector<4x16xbf16>, vector<16x32xbf16>, vector<4x32xf32> -> vector<4x32xf32>
    %317 = arith.addf %301, %316 : vector<4x32xf32>
    %cst_164 = arith.constant 1.562500e-02 : f32
    %318 = vector.broadcast %cst_164 : f32 to vector<4x1xf32>
    %319 = arith.mulf %307, %318 : vector<4x1xf32>
    %cst_165 = arith.constant 1.562500e-02 : f32
    %320 = vector.broadcast %cst_165 : f32 to vector<4x1xf32>
    %321 = arith.mulf %311, %320 : vector<4x1xf32>
    %322 = arith.mulf %319, %319 : vector<4x1xf32>
    %323 = arith.subf %321, %322 : vector<4x1xf32>
    %cst_166 = arith.constant 9.99999974E-6 : f32
    %324 = vector.broadcast %cst_166 : f32 to vector<4x1xf32>
    %325 = arith.addf %323, %324 : vector<4x1xf32>
    %326 = math.rsqrt %325 : vector<4x1xf32>
    %c0_167 = arith.constant 0 : index
    %c0_168 = arith.constant 0 : index
    %327 = vector.load %arg26[%c0_167, %c0_168] : memref<1x32xf32, #tpu.memory_space<vmem>>, vector<1x32xf32>
    %328 = vector.broadcast %319 : vector<4x1xf32> to vector<4x32xf32>
    %329 = vector.broadcast %327 : vector<1x32xf32> to vector<4x32xf32>
    %330 = arith.mulf %328, %329 : vector<4x32xf32>
    %331 = arith.subf %317, %330 : vector<4x32xf32>
    %332 = vector.broadcast %326 : vector<4x1xf32> to vector<4x32xf32>
    %333 = arith.mulf %332, %331 : vector<4x32xf32>
    %c0_169 = arith.constant 0 : index
    %c0_170 = arith.constant 0 : index
    %334 = vector.load %arg27[%c0_169, %c0_170] : memref<1x32xf32, #tpu.memory_space<vmem>>, vector<1x32xf32>
    %335 = vector.broadcast %334 : vector<1x32xf32> to vector<4x32xf32>
    %336 = arith.addf %333, %335 : vector<4x32xf32>
    %c0_171 = arith.constant 0 : index
    %c0_172 = arith.constant 0 : index
    %337 = vector.load %arg34[%c0_171, %c0_172] : memref<1x4xf32, #tpu.memory_space<vmem>>, vector<1x4xf32>
    %cst_173 = arith.constant 0.000000e+00 : f32
    %338 = vector.broadcast %cst_173 : f32 to vector<4x32xf32>
    %c0_174 = arith.constant 0 : index
    %c0_175 = arith.constant 0 : index
    %c0_176 = arith.constant 0 : index
    %339 = vector.load %arg28[%c0_174, %c0_175, %c0_176] : memref<4x32x8xf32, #tpu.memory_space<vmem>>, vector<1x32x8xf32>
    %340 = vector.shape_cast %339 : vector<1x32x8xf32> to vector<32x8xf32>
    %341 = arith.truncf %336 : vector<4x32xf32> to vector<4x32xbf16>
    %342 = arith.truncf %340 : vector<32x8xf32> to vector<32x8xbf16>
    %cst_177 = arith.constant dense<0.000000e+00> : vector<4x8xf32>
    %343 = tpu.matmul %341, %342, %cst_177 {dimension_numbers = #tpu.dot_dimension_numbers<[1], [0], [0], [1], [0, 0, 1, 1], [], []>} : vector<4x32xbf16>, vector<32x8xbf16>, vector<4x8xf32> -> vector<4x8xf32>
    %c0_178 = arith.constant 0 : index
    %c0_179 = arith.constant 0 : index
    %c0_180 = arith.constant 0 : index
    %344 = vector.load %arg29[%c0_178, %c0_179, %c0_180] : memref<4x1x8xf32, #tpu.memory_space<vmem>>, vector<1x1x8xf32>
    %345 = vector.shape_cast %344 : vector<1x1x8xf32> to vector<1x8xf32>
    %346 = vector.broadcast %345 : vector<1x8xf32> to vector<4x8xf32>
    %347 = arith.addf %343, %346 : vector<4x8xf32>
    %c0_181 = arith.constant 0 : index
    %c0_182 = arith.constant 0 : index
    %c0_183 = arith.constant 0 : index
    %348 = vector.load %arg30[%c0_181, %c0_182, %c0_183] : memref<4x32x8xf32, #tpu.memory_space<vmem>>, vector<1x32x8xf32>
    %349 = vector.shape_cast %348 : vector<1x32x8xf32> to vector<32x8xf32>
    %350 = arith.truncf %336 : vector<4x32xf32> to vector<4x32xbf16>
    %351 = arith.truncf %349 : vector<32x8xf32> to vector<32x8xbf16>
    %cst_184 = arith.constant dense<0.000000e+00> : vector<4x8xf32>
    %352 = tpu.matmul %350, %351, %cst_184 {dimension_numbers = #tpu.dot_dimension_numbers<[1], [0], [0], [1], [0, 0, 1, 1], [], []>} : vector<4x32xbf16>, vector<32x8xbf16>, vector<4x8xf32> -> vector<4x8xf32>
    %c0_185 = arith.constant 0 : index
    %c0_186 = arith.constant 0 : index
    %c0_187 = arith.constant 0 : index
    %353 = vector.load %arg31[%c0_185, %c0_186, %c0_187] : memref<4x1x8xf32, #tpu.memory_space<vmem>>, vector<1x1x8xf32>
    %354 = vector.shape_cast %353 : vector<1x1x8xf32> to vector<1x8xf32>
    %355 = vector.broadcast %354 : vector<1x8xf32> to vector<4x8xf32>
    %356 = arith.addf %352, %355 : vector<4x8xf32>
    %c0_188 = arith.constant 0 : index
    %c0_189 = arith.constant 0 : index
    %c0_190 = arith.constant 0 : index
    %357 = vector.load %arg32[%c0_188, %c0_189, %c0_190] : memref<4x32x8xf32, #tpu.memory_space<vmem>>, vector<1x32x8xf32>
    %358 = vector.shape_cast %357 : vector<1x32x8xf32> to vector<32x8xf32>
    %359 = arith.truncf %336 : vector<4x32xf32> to vector<4x32xbf16>
    %360 = arith.truncf %358 : vector<32x8xf32> to vector<32x8xbf16>
    %cst_191 = arith.constant dense<0.000000e+00> : vector<4x8xf32>
    %361 = tpu.matmul %359, %360, %cst_191 {dimension_numbers = #tpu.dot_dimension_numbers<[1], [0], [0], [1], [0, 0, 1, 1], [], []>} : vector<4x32xbf16>, vector<32x8xbf16>, vector<4x8xf32> -> vector<4x8xf32>
    %c0_192 = arith.constant 0 : index
    %c0_193 = arith.constant 0 : index
    %c0_194 = arith.constant 0 : index
    %362 = vector.load %arg33[%c0_192, %c0_193, %c0_194] : memref<4x1x8xf32, #tpu.memory_space<vmem>>, vector<1x1x8xf32>
    %363 = vector.shape_cast %362 : vector<1x1x8xf32> to vector<1x8xf32>
    %364 = vector.broadcast %363 : vector<1x8xf32> to vector<4x8xf32>
    %365 = arith.addf %361, %364 : vector<4x8xf32>
    %366 = arith.mulf %347, %347 : vector<4x8xf32>
    %cst_195 = arith.constant dense<0.000000e+00> : vector<4xf32>
    %367 = vector.multi_reduction <add>, %366, %cst_195 [1] : vector<4x8xf32> to vector<4xf32>
    %368 = vector.shape_cast %367 : vector<4xf32> to vector<4x1xf32>
    %cst_196 = arith.constant 1.000000e-24 : f32
    %369 = vector.broadcast %cst_196 : f32 to vector<4x1xf32>
    %370 = arith.maximumf %368, %369 : vector<4x1xf32>
    %371 = math.rsqrt %370 : vector<4x1xf32>
    %372 = vector.broadcast %371 : vector<4x1xf32> to vector<4x8xf32>
    %373 = arith.mulf %347, %372 : vector<4x8xf32>
    %374 = arith.mulf %356, %356 : vector<4x8xf32>
    %cst_197 = arith.constant dense<0.000000e+00> : vector<4xf32>
    %375 = vector.multi_reduction <add>, %374, %cst_197 [1] : vector<4x8xf32> to vector<4xf32>
    %376 = vector.shape_cast %375 : vector<4xf32> to vector<4x1xf32>
    %cst_198 = arith.constant 1.000000e-24 : f32
    %377 = vector.broadcast %cst_198 : f32 to vector<4x1xf32>
    %378 = arith.maximumf %376, %377 : vector<4x1xf32>
    %379 = math.rsqrt %378 : vector<4x1xf32>
    %380 = vector.broadcast %379 : vector<4x1xf32> to vector<4x8xf32>
    %381 = arith.mulf %356, %380 : vector<4x8xf32>
    %382 = arith.truncf %373 : vector<4x8xf32> to vector<4x8xbf16>
    %383 = arith.truncf %381 : vector<4x8xf32> to vector<4x8xbf16>
    %cst_199 = arith.constant dense<0.000000e+00> : vector<4x4xf32>
    %384 = tpu.matmul %382, %383, %cst_199 {dimension_numbers = #tpu.dot_dimension_numbers<[1], [1], [0], [0], [0, 0, 1, 0], [], []>} : vector<4x8xbf16>, vector<4x8xbf16>, vector<4x4xf32> -> vector<4x4xf32>
    %385 = vector.extract_strided_slice %337 {offsets = [0, 0], sizes = [1, 1], strides = [1, 1]} : vector<1x4xf32> to vector<1x1xf32>
    %386 = vector.broadcast %385 : vector<1x1xf32> to vector<4x4xf32>
    %387 = arith.mulf %384, %386 : vector<4x4xf32>
    %c0_200 = arith.constant 0 : index
    %c0_201 = arith.constant 0 : index
    %c0_202 = arith.constant 0 : index
    %388 = vector.load %arg35[%c0_200, %c0_201, %c0_202] : memref<4x4x4xf32, #tpu.memory_space<vmem>>, vector<1x4x4xf32>
    %389 = vector.shape_cast %388 : vector<1x4x4xf32> to vector<4x4xf32>
    %390 = arith.addf %387, %389 : vector<4x4xf32>
    %cst_203 = arith.constant dense<0xFF800000> : vector<4xf32>
    %391 = vector.multi_reduction <maximumf>, %390, %cst_203 [1] : vector<4x4xf32> to vector<4xf32>
    %392 = vector.shape_cast %391 : vector<4xf32> to vector<4x1xf32>
    %393 = vector.broadcast %392 : vector<4x1xf32> to vector<4x4xf32>
    %394 = arith.subf %390, %393 : vector<4x4xf32>
    %395 = math.exp %394 : vector<4x4xf32>
    %cst_204 = arith.constant dense<0.000000e+00> : vector<4xf32>
    %396 = vector.multi_reduction <add>, %395, %cst_204 [1] : vector<4x4xf32> to vector<4xf32>
    %397 = vector.shape_cast %396 : vector<4xf32> to vector<4x1xf32>
    %398 = tpu.reciprocal %397 {approx = true} : vector<4x1xf32> -> vector<4x1xf32>
    %399 = vector.broadcast %398 : vector<4x1xf32> to vector<4x4xf32>
    %400 = arith.mulf %395, %399 : vector<4x4xf32>
    %401 = arith.truncf %400 : vector<4x4xf32> to vector<4x4xbf16>
    %402 = arith.truncf %365 : vector<4x8xf32> to vector<4x8xbf16>
    %cst_205 = arith.constant dense<0.000000e+00> : vector<4x8xf32>
    %403 = tpu.matmul %401, %402, %cst_205 {dimension_numbers = #tpu.dot_dimension_numbers<[1], [0], [0], [1], [0, 0, 1, 1], [], []>} : vector<4x4xbf16>, vector<4x8xbf16>, vector<4x8xf32> -> vector<4x8xf32>
    %c0_206 = arith.constant 0 : index
    %c0_207 = arith.constant 0 : index
    %c0_208 = arith.constant 0 : index
    %404 = vector.load %arg36[%c0_206, %c0_207, %c0_208] : memref<4x8x32xf32, #tpu.memory_space<vmem>>, vector<1x8x32xf32>
    %405 = vector.shape_cast %404 : vector<1x8x32xf32> to vector<8x32xf32>
    %406 = arith.truncf %403 : vector<4x8xf32> to vector<4x8xbf16>
    %407 = arith.truncf %405 : vector<8x32xf32> to vector<8x32xbf16>
    %cst_209 = arith.constant dense<0.000000e+00> : vector<4x32xf32>
    %408 = tpu.matmul %406, %407, %cst_209 {dimension_numbers = #tpu.dot_dimension_numbers<[1], [0], [0], [1], [0, 0, 1, 1], [], []>} : vector<4x8xbf16>, vector<8x32xbf16>, vector<4x32xf32> -> vector<4x32xf32>
    %409 = arith.addf %338, %408 : vector<4x32xf32>
    %c1_210 = arith.constant 1 : index
    %c0_211 = arith.constant 0 : index
    %c0_212 = arith.constant 0 : index
    %410 = vector.load %arg28[%c1_210, %c0_211, %c0_212] : memref<4x32x8xf32, #tpu.memory_space<vmem>>, vector<1x32x8xf32>
    %411 = vector.shape_cast %410 : vector<1x32x8xf32> to vector<32x8xf32>
    %412 = arith.truncf %336 : vector<4x32xf32> to vector<4x32xbf16>
    %413 = arith.truncf %411 : vector<32x8xf32> to vector<32x8xbf16>
    %cst_213 = arith.constant dense<0.000000e+00> : vector<4x8xf32>
    %414 = tpu.matmul %412, %413, %cst_213 {dimension_numbers = #tpu.dot_dimension_numbers<[1], [0], [0], [1], [0, 0, 1, 1], [], []>} : vector<4x32xbf16>, vector<32x8xbf16>, vector<4x8xf32> -> vector<4x8xf32>
    %c1_214 = arith.constant 1 : index
    %c0_215 = arith.constant 0 : index
    %c0_216 = arith.constant 0 : index
    %415 = vector.load %arg29[%c1_214, %c0_215, %c0_216] : memref<4x1x8xf32, #tpu.memory_space<vmem>>, vector<1x1x8xf32>
    %416 = vector.shape_cast %415 : vector<1x1x8xf32> to vector<1x8xf32>
    %417 = vector.broadcast %416 : vector<1x8xf32> to vector<4x8xf32>
    %418 = arith.addf %414, %417 : vector<4x8xf32>
    %c1_217 = arith.constant 1 : index
    %c0_218 = arith.constant 0 : index
    %c0_219 = arith.constant 0 : index
    %419 = vector.load %arg30[%c1_217, %c0_218, %c0_219] : memref<4x32x8xf32, #tpu.memory_space<vmem>>, vector<1x32x8xf32>
    %420 = vector.shape_cast %419 : vector<1x32x8xf32> to vector<32x8xf32>
    %421 = arith.truncf %336 : vector<4x32xf32> to vector<4x32xbf16>
    %422 = arith.truncf %420 : vector<32x8xf32> to vector<32x8xbf16>
    %cst_220 = arith.constant dense<0.000000e+00> : vector<4x8xf32>
    %423 = tpu.matmul %421, %422, %cst_220 {dimension_numbers = #tpu.dot_dimension_numbers<[1], [0], [0], [1], [0, 0, 1, 1], [], []>} : vector<4x32xbf16>, vector<32x8xbf16>, vector<4x8xf32> -> vector<4x8xf32>
    %c1_221 = arith.constant 1 : index
    %c0_222 = arith.constant 0 : index
    %c0_223 = arith.constant 0 : index
    %424 = vector.load %arg31[%c1_221, %c0_222, %c0_223] : memref<4x1x8xf32, #tpu.memory_space<vmem>>, vector<1x1x8xf32>
    %425 = vector.shape_cast %424 : vector<1x1x8xf32> to vector<1x8xf32>
    %426 = vector.broadcast %425 : vector<1x8xf32> to vector<4x8xf32>
    %427 = arith.addf %423, %426 : vector<4x8xf32>
    %c1_224 = arith.constant 1 : index
    %c0_225 = arith.constant 0 : index
    %c0_226 = arith.constant 0 : index
    %428 = vector.load %arg32[%c1_224, %c0_225, %c0_226] : memref<4x32x8xf32, #tpu.memory_space<vmem>>, vector<1x32x8xf32>
    %429 = vector.shape_cast %428 : vector<1x32x8xf32> to vector<32x8xf32>
    %430 = arith.truncf %336 : vector<4x32xf32> to vector<4x32xbf16>
    %431 = arith.truncf %429 : vector<32x8xf32> to vector<32x8xbf16>
    %cst_227 = arith.constant dense<0.000000e+00> : vector<4x8xf32>
    %432 = tpu.matmul %430, %431, %cst_227 {dimension_numbers = #tpu.dot_dimension_numbers<[1], [0], [0], [1], [0, 0, 1, 1], [], []>} : vector<4x32xbf16>, vector<32x8xbf16>, vector<4x8xf32> -> vector<4x8xf32>
    %c1_228 = arith.constant 1 : index
    %c0_229 = arith.constant 0 : index
    %c0_230 = arith.constant 0 : index
    %433 = vector.load %arg33[%c1_228, %c0_229, %c0_230] : memref<4x1x8xf32, #tpu.memory_space<vmem>>, vector<1x1x8xf32>
    %434 = vector.shape_cast %433 : vector<1x1x8xf32> to vector<1x8xf32>
    %435 = vector.broadcast %434 : vector<1x8xf32> to vector<4x8xf32>
    %436 = arith.addf %432, %435 : vector<4x8xf32>
    %437 = arith.mulf %418, %418 : vector<4x8xf32>
    %cst_231 = arith.constant dense<0.000000e+00> : vector<4xf32>
    %438 = vector.multi_reduction <add>, %437, %cst_231 [1] : vector<4x8xf32> to vector<4xf32>
    %439 = vector.shape_cast %438 : vector<4xf32> to vector<4x1xf32>
    %cst_232 = arith.constant 1.000000e-24 : f32
    %440 = vector.broadcast %cst_232 : f32 to vector<4x1xf32>
    %441 = arith.maximumf %439, %440 : vector<4x1xf32>
    %442 = math.rsqrt %441 : vector<4x1xf32>
    %443 = vector.broadcast %442 : vector<4x1xf32> to vector<4x8xf32>
    %444 = arith.mulf %418, %443 : vector<4x8xf32>
    %445 = arith.mulf %427, %427 : vector<4x8xf32>
    %cst_233 = arith.constant dense<0.000000e+00> : vector<4xf32>
    %446 = vector.multi_reduction <add>, %445, %cst_233 [1] : vector<4x8xf32> to vector<4xf32>
    %447 = vector.shape_cast %446 : vector<4xf32> to vector<4x1xf32>
    %cst_234 = arith.constant 1.000000e-24 : f32
    %448 = vector.broadcast %cst_234 : f32 to vector<4x1xf32>
    %449 = arith.maximumf %447, %448 : vector<4x1xf32>
    %450 = math.rsqrt %449 : vector<4x1xf32>
    %451 = vector.broadcast %450 : vector<4x1xf32> to vector<4x8xf32>
    %452 = arith.mulf %427, %451 : vector<4x8xf32>
    %453 = arith.truncf %444 : vector<4x8xf32> to vector<4x8xbf16>
    %454 = arith.truncf %452 : vector<4x8xf32> to vector<4x8xbf16>
    %cst_235 = arith.constant dense<0.000000e+00> : vector<4x4xf32>
    %455 = tpu.matmul %453, %454, %cst_235 {dimension_numbers = #tpu.dot_dimension_numbers<[1], [1], [0], [0], [0, 0, 1, 0], [], []>} : vector<4x8xbf16>, vector<4x8xbf16>, vector<4x4xf32> -> vector<4x4xf32>
    %456 = vector.extract_strided_slice %337 {offsets = [0, 1], sizes = [1, 1], strides = [1, 1]} : vector<1x4xf32> to vector<1x1xf32>
    %457 = vector.broadcast %456 : vector<1x1xf32> to vector<4x4xf32>
    %458 = arith.mulf %455, %457 : vector<4x4xf32>
    %c1_236 = arith.constant 1 : index
    %c0_237 = arith.constant 0 : index
    %c0_238 = arith.constant 0 : index
    %459 = vector.load %arg35[%c1_236, %c0_237, %c0_238] : memref<4x4x4xf32, #tpu.memory_space<vmem>>, vector<1x4x4xf32>
    %460 = vector.shape_cast %459 : vector<1x4x4xf32> to vector<4x4xf32>
    %461 = arith.addf %458, %460 : vector<4x4xf32>
    %cst_239 = arith.constant dense<0xFF800000> : vector<4xf32>
    %462 = vector.multi_reduction <maximumf>, %461, %cst_239 [1] : vector<4x4xf32> to vector<4xf32>
    %463 = vector.shape_cast %462 : vector<4xf32> to vector<4x1xf32>
    %464 = vector.broadcast %463 : vector<4x1xf32> to vector<4x4xf32>
    %465 = arith.subf %461, %464 : vector<4x4xf32>
    %466 = math.exp %465 : vector<4x4xf32>
    %cst_240 = arith.constant dense<0.000000e+00> : vector<4xf32>
    %467 = vector.multi_reduction <add>, %466, %cst_240 [1] : vector<4x4xf32> to vector<4xf32>
    %468 = vector.shape_cast %467 : vector<4xf32> to vector<4x1xf32>
    %469 = tpu.reciprocal %468 {approx = true} : vector<4x1xf32> -> vector<4x1xf32>
    %470 = vector.broadcast %469 : vector<4x1xf32> to vector<4x4xf32>
    %471 = arith.mulf %466, %470 : vector<4x4xf32>
    %472 = arith.truncf %471 : vector<4x4xf32> to vector<4x4xbf16>
    %473 = arith.truncf %436 : vector<4x8xf32> to vector<4x8xbf16>
    %cst_241 = arith.constant dense<0.000000e+00> : vector<4x8xf32>
    %474 = tpu.matmul %472, %473, %cst_241 {dimension_numbers = #tpu.dot_dimension_numbers<[1], [0], [0], [1], [0, 0, 1, 1], [], []>} : vector<4x4xbf16>, vector<4x8xbf16>, vector<4x8xf32> -> vector<4x8xf32>
    %c1_242 = arith.constant 1 : index
    %c0_243 = arith.constant 0 : index
    %c0_244 = arith.constant 0 : index
    %475 = vector.load %arg36[%c1_242, %c0_243, %c0_244] : memref<4x8x32xf32, #tpu.memory_space<vmem>>, vector<1x8x32xf32>
    %476 = vector.shape_cast %475 : vector<1x8x32xf32> to vector<8x32xf32>
    %477 = arith.truncf %474 : vector<4x8xf32> to vector<4x8xbf16>
    %478 = arith.truncf %476 : vector<8x32xf32> to vector<8x32xbf16>
    %cst_245 = arith.constant dense<0.000000e+00> : vector<4x32xf32>
    %479 = tpu.matmul %477, %478, %cst_245 {dimension_numbers = #tpu.dot_dimension_numbers<[1], [0], [0], [1], [0, 0, 1, 1], [], []>} : vector<4x8xbf16>, vector<8x32xbf16>, vector<4x32xf32> -> vector<4x32xf32>
    %480 = arith.addf %409, %479 : vector<4x32xf32>
    %c2_246 = arith.constant 2 : index
    %c0_247 = arith.constant 0 : index
    %c0_248 = arith.constant 0 : index
    %481 = vector.load %arg28[%c2_246, %c0_247, %c0_248] : memref<4x32x8xf32, #tpu.memory_space<vmem>>, vector<1x32x8xf32>
    %482 = vector.shape_cast %481 : vector<1x32x8xf32> to vector<32x8xf32>
    %483 = arith.truncf %336 : vector<4x32xf32> to vector<4x32xbf16>
    %484 = arith.truncf %482 : vector<32x8xf32> to vector<32x8xbf16>
    %cst_249 = arith.constant dense<0.000000e+00> : vector<4x8xf32>
    %485 = tpu.matmul %483, %484, %cst_249 {dimension_numbers = #tpu.dot_dimension_numbers<[1], [0], [0], [1], [0, 0, 1, 1], [], []>} : vector<4x32xbf16>, vector<32x8xbf16>, vector<4x8xf32> -> vector<4x8xf32>
    %c2_250 = arith.constant 2 : index
    %c0_251 = arith.constant 0 : index
    %c0_252 = arith.constant 0 : index
    %486 = vector.load %arg29[%c2_250, %c0_251, %c0_252] : memref<4x1x8xf32, #tpu.memory_space<vmem>>, vector<1x1x8xf32>
    %487 = vector.shape_cast %486 : vector<1x1x8xf32> to vector<1x8xf32>
    %488 = vector.broadcast %487 : vector<1x8xf32> to vector<4x8xf32>
    %489 = arith.addf %485, %488 : vector<4x8xf32>
    %c2_253 = arith.constant 2 : index
    %c0_254 = arith.constant 0 : index
    %c0_255 = arith.constant 0 : index
    %490 = vector.load %arg30[%c2_253, %c0_254, %c0_255] : memref<4x32x8xf32, #tpu.memory_space<vmem>>, vector<1x32x8xf32>
    %491 = vector.shape_cast %490 : vector<1x32x8xf32> to vector<32x8xf32>
    %492 = arith.truncf %336 : vector<4x32xf32> to vector<4x32xbf16>
    %493 = arith.truncf %491 : vector<32x8xf32> to vector<32x8xbf16>
    %cst_256 = arith.constant dense<0.000000e+00> : vector<4x8xf32>
    %494 = tpu.matmul %492, %493, %cst_256 {dimension_numbers = #tpu.dot_dimension_numbers<[1], [0], [0], [1], [0, 0, 1, 1], [], []>} : vector<4x32xbf16>, vector<32x8xbf16>, vector<4x8xf32> -> vector<4x8xf32>
    %c2_257 = arith.constant 2 : index
    %c0_258 = arith.constant 0 : index
    %c0_259 = arith.constant 0 : index
    %495 = vector.load %arg31[%c2_257, %c0_258, %c0_259] : memref<4x1x8xf32, #tpu.memory_space<vmem>>, vector<1x1x8xf32>
    %496 = vector.shape_cast %495 : vector<1x1x8xf32> to vector<1x8xf32>
    %497 = vector.broadcast %496 : vector<1x8xf32> to vector<4x8xf32>
    %498 = arith.addf %494, %497 : vector<4x8xf32>
    %c2_260 = arith.constant 2 : index
    %c0_261 = arith.constant 0 : index
    %c0_262 = arith.constant 0 : index
    %499 = vector.load %arg32[%c2_260, %c0_261, %c0_262] : memref<4x32x8xf32, #tpu.memory_space<vmem>>, vector<1x32x8xf32>
    %500 = vector.shape_cast %499 : vector<1x32x8xf32> to vector<32x8xf32>
    %501 = arith.truncf %336 : vector<4x32xf32> to vector<4x32xbf16>
    %502 = arith.truncf %500 : vector<32x8xf32> to vector<32x8xbf16>
    %cst_263 = arith.constant dense<0.000000e+00> : vector<4x8xf32>
    %503 = tpu.matmul %501, %502, %cst_263 {dimension_numbers = #tpu.dot_dimension_numbers<[1], [0], [0], [1], [0, 0, 1, 1], [], []>} : vector<4x32xbf16>, vector<32x8xbf16>, vector<4x8xf32> -> vector<4x8xf32>
    %c2_264 = arith.constant 2 : index
    %c0_265 = arith.constant 0 : index
    %c0_266 = arith.constant 0 : index
    %504 = vector.load %arg33[%c2_264, %c0_265, %c0_266] : memref<4x1x8xf32, #tpu.memory_space<vmem>>, vector<1x1x8xf32>
    %505 = vector.shape_cast %504 : vector<1x1x8xf32> to vector<1x8xf32>
    %506 = vector.broadcast %505 : vector<1x8xf32> to vector<4x8xf32>
    %507 = arith.addf %503, %506 : vector<4x8xf32>
    %508 = arith.mulf %489, %489 : vector<4x8xf32>
    %cst_267 = arith.constant dense<0.000000e+00> : vector<4xf32>
    %509 = vector.multi_reduction <add>, %508, %cst_267 [1] : vector<4x8xf32> to vector<4xf32>
    %510 = vector.shape_cast %509 : vector<4xf32> to vector<4x1xf32>
    %cst_268 = arith.constant 1.000000e-24 : f32
    %511 = vector.broadcast %cst_268 : f32 to vector<4x1xf32>
    %512 = arith.maximumf %510, %511 : vector<4x1xf32>
    %513 = math.rsqrt %512 : vector<4x1xf32>
    %514 = vector.broadcast %513 : vector<4x1xf32> to vector<4x8xf32>
    %515 = arith.mulf %489, %514 : vector<4x8xf32>
    %516 = arith.mulf %498, %498 : vector<4x8xf32>
    %cst_269 = arith.constant dense<0.000000e+00> : vector<4xf32>
    %517 = vector.multi_reduction <add>, %516, %cst_269 [1] : vector<4x8xf32> to vector<4xf32>
    %518 = vector.shape_cast %517 : vector<4xf32> to vector<4x1xf32>
    %cst_270 = arith.constant 1.000000e-24 : f32
    %519 = vector.broadcast %cst_270 : f32 to vector<4x1xf32>
    %520 = arith.maximumf %518, %519 : vector<4x1xf32>
    %521 = math.rsqrt %520 : vector<4x1xf32>
    %522 = vector.broadcast %521 : vector<4x1xf32> to vector<4x8xf32>
    %523 = arith.mulf %498, %522 : vector<4x8xf32>
    %524 = arith.truncf %515 : vector<4x8xf32> to vector<4x8xbf16>
    %525 = arith.truncf %523 : vector<4x8xf32> to vector<4x8xbf16>
    %cst_271 = arith.constant dense<0.000000e+00> : vector<4x4xf32>
    %526 = tpu.matmul %524, %525, %cst_271 {dimension_numbers = #tpu.dot_dimension_numbers<[1], [1], [0], [0], [0, 0, 1, 0], [], []>} : vector<4x8xbf16>, vector<4x8xbf16>, vector<4x4xf32> -> vector<4x4xf32>
    %527 = vector.extract_strided_slice %337 {offsets = [0, 2], sizes = [1, 1], strides = [1, 1]} : vector<1x4xf32> to vector<1x1xf32>
    %528 = vector.broadcast %527 : vector<1x1xf32> to vector<4x4xf32>
    %529 = arith.mulf %526, %528 : vector<4x4xf32>
    %c2_272 = arith.constant 2 : index
    %c0_273 = arith.constant 0 : index
    %c0_274 = arith.constant 0 : index
    %530 = vector.load %arg35[%c2_272, %c0_273, %c0_274] : memref<4x4x4xf32, #tpu.memory_space<vmem>>, vector<1x4x4xf32>
    %531 = vector.shape_cast %530 : vector<1x4x4xf32> to vector<4x4xf32>
    %532 = arith.addf %529, %531 : vector<4x4xf32>
    %cst_275 = arith.constant dense<0xFF800000> : vector<4xf32>
    %533 = vector.multi_reduction <maximumf>, %532, %cst_275 [1] : vector<4x4xf32> to vector<4xf32>
    %534 = vector.shape_cast %533 : vector<4xf32> to vector<4x1xf32>
    %535 = vector.broadcast %534 : vector<4x1xf32> to vector<4x4xf32>
    %536 = arith.subf %532, %535 : vector<4x4xf32>
    %537 = math.exp %536 : vector<4x4xf32>
    %cst_276 = arith.constant dense<0.000000e+00> : vector<4xf32>
    %538 = vector.multi_reduction <add>, %537, %cst_276 [1] : vector<4x4xf32> to vector<4xf32>
    %539 = vector.shape_cast %538 : vector<4xf32> to vector<4x1xf32>
    %540 = tpu.reciprocal %539 {approx = true} : vector<4x1xf32> -> vector<4x1xf32>
    %541 = vector.broadcast %540 : vector<4x1xf32> to vector<4x4xf32>
    %542 = arith.mulf %537, %541 : vector<4x4xf32>
    %543 = arith.truncf %542 : vector<4x4xf32> to vector<4x4xbf16>
    %544 = arith.truncf %507 : vector<4x8xf32> to vector<4x8xbf16>
    %cst_277 = arith.constant dense<0.000000e+00> : vector<4x8xf32>
    %545 = tpu.matmul %543, %544, %cst_277 {dimension_numbers = #tpu.dot_dimension_numbers<[1], [0], [0], [1], [0, 0, 1, 1], [], []>} : vector<4x4xbf16>, vector<4x8xbf16>, vector<4x8xf32> -> vector<4x8xf32>
    %c2_278 = arith.constant 2 : index
    %c0_279 = arith.constant 0 : index
    %c0_280 = arith.constant 0 : index
    %546 = vector.load %arg36[%c2_278, %c0_279, %c0_280] : memref<4x8x32xf32, #tpu.memory_space<vmem>>, vector<1x8x32xf32>
    %547 = vector.shape_cast %546 : vector<1x8x32xf32> to vector<8x32xf32>
    %548 = arith.truncf %545 : vector<4x8xf32> to vector<4x8xbf16>
    %549 = arith.truncf %547 : vector<8x32xf32> to vector<8x32xbf16>
    %cst_281 = arith.constant dense<0.000000e+00> : vector<4x32xf32>
    %550 = tpu.matmul %548, %549, %cst_281 {dimension_numbers = #tpu.dot_dimension_numbers<[1], [0], [0], [1], [0, 0, 1, 1], [], []>} : vector<4x8xbf16>, vector<8x32xbf16>, vector<4x32xf32> -> vector<4x32xf32>
    %551 = arith.addf %480, %550 : vector<4x32xf32>
    %c3_282 = arith.constant 3 : index
    %c0_283 = arith.constant 0 : index
    %c0_284 = arith.constant 0 : index
    %552 = vector.load %arg28[%c3_282, %c0_283, %c0_284] : memref<4x32x8xf32, #tpu.memory_space<vmem>>, vector<1x32x8xf32>
    %553 = vector.shape_cast %552 : vector<1x32x8xf32> to vector<32x8xf32>
    %554 = arith.truncf %336 : vector<4x32xf32> to vector<4x32xbf16>
    %555 = arith.truncf %553 : vector<32x8xf32> to vector<32x8xbf16>
    %cst_285 = arith.constant dense<0.000000e+00> : vector<4x8xf32>
    %556 = tpu.matmul %554, %555, %cst_285 {dimension_numbers = #tpu.dot_dimension_numbers<[1], [0], [0], [1], [0, 0, 1, 1], [], []>} : vector<4x32xbf16>, vector<32x8xbf16>, vector<4x8xf32> -> vector<4x8xf32>
    %c3_286 = arith.constant 3 : index
    %c0_287 = arith.constant 0 : index
    %c0_288 = arith.constant 0 : index
    %557 = vector.load %arg29[%c3_286, %c0_287, %c0_288] : memref<4x1x8xf32, #tpu.memory_space<vmem>>, vector<1x1x8xf32>
    %558 = vector.shape_cast %557 : vector<1x1x8xf32> to vector<1x8xf32>
    %559 = vector.broadcast %558 : vector<1x8xf32> to vector<4x8xf32>
    %560 = arith.addf %556, %559 : vector<4x8xf32>
    %c3_289 = arith.constant 3 : index
    %c0_290 = arith.constant 0 : index
    %c0_291 = arith.constant 0 : index
    %561 = vector.load %arg30[%c3_289, %c0_290, %c0_291] : memref<4x32x8xf32, #tpu.memory_space<vmem>>, vector<1x32x8xf32>
    %562 = vector.shape_cast %561 : vector<1x32x8xf32> to vector<32x8xf32>
    %563 = arith.truncf %336 : vector<4x32xf32> to vector<4x32xbf16>
    %564 = arith.truncf %562 : vector<32x8xf32> to vector<32x8xbf16>
    %cst_292 = arith.constant dense<0.000000e+00> : vector<4x8xf32>
    %565 = tpu.matmul %563, %564, %cst_292 {dimension_numbers = #tpu.dot_dimension_numbers<[1], [0], [0], [1], [0, 0, 1, 1], [], []>} : vector<4x32xbf16>, vector<32x8xbf16>, vector<4x8xf32> -> vector<4x8xf32>
    %c3_293 = arith.constant 3 : index
    %c0_294 = arith.constant 0 : index
    %c0_295 = arith.constant 0 : index
    %566 = vector.load %arg31[%c3_293, %c0_294, %c0_295] : memref<4x1x8xf32, #tpu.memory_space<vmem>>, vector<1x1x8xf32>
    %567 = vector.shape_cast %566 : vector<1x1x8xf32> to vector<1x8xf32>
    %568 = vector.broadcast %567 : vector<1x8xf32> to vector<4x8xf32>
    %569 = arith.addf %565, %568 : vector<4x8xf32>
    %c3_296 = arith.constant 3 : index
    %c0_297 = arith.constant 0 : index
    %c0_298 = arith.constant 0 : index
    %570 = vector.load %arg32[%c3_296, %c0_297, %c0_298] : memref<4x32x8xf32, #tpu.memory_space<vmem>>, vector<1x32x8xf32>
    %571 = vector.shape_cast %570 : vector<1x32x8xf32> to vector<32x8xf32>
    %572 = arith.truncf %336 : vector<4x32xf32> to vector<4x32xbf16>
    %573 = arith.truncf %571 : vector<32x8xf32> to vector<32x8xbf16>
    %cst_299 = arith.constant dense<0.000000e+00> : vector<4x8xf32>
    %574 = tpu.matmul %572, %573, %cst_299 {dimension_numbers = #tpu.dot_dimension_numbers<[1], [0], [0], [1], [0, 0, 1, 1], [], []>} : vector<4x32xbf16>, vector<32x8xbf16>, vector<4x8xf32> -> vector<4x8xf32>
    %c3_300 = arith.constant 3 : index
    %c0_301 = arith.constant 0 : index
    %c0_302 = arith.constant 0 : index
    %575 = vector.load %arg33[%c3_300, %c0_301, %c0_302] : memref<4x1x8xf32, #tpu.memory_space<vmem>>, vector<1x1x8xf32>
    %576 = vector.shape_cast %575 : vector<1x1x8xf32> to vector<1x8xf32>
    %577 = vector.broadcast %576 : vector<1x8xf32> to vector<4x8xf32>
    %578 = arith.addf %574, %577 : vector<4x8xf32>
    %579 = arith.mulf %560, %560 : vector<4x8xf32>
    %cst_303 = arith.constant dense<0.000000e+00> : vector<4xf32>
    %580 = vector.multi_reduction <add>, %579, %cst_303 [1] : vector<4x8xf32> to vector<4xf32>
    %581 = vector.shape_cast %580 : vector<4xf32> to vector<4x1xf32>
    %cst_304 = arith.constant 1.000000e-24 : f32
    %582 = vector.broadcast %cst_304 : f32 to vector<4x1xf32>
    %583 = arith.maximumf %581, %582 : vector<4x1xf32>
    %584 = math.rsqrt %583 : vector<4x1xf32>
    %585 = vector.broadcast %584 : vector<4x1xf32> to vector<4x8xf32>
    %586 = arith.mulf %560, %585 : vector<4x8xf32>
    %587 = arith.mulf %569, %569 : vector<4x8xf32>
    %cst_305 = arith.constant dense<0.000000e+00> : vector<4xf32>
    %588 = vector.multi_reduction <add>, %587, %cst_305 [1] : vector<4x8xf32> to vector<4xf32>
    %589 = vector.shape_cast %588 : vector<4xf32> to vector<4x1xf32>
    %cst_306 = arith.constant 1.000000e-24 : f32
    %590 = vector.broadcast %cst_306 : f32 to vector<4x1xf32>
    %591 = arith.maximumf %589, %590 : vector<4x1xf32>
    %592 = math.rsqrt %591 : vector<4x1xf32>
    %593 = vector.broadcast %592 : vector<4x1xf32> to vector<4x8xf32>
    %594 = arith.mulf %569, %593 : vector<4x8xf32>
    %595 = arith.truncf %586 : vector<4x8xf32> to vector<4x8xbf16>
    %596 = arith.truncf %594 : vector<4x8xf32> to vector<4x8xbf16>
    %cst_307 = arith.constant dense<0.000000e+00> : vector<4x4xf32>
    %597 = tpu.matmul %595, %596, %cst_307 {dimension_numbers = #tpu.dot_dimension_numbers<[1], [1], [0], [0], [0, 0, 1, 0], [], []>} : vector<4x8xbf16>, vector<4x8xbf16>, vector<4x4xf32> -> vector<4x4xf32>
    %598 = vector.extract_strided_slice %337 {offsets = [0, 3], sizes = [1, 1], strides = [1, 1]} : vector<1x4xf32> to vector<1x1xf32>
    %599 = vector.broadcast %598 : vector<1x1xf32> to vector<4x4xf32>
    %600 = arith.mulf %597, %599 : vector<4x4xf32>
    %c3_308 = arith.constant 3 : index
    %c0_309 = arith.constant 0 : index
    %c0_310 = arith.constant 0 : index
    %601 = vector.load %arg35[%c3_308, %c0_309, %c0_310] : memref<4x4x4xf32, #tpu.memory_space<vmem>>, vector<1x4x4xf32>
    %602 = vector.shape_cast %601 : vector<1x4x4xf32> to vector<4x4xf32>
    %603 = arith.addf %600, %602 : vector<4x4xf32>
    %cst_311 = arith.constant dense<0xFF800000> : vector<4xf32>
    %604 = vector.multi_reduction <maximumf>, %603, %cst_311 [1] : vector<4x4xf32> to vector<4xf32>
    %605 = vector.shape_cast %604 : vector<4xf32> to vector<4x1xf32>
    %606 = vector.broadcast %605 : vector<4x1xf32> to vector<4x4xf32>
    %607 = arith.subf %603, %606 : vector<4x4xf32>
    %608 = math.exp %607 : vector<4x4xf32>
    %cst_312 = arith.constant dense<0.000000e+00> : vector<4xf32>
    %609 = vector.multi_reduction <add>, %608, %cst_312 [1] : vector<4x4xf32> to vector<4xf32>
    %610 = vector.shape_cast %609 : vector<4xf32> to vector<4x1xf32>
    %611 = tpu.reciprocal %610 {approx = true} : vector<4x1xf32> -> vector<4x1xf32>
    %612 = vector.broadcast %611 : vector<4x1xf32> to vector<4x4xf32>
    %613 = arith.mulf %608, %612 : vector<4x4xf32>
    %614 = arith.truncf %613 : vector<4x4xf32> to vector<4x4xbf16>
    %615 = arith.truncf %578 : vector<4x8xf32> to vector<4x8xbf16>
    %cst_313 = arith.constant dense<0.000000e+00> : vector<4x8xf32>
    %616 = tpu.matmul %614, %615, %cst_313 {dimension_numbers = #tpu.dot_dimension_numbers<[1], [0], [0], [1], [0, 0, 1, 1], [], []>} : vector<4x4xbf16>, vector<4x8xbf16>, vector<4x8xf32> -> vector<4x8xf32>
    %c3_314 = arith.constant 3 : index
    %c0_315 = arith.constant 0 : index
    %c0_316 = arith.constant 0 : index
    %617 = vector.load %arg36[%c3_314, %c0_315, %c0_316] : memref<4x8x32xf32, #tpu.memory_space<vmem>>, vector<1x8x32xf32>
    %618 = vector.shape_cast %617 : vector<1x8x32xf32> to vector<8x32xf32>
    %619 = arith.truncf %616 : vector<4x8xf32> to vector<4x8xbf16>
    %620 = arith.truncf %618 : vector<8x32xf32> to vector<8x32xbf16>
    %cst_317 = arith.constant dense<0.000000e+00> : vector<4x32xf32>
    %621 = tpu.matmul %619, %620, %cst_317 {dimension_numbers = #tpu.dot_dimension_numbers<[1], [0], [0], [1], [0, 0, 1, 1], [], []>} : vector<4x8xbf16>, vector<8x32xbf16>, vector<4x32xf32> -> vector<4x32xf32>
    %622 = arith.addf %551, %621 : vector<4x32xf32>
    %c0_318 = arith.constant 0 : index
    %c0_319 = arith.constant 0 : index
    %623 = vector.load %arg37[%c0_318, %c0_319] : memref<1x32xf32, #tpu.memory_space<vmem>>, vector<1x32xf32>
    %624 = vector.broadcast %623 : vector<1x32xf32> to vector<4x32xf32>
    %625 = arith.addf %622, %624 : vector<4x32xf32>
    %c0_320 = arith.constant 0 : index
    %c0_321 = arith.constant 0 : index
    %626 = vector.load %arg38[%c0_320, %c0_321] : memref<1x32xf32, #tpu.memory_space<vmem>>, vector<1x32xf32>
    %c0_322 = arith.constant 0 : index
    %c0_323 = arith.constant 0 : index
    %627 = vector.load %arg39[%c0_322, %c0_323] : memref<1x32xf32, #tpu.memory_space<vmem>>, vector<1x32xf32>
    %cst_324 = arith.constant dense<0.000000e+00> : vector<4xf32>
    %628 = vector.multi_reduction <add>, %625, %cst_324 [1] : vector<4x32xf32> to vector<4xf32>
    %629 = vector.shape_cast %628 : vector<4xf32> to vector<4x1xf32>
    %cst_325 = arith.constant 3.200000e+01 : f32
    %630 = vector.broadcast %cst_325 : f32 to vector<4x1xf32>
    %631 = arith.divf %629, %630 : vector<4x1xf32>
    %632 = vector.broadcast %631 : vector<4x1xf32> to vector<4x32xf32>
    %633 = arith.subf %625, %632 : vector<4x32xf32>
    %634 = arith.mulf %633, %633 : vector<4x32xf32>
    %cst_326 = arith.constant dense<0.000000e+00> : vector<4xf32>
    %635 = vector.multi_reduction <add>, %634, %cst_326 [1] : vector<4x32xf32> to vector<4xf32>
    %636 = vector.shape_cast %635 : vector<4xf32> to vector<4x1xf32>
    %cst_327 = arith.constant 3.200000e+01 : f32
    %637 = vector.broadcast %cst_327 : f32 to vector<4x1xf32>
    %638 = arith.divf %636, %637 : vector<4x1xf32>
    %cst_328 = arith.constant 9.99999974E-6 : f32
    %639 = vector.broadcast %cst_328 : f32 to vector<4x1xf32>
    %640 = arith.addf %638, %639 : vector<4x1xf32>
    %641 = math.rsqrt %640 : vector<4x1xf32>
    %642 = vector.broadcast %641 : vector<4x1xf32> to vector<4x32xf32>
    %643 = arith.mulf %633, %642 : vector<4x32xf32>
    %644 = vector.broadcast %626 : vector<1x32xf32> to vector<4x32xf32>
    %645 = arith.mulf %643, %644 : vector<4x32xf32>
    %646 = vector.broadcast %627 : vector<1x32xf32> to vector<4x32xf32>
    %647 = arith.addf %645, %646 : vector<4x32xf32>
    %648 = arith.addf %336, %647 : vector<4x32xf32>
    %c0_329 = arith.constant 0 : index
    %c0_330 = arith.constant 0 : index
    %649 = vector.load %arg40[%c0_329, %c0_330] : memref<32x64xf32, #tpu.memory_space<vmem>>, vector<32x64xf32>
    %650 = arith.truncf %648 : vector<4x32xf32> to vector<4x32xbf16>
    %651 = arith.truncf %649 : vector<32x64xf32> to vector<32x64xbf16>
    %cst_331 = arith.constant dense<0.000000e+00> : vector<4x64xf32>
    %652 = tpu.matmul %650, %651, %cst_331 {dimension_numbers = #tpu.dot_dimension_numbers<[1], [0], [0], [1], [0, 0, 1, 1], [], []>} : vector<4x32xbf16>, vector<32x64xbf16>, vector<4x64xf32> -> vector<4x64xf32>
    %c0_332 = arith.constant 0 : index
    %c0_333 = arith.constant 0 : index
    %653 = vector.load %arg41[%c0_332, %c0_333] : memref<1x64xf32, #tpu.memory_space<vmem>>, vector<1x64xf32>
    %654 = vector.broadcast %653 : vector<1x64xf32> to vector<4x64xf32>
    %655 = arith.addf %652, %654 : vector<4x64xf32>
    %cst_334 = arith.constant 5.000000e-01 : f32
    %656 = vector.broadcast %cst_334 : f32 to vector<4x64xf32>
    %657 = arith.mulf %656, %655 : vector<4x64xf32>
    %cst_335 = arith.constant 4.471500e-02 : f32
    %658 = vector.broadcast %cst_335 : f32 to vector<4x64xf32>
    %659 = arith.mulf %658, %655 : vector<4x64xf32>
    %660 = arith.mulf %659, %655 : vector<4x64xf32>
    %661 = arith.mulf %660, %655 : vector<4x64xf32>
    %662 = arith.addf %655, %661 : vector<4x64xf32>
    %cst_336 = arith.constant 0.797884583 : f32
    %663 = vector.broadcast %cst_336 : f32 to vector<4x64xf32>
    %664 = arith.mulf %663, %662 : vector<4x64xf32>
    %665 = math.tanh %664 : vector<4x64xf32>
    %cst_337 = arith.constant 1.000000e+00 : f32
    %666 = vector.broadcast %cst_337 : f32 to vector<4x64xf32>
    %667 = arith.addf %666, %665 : vector<4x64xf32>
    %668 = arith.mulf %657, %667 : vector<4x64xf32>
    %c0_338 = arith.constant 0 : index
    %c0_339 = arith.constant 0 : index
    %669 = vector.load %arg42[%c0_338, %c0_339] : memref<64x32xf32, #tpu.memory_space<vmem>>, vector<64x32xf32>
    %670 = arith.truncf %668 : vector<4x64xf32> to vector<4x64xbf16>
    %671 = arith.truncf %669 : vector<64x32xf32> to vector<64x32xbf16>
    %cst_340 = arith.constant dense<0.000000e+00> : vector<4x32xf32>
    %672 = tpu.matmul %670, %671, %cst_340 {dimension_numbers = #tpu.dot_dimension_numbers<[1], [0], [0], [1], [0, 0, 1, 1], [], []>} : vector<4x64xbf16>, vector<64x32xbf16>, vector<4x32xf32> -> vector<4x32xf32>
    %c0_341 = arith.constant 0 : index
    %c0_342 = arith.constant 0 : index
    %673 = vector.load %arg43[%c0_341, %c0_342] : memref<1x32xf32, #tpu.memory_space<vmem>>, vector<1x32xf32>
    %674 = vector.broadcast %673 : vector<1x32xf32> to vector<4x32xf32>
    %675 = arith.addf %672, %674 : vector<4x32xf32>
    %c0_343 = arith.constant 0 : index
    %c0_344 = arith.constant 0 : index
    %676 = vector.load %arg44[%c0_343, %c0_344] : memref<1x32xf32, #tpu.memory_space<vmem>>, vector<1x32xf32>
    %c0_345 = arith.constant 0 : index
    %c0_346 = arith.constant 0 : index
    %677 = vector.load %arg45[%c0_345, %c0_346] : memref<1x32xf32, #tpu.memory_space<vmem>>, vector<1x32xf32>
    %cst_347 = arith.constant dense<0.000000e+00> : vector<4xf32>
    %678 = vector.multi_reduction <add>, %675, %cst_347 [1] : vector<4x32xf32> to vector<4xf32>
    %679 = vector.shape_cast %678 : vector<4xf32> to vector<4x1xf32>
    %cst_348 = arith.constant 3.200000e+01 : f32
    %680 = vector.broadcast %cst_348 : f32 to vector<4x1xf32>
    %681 = arith.divf %679, %680 : vector<4x1xf32>
    %682 = vector.broadcast %681 : vector<4x1xf32> to vector<4x32xf32>
    %683 = arith.subf %675, %682 : vector<4x32xf32>
    %684 = arith.mulf %683, %683 : vector<4x32xf32>
    %cst_349 = arith.constant dense<0.000000e+00> : vector<4xf32>
    %685 = vector.multi_reduction <add>, %684, %cst_349 [1] : vector<4x32xf32> to vector<4xf32>
    %686 = vector.shape_cast %685 : vector<4xf32> to vector<4x1xf32>
    %cst_350 = arith.constant 3.200000e+01 : f32
    %687 = vector.broadcast %cst_350 : f32 to vector<4x1xf32>
    %688 = arith.divf %686, %687 : vector<4x1xf32>
    %cst_351 = arith.constant 9.99999974E-6 : f32
    %689 = vector.broadcast %cst_351 : f32 to vector<4x1xf32>
    %690 = arith.addf %688, %689 : vector<4x1xf32>
    %691 = math.rsqrt %690 : vector<4x1xf32>
    %692 = vector.broadcast %691 : vector<4x1xf32> to vector<4x32xf32>
    %693 = arith.mulf %683, %692 : vector<4x32xf32>
    %694 = vector.broadcast %676 : vector<1x32xf32> to vector<4x32xf32>
    %695 = arith.mulf %693, %694 : vector<4x32xf32>
    %696 = vector.broadcast %677 : vector<1x32xf32> to vector<4x32xf32>
    %697 = arith.addf %695, %696 : vector<4x32xf32>
    %698 = arith.addf %648, %697 : vector<4x32xf32>
    %c0_352 = arith.constant 0 : index
    %c0_353 = arith.constant 0 : index
    %699 = vector.load %arg46[%c0_352, %c0_353] : memref<1x32xf32, #tpu.memory_space<vmem>>, vector<1x32xf32>
    %c0_354 = arith.constant 0 : index
    %c0_355 = arith.constant 0 : index
    %700 = vector.load %arg47[%c0_354, %c0_355] : memref<1x32xf32, #tpu.memory_space<vmem>>, vector<1x32xf32>
    %cst_356 = arith.constant dense<0.000000e+00> : vector<4xf32>
    %701 = vector.multi_reduction <add>, %698, %cst_356 [1] : vector<4x32xf32> to vector<4xf32>
    %702 = vector.shape_cast %701 : vector<4xf32> to vector<4x1xf32>
    %cst_357 = arith.constant 3.200000e+01 : f32
    %703 = vector.broadcast %cst_357 : f32 to vector<4x1xf32>
    %704 = arith.divf %702, %703 : vector<4x1xf32>
    %705 = vector.broadcast %704 : vector<4x1xf32> to vector<4x32xf32>
    %706 = arith.subf %698, %705 : vector<4x32xf32>
    %707 = arith.mulf %706, %706 : vector<4x32xf32>
    %cst_358 = arith.constant dense<0.000000e+00> : vector<4xf32>
    %708 = vector.multi_reduction <add>, %707, %cst_358 [1] : vector<4x32xf32> to vector<4xf32>
    %709 = vector.shape_cast %708 : vector<4xf32> to vector<4x1xf32>
    %cst_359 = arith.constant 3.200000e+01 : f32
    %710 = vector.broadcast %cst_359 : f32 to vector<4x1xf32>
    %711 = arith.divf %709, %710 : vector<4x1xf32>
    %cst_360 = arith.constant 9.99999974E-6 : f32
    %712 = vector.broadcast %cst_360 : f32 to vector<4x1xf32>
    %713 = arith.addf %711, %712 : vector<4x1xf32>
    %714 = math.rsqrt %713 : vector<4x1xf32>
    %715 = vector.broadcast %714 : vector<4x1xf32> to vector<4x32xf32>
    %716 = arith.mulf %706, %715 : vector<4x32xf32>
    %717 = vector.broadcast %699 : vector<1x32xf32> to vector<4x32xf32>
    %718 = arith.mulf %716, %717 : vector<4x32xf32>
    %719 = vector.broadcast %700 : vector<1x32xf32> to vector<4x32xf32>
    %720 = arith.addf %718, %719 : vector<4x32xf32>
    %cst_361 = arith.constant dense<0.000000e+00> : vector<32xf32>
    %721 = vector.multi_reduction <add>, %720, %cst_361 [0] : vector<4x32xf32> to vector<32xf32>
    %722 = vector.shape_cast %721 : vector<32xf32> to vector<1x32xf32>
    %cst_362 = arith.constant 2.500000e-01 : f32
    %723 = vector.broadcast %cst_362 : f32 to vector<1x32xf32>
    %724 = arith.mulf %722, %723 : vector<1x32xf32>
    %c0_363 = arith.constant 0 : index
    %c0_364 = arith.constant 0 : index
    %725 = vector.load %arg48[%c0_363, %c0_364] : memref<32x8xf32, #tpu.memory_space<vmem>>, vector<32x8xf32>
    %726 = arith.truncf %724 : vector<1x32xf32> to vector<1x32xbf16>
    %727 = arith.truncf %725 : vector<32x8xf32> to vector<32x8xbf16>
    %cst_365 = arith.constant dense<0.000000e+00> : vector<1x8xf32>
    %728 = tpu.matmul %726, %727, %cst_365 {dimension_numbers = #tpu.dot_dimension_numbers<[1], [0], [0], [1], [0, 0, 1, 1], [], []>} : vector<1x32xbf16>, vector<32x8xbf16>, vector<1x8xf32> -> vector<1x8xf32>
    %c0_366 = arith.constant 0 : index
    %c0_367 = arith.constant 0 : index
    %729 = vector.load %arg49[%c0_366, %c0_367] : memref<1x8xf32, #tpu.memory_space<vmem>>, vector<1x8xf32>
    %730 = arith.addf %728, %729 : vector<1x8xf32>
    %c0_368 = arith.constant 0 : index
    %c0_369 = arith.constant 0 : index
    %c0_370 = arith.constant 0 : index
    %731 = vector.load %arg50[%c0_368, %c0_369, %c0_370] : memref<1x1x8xf32, #tpu.memory_space<vmem>>, vector<1x1x8xf32>
    %732 = vector.shape_cast %731 : vector<1x1x8xf32> to vector<1x8xf32>
    %733 = vector.shape_cast %730 : vector<1x8xf32> to vector<1x1x8xf32>
    tpu.vector_store %arg50[%c0_368, %c0_369, %c0_370], %733 {strides = array<i32>} : memref<1x1x8xf32, #tpu.memory_space<vmem>>, vector<1x1x8xf32>,
    return
  }
  func.func @transform_0(%arg0: i32) -> (i32, i32, i32) {
    %c0_i32 = arith.constant 0 : i32
    %c0_i32_0 = arith.constant 0 : i32
    %c0_i32_1 = arith.constant 0 : i32
    return %arg0, %c0_i32, %c0_i32_0 : i32, i32, i32
  }
  func.func @transform_1(%arg0: i32) -> (i32, i32) {
    %c0_i32 = arith.constant 0 : i32
    %c0_i32_0 = arith.constant 0 : i32
    %c0_i32_1 = arith.constant 0 : i32
    return %c0_i32, %c0_i32_0 : i32, i32
  }
  func.func @transform_2(%arg0: i32) -> (i32, i32) {
    %c0_i32 = arith.constant 0 : i32
    %c0_i32_0 = arith.constant 0 : i32
    %c0_i32_1 = arith.constant 0 : i32
    return %c0_i32, %c0_i32_0 : i32, i32
  }
  func.func @transform_3(%arg0: i32) -> (i32, i32) {
    %c0_i32 = arith.constant 0 : i32
    %c0_i32_0 = arith.constant 0 : i32
    %c0_i32_1 = arith.constant 0 : i32
    return %c0_i32, %c0_i32_0 : i32, i32
  }
  func.func @transform_4(%arg0: i32) -> (i32, i32) {
    %c0_i32 = arith.constant 0 : i32
    %c0_i32_0 = arith.constant 0 : i32
    %c0_i32_1 = arith.constant 0 : i32
    return %c0_i32, %c0_i32_0 : i32, i32
  }
  func.func @transform_5(%arg0: i32) -> (i32, i32, i32) {
    %c0_i32 = arith.constant 0 : i32
    %c0_i32_0 = arith.constant 0 : i32
    %c0_i32_1 = arith.constant 0 : i32
    %c0_i32_2 = arith.constant 0 : i32
    return %c0_i32, %c0_i32_0, %c0_i32_1 : i32, i32, i32
  }
  func.func @transform_6(%arg0: i32) -> (i32, i32, i32) {
    %c0_i32 = arith.constant 0 : i32
    %c0_i32_0 = arith.constant 0 : i32
    %c0_i32_1 = arith.constant 0 : i32
    %c0_i32_2 = arith.constant 0 : i32
    return %c0_i32, %c0_i32_0, %c0_i32_1 : i32, i32, i32
  }
  func.func @transform_7(%arg0: i32) -> (i32, i32, i32) {
    %c0_i32 = arith.constant 0 : i32
    %c0_i32_0 = arith.constant 0 : i32
    %c0_i32_1 = arith.constant 0 : i32
    %c0_i32_2 = arith.constant 0 : i32
    return %c0_i32, %c0_i32_0, %c0_i32_1 : i32, i32, i32
  }
  func.func @transform_8(%arg0: i32) -> (i32, i32, i32) {
    %c0_i32 = arith.constant 0 : i32
    %c0_i32_0 = arith.constant 0 : i32
    %c0_i32_1 = arith.constant 0 : i32
    %c0_i32_2 = arith.constant 0 : i32
    return %c0_i32, %c0_i32_0, %c0_i32_1 : i32, i32, i32
  }
  func.func @transform_9(%arg0: i32) -> (i32, i32, i32) {
    %c0_i32 = arith.constant 0 : i32
    %c0_i32_0 = arith.constant 0 : i32
    %c0_i32_1 = arith.constant 0 : i32
    %c0_i32_2 = arith.constant 0 : i32
    return %c0_i32, %c0_i32_0, %c0_i32_1 : i32, i32, i32
  }
  func.func @transform_10(%arg0: i32) -> (i32, i32, i32) {
    %c0_i32 = arith.constant 0 : i32
    %c0_i32_0 = arith.constant 0 : i32
    %c0_i32_1 = arith.constant 0 : i32
    %c0_i32_2 = arith.constant 0 : i32
    return %c0_i32, %c0_i32_0, %c0_i32_1 : i32, i32, i32
  }
  func.func @transform_11(%arg0: i32) -> (i32, i32) {
    %c0_i32 = arith.constant 0 : i32
    %c0_i32_0 = arith.constant 0 : i32
    %c0_i32_1 = arith.constant 0 : i32
    return %c0_i32, %c0_i32_0 : i32, i32
  }
  func.func @transform_12(%arg0: i32) -> (i32, i32, i32) {
    %c0_i32 = arith.constant 0 : i32
    %c0_i32_0 = arith.constant 0 : i32
    %c0_i32_1 = arith.constant 0 : i32
    %c0_i32_2 = arith.constant 0 : i32
    return %c0_i32, %c0_i32_0, %c0_i32_1 : i32, i32, i32
  }
  func.func @transform_13(%arg0: i32) -> (i32, i32, i32) {
    %c0_i32 = arith.constant 0 : i32
    %c0_i32_0 = arith.constant 0 : i32
    %c0_i32_1 = arith.constant 0 : i32
    %c0_i32_2 = arith.constant 0 : i32
    return %c0_i32, %c0_i32_0, %c0_i32_1 : i32, i32, i32
  }
  func.func @transform_14(%arg0: i32) -> (i32, i32) {
    %c0_i32 = arith.constant 0 : i32
    %c0_i32_0 = arith.constant 0 : i32
    %c0_i32_1 = arith.constant 0 : i32
    return %c0_i32, %c0_i32_0 : i32, i32
  }
  func.func @transform_15(%arg0: i32) -> (i32, i32) {
    %c0_i32 = arith.constant 0 : i32
    %c0_i32_0 = arith.constant 0 : i32
    %c0_i32_1 = arith.constant 0 : i32
    return %c0_i32, %c0_i32_0 : i32, i32
  }
  func.func @transform_16(%arg0: i32) -> (i32, i32) {
    %c0_i32 = arith.constant 0 : i32
    %c0_i32_0 = arith.constant 0 : i32
    %c0_i32_1 = arith.constant 0 : i32
    return %c0_i32, %c0_i32_0 : i32, i32
  }
  func.func @transform_17(%arg0: i32) -> (i32, i32) {
    %c0_i32 = arith.constant 0 : i32
    %c0_i32_0 = arith.constant 0 : i32
    %c0_i32_1 = arith.constant 0 : i32
    return %c0_i32, %c0_i32_0 : i32, i32
  }
  func.func @transform_18(%arg0: i32) -> (i32, i32) {
    %c0_i32 = arith.constant 0 : i32
    %c0_i32_0 = arith.constant 0 : i32
    %c0_i32_1 = arith.constant 0 : i32
    return %c0_i32, %c0_i32_0 : i32, i32
  }
  func.func @transform_19(%arg0: i32) -> (i32, i32) {
    %c0_i32 = arith.constant 0 : i32
    %c0_i32_0 = arith.constant 0 : i32
    %c0_i32_1 = arith.constant 0 : i32
    return %c0_i32, %c0_i32_0 : i32, i32
  }
  func.func @transform_20(%arg0: i32) -> (i32, i32) {
    %c0_i32 = arith.constant 0 : i32
    %c0_i32_0 = arith.constant 0 : i32
    %c0_i32_1 = arith.constant 0 : i32
    return %c0_i32, %c0_i32_0 : i32, i32
  }
  func.func @transform_21(%arg0: i32) -> (i32, i32) {
    %c0_i32 = arith.constant 0 : i32
    %c0_i32_0 = arith.constant 0 : i32
    %c0_i32_1 = arith.constant 0 : i32
    return %c0_i32, %c0_i32_0 : i32, i32
  }
  func.func @transform_22(%arg0: i32) -> (i32, i32) {
    %c0_i32 = arith.constant 0 : i32
    %c0_i32_0 = arith.constant 0 : i32
    %c0_i32_1 = arith.constant 0 : i32
    return %c0_i32, %c0_i32_0 : i32, i32
  }
  func.func @transform_23(%arg0: i32) -> (i32, i32, i32) {
    %c0_i32 = arith.constant 0 : i32
    %c0_i32_0 = arith.constant 0 : i32
    %c0_i32_1 = arith.constant 0 : i32
    %c0_i32_2 = arith.constant 0 : i32
    return %c0_i32, %c0_i32_0, %c0_i32_1 : i32, i32, i32
  }
  func.func @transform_24(%arg0: i32) -> (i32, i32, i32) {
    %c0_i32 = arith.constant 0 : i32
    %c0_i32_0 = arith.constant 0 : i32
    %c0_i32_1 = arith.constant 0 : i32
    %c0_i32_2 = arith.constant 0 : i32
    return %c0_i32, %c0_i32_0, %c0_i32_1 : i32, i32, i32
  }
  func.func @transform_25(%arg0: i32) -> (i32, i32) {
    %c0_i32 = arith.constant 0 : i32
    %c0_i32_0 = arith.constant 0 : i32
    %c0_i32_1 = arith.constant 0 : i32
    return %c0_i32, %c0_i32_0 : i32, i32
  }
  func.func @transform_26(%arg0: i32) -> (i32, i32) {
    %c0_i32 = arith.constant 0 : i32
    %c0_i32_0 = arith.constant 0 : i32
    %c0_i32_1 = arith.constant 0 : i32
    return %c0_i32, %c0_i32_0 : i32, i32
  }
  func.func @transform_27(%arg0: i32) -> (i32, i32, i32) {
    %c0_i32 = arith.constant 0 : i32
    %c0_i32_0 = arith.constant 0 : i32
    %c0_i32_1 = arith.constant 0 : i32
    %c0_i32_2 = arith.constant 0 : i32
    return %c0_i32, %c0_i32_0, %c0_i32_1 : i32, i32, i32
  }
  func.func @transform_28(%arg0: i32) -> (i32, i32, i32) {
    %c0_i32 = arith.constant 0 : i32
    %c0_i32_0 = arith.constant 0 : i32
    %c0_i32_1 = arith.constant 0 : i32
    %c0_i32_2 = arith.constant 0 : i32
    return %c0_i32, %c0_i32_0, %c0_i32_1 : i32, i32, i32
  }
  func.func @transform_29(%arg0: i32) -> (i32, i32, i32) {
    %c0_i32 = arith.constant 0 : i32
    %c0_i32_0 = arith.constant 0 : i32
    %c0_i32_1 = arith.constant 0 : i32
    %c0_i32_2 = arith.constant 0 : i32
    return %c0_i32, %c0_i32_0, %c0_i32_1 : i32, i32, i32
  }
  func.func @transform_30(%arg0: i32) -> (i32, i32, i32) {
    %c0_i32 = arith.constant 0 : i32
    %c0_i32_0 = arith.constant 0 : i32
    %c0_i32_1 = arith.constant 0 : i32
    %c0_i32_2 = arith.constant 0 : i32
    return %c0_i32, %c0_i32_0, %c0_i32_1 : i32, i32, i32
  }
  func.func @transform_31(%arg0: i32) -> (i32, i32, i32) {
    %c0_i32 = arith.constant 0 : i32
    %c0_i32_0 = arith.constant 0 : i32
    %c0_i32_1 = arith.constant 0 : i32
    %c0_i32_2 = arith.constant 0 : i32
    return %c0_i32, %c0_i32_0, %c0_i32_1 : i32, i32, i32
  }
  func.func @transform_32(%arg0: i32) -> (i32, i32, i32) {
    %c0_i32 = arith.constant 0 : i32
    %c0_i32_0 = arith.constant 0 : i32
    %c0_i32_1 = arith.constant 0 : i32
    %c0_i32_2 = arith.constant 0 : i32
    return %c0_i32, %c0_i32_0, %c0_i32_1 : i32, i32, i32
  }
  func.func @transform_33(%arg0: i32) -> (i32, i32) {
    %c0_i32 = arith.constant 0 : i32
    %c0_i32_0 = arith.constant 0 : i32
    %c0_i32_1 = arith.constant 0 : i32
    return %c0_i32, %c0_i32_0 : i32, i32
  }
  func.func @transform_34(%arg0: i32) -> (i32, i32, i32) {
    %c0_i32 = arith.constant 0 : i32
    %c0_i32_0 = arith.constant 0 : i32
    %c0_i32_1 = arith.constant 0 : i32
    %c0_i32_2 = arith.constant 0 : i32
    return %c0_i32, %c0_i32_0, %c0_i32_1 : i32, i32, i32
  }
  func.func @transform_35(%arg0: i32) -> (i32, i32, i32) {
    %c0_i32 = arith.constant 0 : i32
    %c0_i32_0 = arith.constant 0 : i32
    %c0_i32_1 = arith.constant 0 : i32
    %c0_i32_2 = arith.constant 0 : i32
    return %c0_i32, %c0_i32_0, %c0_i32_1 : i32, i32, i32
  }
  func.func @transform_36(%arg0: i32) -> (i32, i32) {
    %c0_i32 = arith.constant 0 : i32
    %c0_i32_0 = arith.constant 0 : i32
    %c0_i32_1 = arith.constant 0 : i32
    return %c0_i32, %c0_i32_0 : i32, i32
  }
  func.func @transform_37(%arg0: i32) -> (i32, i32) {
    %c0_i32 = arith.constant 0 : i32
    %c0_i32_0 = arith.constant 0 : i32
    %c0_i32_1 = arith.constant 0 : i32
    return %c0_i32, %c0_i32_0 : i32, i32
  }
  func.func @transform_38(%arg0: i32) -> (i32, i32) {
    %c0_i32 = arith.constant 0 : i32
    %c0_i32_0 = arith.constant 0 : i32
    %c0_i32_1 = arith.constant 0 : i32
    return %c0_i32, %c0_i32_0 : i32, i32
  }
  func.func @transform_39(%arg0: i32) -> (i32, i32) {
    %c0_i32 = arith.constant 0 : i32
    %c0_i32_0 = arith.constant 0 : i32
    %c0_i32_1 = arith.constant 0 : i32
    return %c0_i32, %c0_i32_0 : i32, i32
  }
  func.func @transform_40(%arg0: i32) -> (i32, i32) {
    %c0_i32 = arith.constant 0 : i32
    %c0_i32_0 = arith.constant 0 : i32
    %c0_i32_1 = arith.constant 0 : i32
    return %c0_i32, %c0_i32_0 : i32, i32
  }
  func.func @transform_41(%arg0: i32) -> (i32, i32) {
    %c0_i32 = arith.constant 0 : i32
    %c0_i32_0 = arith.constant 0 : i32
    %c0_i32_1 = arith.constant 0 : i32
    return %c0_i32, %c0_i32_0 : i32, i32
  }
  func.func @transform_42(%arg0: i32) -> (i32, i32) {
    %c0_i32 = arith.constant 0 : i32
    %c0_i32_0 = arith.constant 0 : i32
    %c0_i32_1 = arith.constant 0 : i32
    return %c0_i32, %c0_i32_0 : i32, i32
  }
  func.func @transform_43(%arg0: i32) -> (i32, i32) {
    %c0_i32 = arith.constant 0 : i32
    %c0_i32_0 = arith.constant 0 : i32
    %c0_i32_1 = arith.constant 0 : i32
    return %c0_i32, %c0_i32_0 : i32, i32
  }
  func.func @transform_44(%arg0: i32) -> (i32, i32) {
    %c0_i32 = arith.constant 0 : i32
    %c0_i32_0 = arith.constant 0 : i32
    %c0_i32_1 = arith.constant 0 : i32
    return %c0_i32, %c0_i32_0 : i32, i32
  }
  func.func @transform_45(%arg0: i32) -> (i32, i32) {
    %c0_i32 = arith.constant 0 : i32
    %c0_i32_0 = arith.constant 0 : i32
    %c0_i32_1 = arith.constant 0 : i32
    return %c0_i32, %c0_i32_0 : i32, i32
  }
  func.func @transform_46(%arg0: i32) -> (i32, i32) {
    %c0_i32 = arith.constant 0 : i32
    %c0_i32_0 = arith.constant 0 : i32
    %c0_i32_1 = arith.constant 0 : i32
    return %c0_i32, %c0_i32_0 : i32, i32
  }
  func.func @transform_47(%arg0: i32) -> (i32, i32) {
    %c0_i32 = arith.constant 0 : i32
    %c0_i32_0 = arith.constant 0 : i32
    %c0_i32_1 = arith.constant 0 : i32
    return %c0_i32, %c0_i32_0 : i32, i32
  }
  func.func @transform_48(%arg0: i32) -> (i32, i32) {
    %c0_i32 = arith.constant 0 : i32
    %c0_i32_0 = arith.constant 0 : i32
    %c0_i32_1 = arith.constant 0 : i32
    return %c0_i32, %c0_i32_0 : i32, i32
  }
  func.func @transform_49(%arg0: i32) -> (i32, i32, i32) {
    %c0_i32 = arith.constant 0 : i32
    %c0_i32_0 = arith.constant 0 : i32
    %c0_i32_1 = arith.constant 0 : i32
    return %arg0, %c0_i32, %c0_i32_0 : i32, i32, i32
  }
}

</mosaic_0001>

<bundles_post_ra>
// kernel: tpu_custom_call.1
= control target key start
LH: loop header
LB: loop body
LE: loop exit
PB: predicated region body
PF: predicated region fallthrough
CT: control target
= control target key end

     0   :  { %s4134_s6 = smov 1   ;;  %s4135_s10 = smov 2   ;;  %s4990_s0 = inlined_call_operand.smem [shape: u32[50], index: -1, kind: input, shape index: {}] }
   0x1   :  { %s4199_s5 = sld [smem:[%s4990_s0]]   ;;  %s4136_s14 = smov 3  }
   0x2   :  { %s4204_s9 = sld [smem:[%s4990_s0 + %s4134_s6]]   ;;  %s4137_s18 = smov 4  }
   0x3   :  { %s4209_s13 = sld [smem:[%s4990_s0 + %s4135_s10]]   ;;  %s4138_s22 = smov 5  }
   0x4   :  { %s4214_s17 = sld [smem:[%s4990_s0 + %s4136_s14]]   ;;  %s4139_s26 = smov 6  }
   0x5   :  { %s4219_s21 = sld [smem:[%s4990_s0 + %s4137_s18]]   ;;  %s4140_s30 = smov 7  }
   0x6   :  { %s4224_s25 = sld [smem:[%s4990_s0 + %s4138_s22]]   ;;  %s4141_s4 = smov 8  }
   0x7   :  { %5025 = sst [smem:[#allocation11_spill]] %s4199_s5  ;;  %s4142_s10 = smov 9  }
   0x8   :  { %5026 = sst [smem:[#allocation12_spill]] %s4204_s9  ;;  %s4143_s15 = smov 10  }
   0x9   :  { %s4229_s29 = sld [smem:[%s4990_s0 + %s4139_s26]]   ;;  %s4144_s20 = smov 11  }
   0xa   :  { %s4234_s3 = sld [smem:[%s4990_s0 + %s4140_s30]]   ;;  %s4145_s26 = smov 12  }
   0xb   :  { %s4239_s8 = sld [smem:[%s4990_s0 + %s4141_s4]]   ;;  %s4146_s1 = smov 13  }
   0xc   :  { %s4244_s14 = sld [smem:[%s4990_s0 + %s4142_s10]]   ;;  %s4147_s7 = smov 14  }
   0xd   :  { %s4249_s19 = sld [smem:[%s4990_s0 + %s4143_s15]]   ;;  %s4148_s15 = smov 15  }
   0xe   :  { %s4254_s24 = sld [smem:[%s4990_s0 + %s4144_s20]]   ;;  %s4149_s22 = smov 16  }
   0xf   :  { %s4259_s30 = sld [smem:[%s4990_s0 + %s4145_s26]]   ;;  %s4150_s28 = smov 17  }
  0x10   :  { %5027 = sst [smem:[#allocation13_spill]] %s4234_s3 }
  0x11   :  { %5028 = sst [smem:[#allocation14_spill]] %s4239_s8 }
  0x12   :  { %s4264_s6 = sld [smem:[%s4990_s0 + %s4146_s1]]  }
  0x13   :  { %s4269_s12 = sld [smem:[%s4990_s0 + %s4147_s7]]   ;;  %s4151_s7 = smov 18  }
  0x14   :  { %s4274_s20 = sld [smem:[%s4990_s0 + %s4148_s15]]   ;;  %s4152_s15 = smov 19  }
  0x15   :  { %s4279_s27 = sld [smem:[%s4990_s0 + %s4149_s22]]   ;;  %s4153_s22 = smov 20  }
  0x16   :  { %s4284_s4 = sld [smem:[%s4990_s0 + %s4150_s28]]   ;;  %s4154_s28 = smov 21  }
  0x18   :  { %5029 = sst [smem:[#allocation15_spill]] %s4264_s6 }
  0x19   :  { %5030 = sst [smem:[#allocation16_spill]] %s4269_s12 }
  0x1a   :  { %5031 = sst [smem:[#allocation17_spill]] %s4274_s20 }
  0x1b   :  { %5032 = sst [smem:[#allocation18_spill]] %s4279_s27 }
  0x1c   :  { %5033 = sst [smem:[#allocation19_spill]] %s4284_s4 }
  0x1d   :  { %s4289_s12 = sld [smem:[%s4990_s0 + %s4151_s7]]   ;;  %s4155_s7 = smov 22  }
  0x1e   :  { %s4294_s20 = sld [smem:[%s4990_s0 + %s4152_s15]]   ;;  %s4156_s15 = smov 23  }
  0x1f   :  { %s4299_s27 = sld [smem:[%s4990_s0 + %s4153_s22]]   ;;  %s4157_s22 = smov 24  }
  0x20   :  { %s4304_s4 = sld [smem:[%s4990_s0 + %s4154_s28]]   ;;  %s4158_s28 = smov 25  }
  0x23   :  { %5034 = sst [smem:[#allocation20_spill]] %s4289_s12 }
  0x24   :  { %5035 = sst [smem:[#allocation21_spill]] %s4294_s20 }
  0x25   :  { %5036 = sst [smem:[#allocation22_spill]] %s4299_s27 }
  0x26   :  { %5037 = sst [smem:[#allocation23_spill]] %s4304_s4 }
  0x27   :  { %s4309_s12 = sld [smem:[%s4990_s0 + %s4155_s7]]   ;;  %s4159_s7 = smov 26  }
  0x28   :  { %s4314_s20 = sld [smem:[%s4990_s0 + %s4156_s15]]   ;;  %s4160_s15 = smov 27  }
  0x29   :  { %s4319_s27 = sld [smem:[%s4990_s0 + %s4157_s22]]   ;;  %s4161_s22 = smov 28  }
  0x2a   :  { %s4324_s4 = sld [smem:[%s4990_s0 + %s4158_s28]]   ;;  %s4162_s28 = smov 29  }
  0x2d   :  { %5038 = sst [smem:[#allocation24_spill]] %s4309_s12 }
  0x2e   :  { %5039 = sst [smem:[#allocation25_spill]] %s4314_s20 }
  0x2f   :  { %5040 = sst [smem:[#allocation26_spill]] %s4319_s27 }
  0x30   :  { %5041 = sst [smem:[#allocation27_spill]] %s4324_s4 }
  0x31   :  { %s4329_s12 = sld [smem:[%s4990_s0 + %s4159_s7]]   ;;  %s4163_s7 = smov 30  }
  0x32   :  { %s4334_s20 = sld [smem:[%s4990_s0 + %s4160_s15]]   ;;  %s4164_s15 = smov 31  }
  0x33   :  { %s4339_s27 = sld [smem:[%s4990_s0 + %s4161_s22]]   ;;  %s4165_s22 = smov 32  }
  0x34   :  { %s4344_s4 = sld [smem:[%s4990_s0 + %s4162_s28]]   ;;  %s4166_s28 = smov 33  }
  0x37   :  { %5042 = sst [smem:[#allocation28_spill]] %s4329_s12 }
  0x38   :  { %5043 = sst [smem:[#allocation29_spill]] %s4334_s20 }
  0x39   :  { %5044 = sst [smem:[#allocation30_spill]] %s4339_s27 }
  0x3a   :  { %5045 = sst [smem:[#allocation31_spill]] %s4344_s4 }
  0x3b   :  { %s4349_s12 = sld [smem:[%s4990_s0 + %s4163_s7]]   ;;  %s4167_s7 = smov 34  }
  0x3c   :  { %s4354_s20 = sld [smem:[%s4990_s0 + %s4164_s15]]   ;;  %s4168_s15 = smov 35  }
  0x3d   :  { %s4359_s27 = sld [smem:[%s4990_s0 + %s4165_s22]]   ;;  %s4169_s22 = smov 36  }
  0x3e   :  { %s4364_s4 = sld [smem:[%s4990_s0 + %s4166_s28]]   ;;  %s4170_s28 = smov 37  }
  0x41   :  { %5046 = sst [smem:[#allocation32_spill]] %s4349_s12 }
  0x42   :  { %5047 = sst [smem:[#allocation33_spill]] %s4354_s20 }
  0x43   :  { %5048 = sst [smem:[#allocation34_spill]] %s4359_s27 }
  0x44   :  { %5049 = sst [smem:[#allocation35_spill]] %s4364_s4 }
  0x45   :  { %s4369_s12 = sld [smem:[%s4990_s0 + %s4167_s7]]   ;;  %s4171_s7 = smov 38  }
  0x46   :  { %s4374_s20 = sld [smem:[%s4990_s0 + %s4168_s15]]   ;;  %s4172_s15 = smov 39  }
  0x47   :  { %s4379_s27 = sld [smem:[%s4990_s0 + %s4169_s22]]   ;;  %s4173_s22 = smov 40  }
  0x48   :  { %s4384_s4 = sld [smem:[%s4990_s0 + %s4170_s28]]   ;;  %s4174_s28 = smov 41  }
  0x4b   :  { %5050 = sst [smem:[#allocation36_spill]] %s4369_s12 }
  0x4c   :  { %5051 = sst [smem:[#allocation37_spill]] %s4374_s20 }
  0x4d   :  { %5052 = sst [smem:[#allocation38_spill]] %s4379_s27 }
  0x4e   :  { %5053 = sst [smem:[#allocation39_spill]] %s4384_s4 }
  0x4f   :  { %s4389_s12 = sld [smem:[%s4990_s0 + %s4171_s7]]   ;;  %s4175_s7 = smov 42  }
  0x50   :  { %s4394_s20 = sld [smem:[%s4990_s0 + %s4172_s15]]   ;;  %s4176_s15 = smov 43  }
  0x51   :  { %s4399_s27 = sld [smem:[%s4990_s0 + %s4173_s22]]   ;;  %s4177_s22 = smov 44  }
  0x52   :  { %s4404_s4 = sld [smem:[%s4990_s0 + %s4174_s28]]   ;;  %s4178_s28 = smov 45  }
  0x55   :  { %5054 = sst [smem:[#allocation40_spill]] %s4389_s12 }
  0x56   :  { %5055 = sst [smem:[#allocation41_spill]] %s4394_s20 }
  0x57   :  { %5056 = sst [smem:[#allocation42_spill]] %s4399_s27 }
  0x58   :  { %5057 = sst [smem:[#allocation43_spill]] %s4404_s4 }
  0x59   :  { %s4409_s12 = sld [smem:[%s4990_s0 + %s4175_s7]]   ;;  %s4179_s7 = smov 46  }
  0x5a   :  { %s4414_s20 = sld [smem:[%s4990_s0 + %s4176_s15]]   ;;  %s4180_s15 = smov 47  }
  0x5b   :  { %s4419_s27 = sld [smem:[%s4990_s0 + %s4177_s22]]   ;;  %s4181_s22 = smov 48  }
  0x5c   :  { %s4424_s4 = sld [smem:[%s4990_s0 + %s4178_s28]]   ;;  %s4182_s28 = smov 49  }
  0x5f   :  { %5058 = sst [smem:[#allocation44_spill]] %s4409_s12 }
  0x60   :  { %5059 = sst [smem:[#allocation45_spill]] %s4414_s20 }
  0x61   :  { %5060 = sst [smem:[#allocation46_spill]] %s4419_s27 }
  0x62   :  { %5061 = sst [smem:[#allocation47_spill]] %s4424_s4 }
  0x63   :  { %s4429_s12 = sld [smem:[%s4990_s0 + %s4179_s7]]  }
  0x64   :  { %s4434_s20 = sld [smem:[%s4990_s0 + %s4180_s15]]  }
  0x65   :  { %s4439_s27 = sld [smem:[%s4990_s0 + %s4181_s22]]  }
  0x66   :  { %s4444_s4 = sld [smem:[%s4990_s0 + %s4182_s28]]  }
  0x69   :  { %5062 = sst [smem:[#allocation48_spill]] %s4429_s12 }
  0x6a   :  { %104 = vsyncpa [#allocation3], 0 }
  0x6b   :  { %105 = vsyncpa [#allocation6], 0 }
  0x6c   :  { %106 = vsyncpa [#allocation4], 0 }
  0x6d   :  { %108 = vsyncpa [#allocation4 + $0x1], 0  ;;  %s4446_s7 = smov 0   ;;  %s4448_s10 = smov 0  }
  0x6e   :  { %s4450_s11 = smov 0   ;;  %s4452_s15 = smov 0  }
  0x6f LB: > { %s5063_s12 = sld [smem:[#allocation48_spill]]  ;;  %s4467_s0 = sadd.s32 4294967295, %s4132_s15   ;;  %s4132_s15 = sphi %s4452_s15, %s5121_s15   ;;  %s4128_s11 = sphi %s4450_s11, %s5123_s11   ;;  %s4124_s10 = sphi %s4448_s10, %s5125_s10   ;;  %s4120_s7 = sphi %s4446_s7, %s5124_s7  }
  0x70   : > { %s5064_s8 = sld [smem:[#allocation14_spill]]  ;;  %s3612_s16 = sadd.s32 4294967294, %s4132_s15  }
  0x71   : > { %s5065_s6 = sld [smem:[#allocation15_spill]]  ;;  %s4471_s18 = sadd.s32 1, %s4132_s15  }
  0x72   : > { %s5066_s3 = sld [smem:[#allocation13_spill]]  ;;  %s1155_s22 = sadd.s32 1, %s4128_s11 }
  0x73   : > { %5067 = sst [smem:[#allocation49_spill]] %s4120_s7  ;;  %s1152_s23 = ssub.s32 %s4132_s15, %s4471_s18 }
  0x74   : > { %5068 = sst [smem:[#allocation50_spill]] %s4128_s11  ;;  %p1165_p0 = scmp.ne.s32.totalorder %s4128_s11, %s4124_s10 }
  0x75   : > { %5069 = sst [smem:[#allocation51_spill]] %s4132_s15  ;;  %p1153_p1 = scmp.eq.s32.totalorder %s1152_s23, 0 }
  0x76   : > { %5070 = sst [smem:[#allocation52_spill]] %s4471_s18  ;;  %p1166_p2 = scmp.eq.s32.totalorder %s4467_s0, 1 }
  0x77   : > { %p1171_p3 = scmp.ne.s32.totalorder %s4124_s10, %s4120_s7  ;;  %p1172_p4 = scmp.eq.s32.totalorder %s3612_s16, 1 }
  0x78   : > { %s4482_s26 = scalar_select %p1153_p1, %s4128_s11, %s1155_s22  }
  0x79   : > { %p4484_p5 = por %p1166_p2, %p1165_p0  ;;  %p4488_p6 = por %p1172_p4, %p1171_p3 }
  0x7a   : > { %5071 = sst [smem:[#allocation53_spill]] %s4482_s26  ;;  %p3613_p7 = scmp.ge.s32.totalorder %s4132_s15, 1 }
  0x7b   : > { %s5072_s28 = scalar_select %p4484_p5, 1, 0 }
  0x7c   : > { %s5074_s1 = scalar_select %p4488_p6, 1, 0 }
  0x7d   : > { %5073 = sst [smem:[#allocation54_spill]] %s5072_s28  ;;  %p1179_p8 = scmp.lt.s32.totalorder %s4132_s15, 3 }
  0x7e   : > { %5075 = sst [smem:[#allocation55_spill]] %s5074_s1  ;;  %p3768_p9 = scmp.eq.s32.totalorder %s4467_s0, 0 }
  0x7f   : > { %p4495_p10 = pnand %p3613_p7, %p1179_p8  ;;  %s1326_s23 = sshll.u32 %s5063_s12, 4  ;;  %s1327_s23 = int_to_ptr.hbm [resolvable:$true] %s1326_s23 }
  0x80   : > { %s4183_s16 = smov [#allocation2]   ;;  %s1341_s26 = sshll.u32 %s4439_s27, 4  ;;  %s4509_s26 = int_to_ptr.hbm [resolvable:$true] %s1341_s26 }
  0x81   : > { %p3757_p11 = pneg %p4495_p10  ;;  %s1328_s22 = sshll.u32 %s4183_s16, 4  ;;  %s1329_s22 = int_to_ptr.vmem [resolvable:$true] %s1328_s22 }
  0x82   : > { %s4184_s18 = smov [#allocation5]   ;;  %s4002_s7 = sshra.s32 %s1327_s23, 4  ;;  %s4003_s7 = int_to_ptr.hbm [resolvable:$true] %s4002_s7 }
  0x83   : > { %p4505_p12 = pnand %p3768_p9, %p3757_p11  ;;  %s4511_s1 = sshll.u32 %s4184_s18, 4  ;;  %s1344_s1 = int_to_ptr.vmem [resolvable:$true] %s4511_s1 }
  0x84   : > { %s4004_s15 = scalar_lea.hbm %s4003_s7, 1  ;;  %s4009_s16 = scalar_lea.hbm %s5063_s12, 1 }
  0x85   : > { %p4005_p13 = scmp.ne.s32.totalorder %s4003_s7, %s4004_s15  ;;  %p4006_p0 = pneg %p4505_p12 }
  0x86   : > { %p4010_p3 = scmp.lt.s32.totalorder %s4003_s7, %s5063_s12  ;;  %p4011_p4 = scmp.lt.s32.totalorder %s4009_s16, %s4004_s15 }
  0x87   : > { %p4007_p1 = pnand %p4006_p0, %p4005_p13 }
  0x88   : > { %p4012_p7 = por %p4011_p4, %p4010_p3 }
  0x89   : > { %p4008_p2 = pneg %p4007_p1 }
  0x8b   : > { %p4013_p8 = pnand %p4012_p7, %p4008_p2 }
  0x8d   : > { %4016 = shalt.err (!%p4013_p8)
}
  0x8e   : > { %3760 = dma.hbm_to_vmem [thread:$0]  (!%p4505_p12), %s1327_s23, 16, %s1329_s22, [#allocation3]  }
  0x8f   : > { %s4032_s18 = sshra.s32 %s4509_s26, 4  ;;  %s4039_s7 = scalar_lea.hbm %s4439_s27, 1  ;;  %s4033_s18 = int_to_ptr.hbm [resolvable:$true] %s4032_s18 }
  0x90   : > { %s4034_s28 = scalar_lea.hbm %s4033_s18, 1  ;;  %p4040_p2 = scmp.lt.s32.totalorder %s4033_s18, %s4439_s27 }
  0x91   : > { %p4035_p11 = scmp.ne.s32.totalorder %s4033_s18, %s4034_s28  ;;  %p4041_p3 = scmp.lt.s32.totalorder %s4039_s7, %s4034_s28 }
  0x93   : > { %p4037_p13 = pnand %p4035_p11, %p4006_p0  ;;  %p4042_p4 = por %p4041_p3, %p4040_p2 }
  0x95   : > { %p4038_p1 = pneg %p4037_p13 }
  0x97   : > { %p4043_p7 = pnand %p4042_p4, %p4038_p1 }
  0x99   : > { %4046 = shalt.err (!%p4043_p7)
}
  0x9a   : > { %3763 = dma.hbm_to_vmem [thread:$0]  (!%p4505_p12), %s4509_s26, 16, %s1344_s1, [#allocation6]  }
  0x9b   : > { %1364 = sbr.rel (%p4495_p10) target bundleno = 6925 (0x1b0d), region = 216 }
  0xa0   : > { %4107 = dma.done.wait (%p3768_p9), [#allocation3], 16  }
  0xa1   : > { %4109 = vsyncadd (%p3768_p9), [#allocation3], 4294967280 }
  0xa2   : > { %4111 = dma.done.wait (%p3768_p9), [#allocation6], 16  }
  0xa3   : > { %4113 = vsyncadd (%p3768_p9), [#allocation6], 4294967280  ;;  %s5078_s5 = sld [smem:[#allocation11_spill]]  ;;  %p1485_p12 = scmp.lt.s32.totalorder %s4467_s0, 1  ;;  %vm1504_vm0 = vcmask 1041408   ;;  %vm1500_vm1 = vcmask 31744  }
  0xa4   : > { %s5079_s9 = sld [smem:[#allocation12_spill]]  ;;  %v3867_v6 = vld [vmem:[%s4209_s13] ss:$0 sm:$0xff]  ;;  %vm1524_vm2 = vcmask 130048   ;;  %v4185_v13 = vmov 16.0   ;;  %v1588_v33 = vld [vmem:[%s4224_s25 + $0x8] sm:$0xff] }
  0xa5   : > { %s1486_s11 = scalar_select %p1485_p12, %s4467_s0, 1  ;;  %3908 = vrcp.f32 %v4185_v13  ;;  %v1587_v32 = vld [vmem:[%s4224_s25] sm:$0xff]  ;;  %v1613_v36 = vld [vmem:[%s5066_s3 + $0x8] sm:$0xff]  ;;  %v3628_v43 = vld [vmem:[%s4224_s25 + $0x10] sm:$0xff]  ;;  %v4186_v13 = vmov 0   ;;  %vm1656_vm10 = vcmask 64512  }
  0xa6   : > { %v1612_v34 = vld [vmem:[%s5066_s3] sm:$0xff]  ;;  %v1590_v35 = vpack.c.bf16 %v1588_v33, %v1587_v32  ;;  %v1634_v38 = vld [vmem:[%s4244_s14 + $0x8] sm:$0xff]  ;;  %v3629_v44 = vld [vmem:[%s4224_s25 + $0x18] sm:$0xff]  ;;  %3862 = vset.pattern.permute.xlu2 %v4186_v13  ;;  %s5080_s28 = sld [smem:[#allocation16_spill]] }
  0xa7   : > { %s3746_s15 = sshll.u32 %s1486_s11, 4  ;;  %v1633_v37 = vld [vmem:[%s4244_s14] sm:$0xff]  ;;  %v1614_v40 = vpack.c.bf16 %v1613_v36, %v1612_v34  ;;  %v3632_v45 = vld [vmem:[%s5066_s3 + $0x10] sm:$0xff]  ;;  %v1800_v47 = vpack.c.bf16 %v3629_v44, %v3628_v43  ;;  %v3633_v48 = vld [vmem:[%s5066_s3 + $0x18] sm:$0xff]  ;;  %s5081_s1 = sld [smem:[#allocation19_spill]] }
  0xa8   : > { %v1635_v41 = vpack.c.bf16 %v1634_v38, %v1633_v37  ;;  %1605 = vmatpush.bf16.msra.mxu1 %v1590_v35  ;;  %v1823_v49 = vpack.c.bf16 %v3633_v48, %v3632_v45  ;;  %v3868_v63 = vld [vmem:[%s4214_s17] ss:$0 sm:$0xff]  ;;  %v4617_v37 = vld [vmem:[%s4229_s29 + $0x1] ss:$0 sm:$0xff]  ;;  %s5082_s2 = sld [smem:[#allocation17_spill]] }
  0xa9   : > { %s1489_s26 = scalar_lea.vmem %s5078_s5, %s3746_s15  ;;  %1626 = vmatpush.bf16.msra.mxu2 %v1614_v40  ;;  %v4613_v36 = vld [vmem:[%s4254_s24] ss:$0 sm:$0xff]  ;;  %s5083_s23 = sld [smem:[#allocation18_spill]] }
  0xaa   : > { %v1493_v0 = vld [vmem:[%s5079_s9] sm:$0xf]  ;;  %v1492_v2 = vld [vmem:[%s1489_s26 + $0x8] sm:$0xff]  ;;  %1647 = vmatpush.bf16.msra.mxu3 %v1635_v41  ;;  %s5084_s22 = sld [smem:[#allocation21_spill]] }
  0xab   : > { %v1491_v1 = vld [vmem:[%s1489_s26] sm:$0xff]  ;;  %v1495_v3 = vpack.c.bf16 %v1493_v0, %v1493_v0  ;;  %v3909_v14 = vpop.eup %3908  ;;  %s5085_s16 = sld [smem:[#allocation20_spill]] }
  0xac   : > { %v1494_v5 = vpack.c.bf16 %v1492_v2, %v1491_v1  ;;  %v1532_v15 = vmul.f32 16.0, %v3909_v14  ;;  %vm1536_vm3 = vweird.f32 %v3909_v14  ;;  %s5086_s18 = sld [smem:[#allocation22_spill]] }
  0xad   : > { %v1506_v4 = vsel %vm1504_vm0, %v1495_v3, 0  ;;  %1813 = vmatpush.bf16.msrb.mxu2 %v1800_v47  ;;  %v3869_v3 = vld [vmem:[%s4219_s21] ss:$0 sm:$0xff]  ;;  %s5087_s7 = sld [smem:[#allocation23_spill]] }
  0xae   : > { %1515 = vmatpush.bf16.msra.mxu0 %v1506_v4  ;;  %v1533_v16 = vsub.f32 1.0, %v1532_v15  ;;  %1836 = vmatpush.bf16.msrb.mxu3 %v1823_v49  ;;  %s5088_s11 = sld [smem:[#allocation24_spill]] }
  0xaf   : > { %s5089_s15 = sld [smem:[#allocation25_spill]] }
  0xb0   : > { %v1534_v17 = vmul.f32 %v3909_v14, %v1533_v16  ;;  %s5101_s3 = sld [smem:[#allocation34_spill]] }
  0xb1   : > { %3622 = vmatmul.msk.bf16.vlgmr.msra.gmra.mxu0 %vm1500_vm1, %v1494_v5 }
  0xb2   : > { %v1535_v18 = vadd.f32 %v3909_v14, %v1534_v17 }
  0xb4   : > { %v4551_v19 = vsel %vm1536_vm3, %v3909_v14, %v1535_v18  ;;  %v3871_v14 = vld [vmem:[%s5064_s8] ss:$0 sm:$0xff] }
  0xb5   : > { %s5090_s26 = smov %s5089_s15 }
 0x12e   : > { %v1517_v7 = vpop.f32.mrf.mxu0 }
 0x12f   : > { %v1518_v8 = vadd.f32 %v3867_v6, %v1517_v7 }
 0x131   : > { %v1525_v9 = vsel %vm1524_vm2, %v1518_v8, 0.0 }
 0x132   : > { %1526 = vadd.xlane.f32.xlu0 %v1525_v9 }
 0x136   : > { %v1519_v10 = vpop.f32.mrf.mxu0 }
 0x137   : > { %v1520_v11 = vadd.f32 %v3867_v6, %v1519_v10  ;;  %v3870_v10 = vld [vmem:[%s4229_s29] ss:$0 sm:$0xff] }
 0x139   : > { %v1528_v12 = vsel %vm1524_vm2, %v1520_v11, 0.0 }
 0x13a   : > { %1529 = vadd.xlane.f32.xlu0 %v1528_v12 }
 0x1a5   : > { %v1527_v20 = vpop.xlane.xlu0 %1526 }
 0x1a6   : > { %v1538_v21 = vmul.f32 %v4551_v19, %v1527_v20 }
 0x1a8   : > { %v1540_v22 = vsub.f32 %v1518_v8, %v1538_v21 }
 0x1aa   : > { %v1542_v23 = vmul.f32 %v1540_v22, %v1540_v22 }
 0x1ac   : > { %v1544_v24 = vsel %vm1524_vm2, %v1542_v23, 0.0 }
 0x1ad   : > { %1545 = vadd.xlane.f32.xlu1 %v1544_v24  ;;  %v1530_v25 = vpop.xlane.xlu0 %1529 }
 0x1ae   : > { %v1539_v26 = vmul.f32 %v4551_v19, %v1530_v25 }
 0x1b0   : > { %v1541_v27 = vsub.f32 %v1520_v11, %v1539_v26  ;;  %v3872_v26 = vld [vmem:[%s4249_s19] ss:$0 sm:$0xff] }
 0x1b2   : > { %v1543_v28 = vmul.f32 %v1541_v27, %v1541_v27 }
 0x1b4   : > { %v1547_v29 = vsel %vm1524_vm2, %v1543_v28, 0.0 }
 0x1b5   : > { %1548 = vadd.xlane.f32.xlu1 %v1547_v29 }
 0x220   : > { %v1546_v30 = vpop.xlane.xlu1 %1545 }
 0x221   : > { %v1550_v31 = vmul.f32 %v1546_v30, %v4551_v19 }
 0x223   : > { %v1552_v39 = vadd.f32 1e-05, %v1550_v31 }
 0x225   : > { %3910 = vrsqrt.f32 %v1552_v39  ;;  %vm1560_vm5 = vweird.f32 %v1552_v39 }
 0x228   : > { %v1549_v42 = vpop.xlane.xlu1 %1548 }
 0x229   : > { %v1551_v46 = vmul.f32 %v1549_v42, %v4551_v19 }
 0x22b   : > { %v3911_v50 = vpop.eup %3910  ;;  %v1553_v51 = vadd.f32 1e-05, %v1551_v46 }
 0x22c   : > { %v1555_v52 = vmul.f32 %v3911_v50, %v1552_v39  ;;  %vm1561_vm4 = vweird.f32 %v3911_v50 }
 0x22d   : > { %3912 = vrsqrt.f32 %v1553_v51  ;;  %vm1562_vm6 = vmor %vm1560_vm5, %vm1561_vm4  ;;  %vm1570_vm8 = vweird.f32 %v1553_v51 }
 0x22e   : > { %v1556_v53 = vmul.f32 %v3911_v50, %v1555_v52 }
 0x230   : > { %v1557_v54 = vmul.f32 0.5, %v1556_v53 }
 0x232   : > { %v1558_v55 = vsub.f32 1.5, %v1557_v54 }
 0x233   : > { %v3913_v56 = vpop.eup %3912 }
 0x234   : > { %v1559_v57 = vmul.f32 %v3911_v50, %v1558_v55  ;;  %v1565_v58 = vmul.f32 %v3913_v56, %v1553_v51  ;;  %vm1571_vm7 = vweird.f32 %v3913_v56 }
 0x235   : > { %vm1572_vm9 = vmor %vm1570_vm8, %vm1571_vm7 }
 0x236   : > { %v1566_v59 = vmul.f32 %v3913_v56, %v1565_v58  ;;  %v1563_v60 = vsel %vm1562_vm6, %v3911_v50, %v1559_v57 }
 0x237   : > { %v1574_v0 = vmul.f32 %v1563_v60, %v1540_v22 }
 0x238   : > { %v1567_v61 = vmul.f32 0.5, %v1566_v59 }
 0x239   : > { %v1579_v4 = vmul.f32 %v3868_v63, %v1574_v0 }
 0x23a   : > { %v1568_v62 = vsub.f32 1.5, %v1567_v61 }
 0x23b   : > { %v4571_v7 = vadd.f32 %v3869_v3, %v1579_v4 }
 0x23c   : > { %v1569_v1 = vmul.f32 %v3913_v56, %v1568_v62 }
 0x23e   : > { %v1573_v2 = vsel %vm1572_vm9, %v3913_v56, %v1569_v1 }
 0x23f   : > { %v1575_v5 = vmul.f32 %v1573_v2, %v1541_v27 }
 0x241   : > { %v1580_v6 = vmul.f32 %v3868_v63, %v1575_v5 }
 0x243   : > { %v4573_v8 = vadd.f32 %v3869_v3, %v1580_v6 }
 0x245   : > { %v4577_v9 = vpack.c.bf16 %v4573_v8, %v4571_v7 }
 0x247   : > { %3623 = vmatmul.msk.bf16.vlgmr.msra.gmra.mxu1 %vm1524_vm2, %v4577_v9  ;;  %3624 = vmatmul.msk.bf16.vlgmr.msra.gmra.mxu2 %vm1524_vm2, %v4577_v9 }
 0x248   : > { %3625 = vmatmul.msk.bf16.vlgmr.msra.gmra.mxu3 %vm1524_vm2, %v4577_v9 }
 0x257   : > { %3631 = vmatmul.msk.bf16.vlgmr.msrb.gmra.mxu2 %vm1524_vm2, %v4577_v9 }
 0x258   : > { %3635 = vmatmul.msk.bf16.vlgmr.msrb.gmra.mxu3 %vm1524_vm2, %v4577_v9 }
 0x2c4   : > { %v1607_v11 = vpop.f32.mrf.mxu1 }
 0x2c5   : > { %v4590_v12 = vadd.f32 %v3870_v10, %v1607_v11 }
 0x2c7   : > { %v1654_v15 = vmul.f32 %v4590_v12, %v4590_v12 }
 0x2c9   : > { %v1657_v16 = vsel %vm1656_vm10, %v1654_v15, 0.0  ;;  %v3636_v15 = vld [vmem:[%s4244_s14 + $0x10] sm:$0xff] }
 0x2ca   : > { %v1628_v17 = vpop.f32.mrf.mxu2  ;;  %1658 = vadd.xlane.f32.xlu0 %v1657_v16  ;;  %v3637_v16 = vld [vmem:[%s4244_s14 + $0x18] sm:$0xff] }
 0x2cb   : > { %v4596_v18 = vadd.f32 %v3871_v14, %v1628_v17  ;;  %v1649_v20 = vpop.f32.mrf.mxu3 }
 0x2cc   : > { %v1609_v21 = vpop.f32.mrf.mxu1  ;;  %v1650_v31 = vadd.f32 %v3872_v26, %v1649_v20 }
 0x2cd   : > { %v4598_v22 = vadd.f32 %v3870_v10, %v1609_v21  ;;  %v1687_v23 = vmul.f32 %v4596_v18, %v4596_v18 }
 0x2cf   : > { %v1689_v24 = vsel %vm1656_vm10, %v1687_v23, 0.0  ;;  %v1655_v25 = vmul.f32 %v4598_v22, %v4598_v22 }
 0x2d0   : > { %1690 = vadd.xlane.f32.xlu2 %v1689_v24  ;;  %v1846_v24 = vpack.c.bf16 %v3637_v16, %v3636_v15 }
 0x2d1   : > { %v1660_v27 = vsel %vm1656_vm10, %v1655_v25, 0.0 }
 0x2d2   : > { %v1630_v28 = vpop.f32.mrf.mxu2  ;;  %1661 = vadd.xlane.f32.xlu1 %v1660_v27 }
 0x2d3   : > { %v4607_v29 = vadd.f32 %v3871_v14, %v1630_v28  ;;  %v1651_v30 = vpop.f32.mrf.mxu3 }
 0x2d4   : > { %v1652_v32 = vadd.f32 %v3872_v26, %v1651_v30 }
 0x2d5   : > { %v1688_v33 = vmul.f32 %v4607_v29, %v4607_v29 }
 0x2d6   : > { %v1776_v34 = vpack.c.bf16 %v1652_v32, %v1650_v31 }
 0x2d7   : > { %v1692_v35 = vsel %vm1656_vm10, %v1688_v33, 0.0  ;;  %v1749_v33 = vld [vmem:[%s4259_s30] sm:$0xff] }
 0x2d8   : > { %1787 = vmatpush.bf16.msrb.mxu1 %v1776_v34  ;;  %1693 = vadd.xlane.f32.xlu2 %v1692_v35  ;;  %v3874_v34 = vld [vmem:[%s5064_s8 + $0x1] ss:$0 sm:$0xff] }
 0x2da   : > { %v1815_v38 = vpop.f32.mrf.mxu2 }
 0x2db   : > { %v4620_v39 = vadd.f32 %v4617_v37, %v1815_v38  ;;  %v1838_v30 = vpop.f32.mrf.mxu3 }
 0x2dd   : > { %v1866_v40 = vmul.f32 %v4620_v39, %v4620_v39 }
 0x2df   : > { %v1868_v41 = vsel %vm1656_vm10, %v1866_v40, 0.0  ;;  %v4637_v40 = vadd.f32 %v3874_v34, %v1838_v30 }
 0x2f0   : > { %1744 = vperm.xlu2 %3862, %v4613_v36  }
 0x319   : > { %1869 = vadd.xlane.f32.xlu2 %v1868_v41  ;;  %v1750_v41 = vld [vmem:[%s4259_s30 + $0x8] sm:$0xff] }
 0x33d   : > { %v1659_v42 = vpop.xlane.xlu0 %1658 }
 0x33e   : > { %v1663_v43 = vmax.f32 %v1659_v42, 1e-24 }
 0x340   : > { %vm1671_vm8 = vweird.f32 %v1663_v43 }
 0x343   : > { %v1691_v44 = vpop.xlane.xlu2 %1690 }
 0x344   : > { %v1695_v45 = vmax.f32 %v1691_v44, 1e-24 }
 0x345   : > { %v1662_v46 = vpop.xlane.xlu1 %1661 }
 0x346   : > { %3914 = vrsqrt.f32 %v1695_v45  ;;  %v1664_v47 = vmax.f32 %v1662_v46, 1e-24  ;;  %vm1703_vm12 = vweird.f32 %v1695_v45 }
 0x347   : > { %3916 = vrsqrt.f32 %v1663_v43 }
 0x348   : > { %3918 = vrsqrt.f32 %v1664_v47  ;;  %vm1681_vm6 = vweird.f32 %v1664_v47 }
 0x34b   : > { %v1694_v48 = vpop.xlane.xlu2 %1693 }
 0x34c   : > { %v3915_v49 = vpop.eup %3914  ;;  %v1696_v50 = vmax.f32 %v1694_v48, 1e-24 }
 0x34d   : > { %v3917_v51 = vpop.eup %3916  ;;  %v1698_v52 = vmul.f32 %v3915_v49, %v1695_v45  ;;  %vm1704_vm11 = vweird.f32 %v3915_v49 }
 0x34e   : > { %v3919_v53 = vpop.eup %3918  ;;  %3920 = vrsqrt.f32 %v1696_v50  ;;  %v1666_v56 = vmul.f32 %v3917_v51, %v1663_v43  ;;  %vm1705_vm14 = vmor %vm1703_vm12, %vm1704_vm11  ;;  %vm1713_vm15 = vweird.f32 %v1696_v50  ;;  %vm1672_vm5 = vweird.f32 %v3917_v51 }
 0x34f   : > { %v1699_v54 = vmul.f32 %v3915_v49, %v1698_v52  ;;  %v1676_v55 = vmul.f32 %v3919_v53, %v1664_v47  ;;  %vm1682_vm4 = vweird.f32 %v3919_v53  ;;  %vm1673_vm9 = vmor %vm1671_vm8, %vm1672_vm5  ;;  %v1898_v43 = vmul.f32 %v4637_v40, %v4637_v40 }
 0x350   : > { %v1667_v60 = vmul.f32 %v3917_v51, %v1666_v56  ;;  %vm1683_vm7 = vmor %vm1681_vm6, %vm1682_vm4 }
 0x351   : > { %v1700_v57 = vmul.f32 0.5, %v1699_v54  ;;  %v1677_v58 = vmul.f32 %v3919_v53, %v1676_v55  ;;  %v1900_v46 = vsel %vm1656_vm10, %v1898_v43, 0.0 }
 0x352   : > { %v1668_v1 = vmul.f32 0.5, %v1667_v60 }
 0x353   : > { %v1701_v61 = vsub.f32 1.5, %v1700_v57  ;;  %v1678_v63 = vmul.f32 0.5, %v1677_v58  ;;  %v1745_v31 = vpop.permute.xlu2 %1744 }
 0x354   : > { %v3921_v59 = vpop.eup %3920  ;;  %v1669_v6 = vsub.f32 1.5, %v1668_v1 }
 0x355   : > { %v1708_v62 = vmul.f32 %v3921_v59, %v1696_v50  ;;  %v1702_v3 = vmul.f32 %v3915_v49, %v1701_v61  ;;  %v1679_v4 = vsub.f32 1.5, %v1678_v63  ;;  %vm1714_vm13 = vweird.f32 %v3921_v59  ;;  %v3876_v50 = vld [vmem:[%s4249_s19 + $0x1] ss:$0 sm:$0xff]  ;;  %v1817_v61 = vpop.f32.mrf.mxu2 }
 0x356   : > { %vm1715_vm3 = vmor %vm1713_vm15, %vm1714_vm13  ;;  %v1670_v21 = vmul.f32 %v3917_v51, %v1669_v6 }
 0x357   : > { %v1709_v0 = vmul.f32 %v3921_v59, %v1708_v62  ;;  %v1706_v10 = vsel %vm1705_vm14, %v3915_v49, %v1702_v3  ;;  %v1680_v13 = vmul.f32 %v3919_v53, %v1679_v4 }
 0x358   : > { %v1717_v17 = vmul.f32 %v1706_v10, %v4596_v18  ;;  %v1674_v27 = vsel %vm1673_vm9, %v3917_v51, %v1670_v21 }
 0x359   : > { %v1710_v2 = vmul.f32 0.5, %v1709_v0  ;;  %v1684_v25 = vsel %vm1683_vm7, %v3919_v53, %v1680_v13  ;;  %v1685_v18 = vmul.f32 %v1674_v27, %v4590_v12 }
 0x35a   : > { %v1686_v28 = vmul.f32 %v1684_v25, %v4598_v22 }
 0x35b   : > { %v1711_v5 = vsub.f32 1.5, %v1710_v2  ;;  %v4648_v2 = vadd.f32 %v4617_v37, %v1817_v61  ;;  %v1794_v61 = vld [vmem:[%s5065_s6] sm:$0xff] }
 0x35d   : > { %v1712_v11 = vmul.f32 %v3921_v59, %v1711_v5  ;;  %v1867_v5 = vmul.f32 %v4648_v2, %v4648_v2 }
 0x35f   : > { %v1716_v14 = vsel %vm1715_vm3, %v3921_v59, %v1712_v11  ;;  %v1871_v15 = vsel %vm1656_vm10, %v1867_v5, 0.0 }
 0x360   : > { %v1718_v20 = vmul.f32 %v1716_v14, %v4607_v29  ;;  %v1719_v29 = vpack.c.bf16 %v1686_v28, %v1685_v18 }
 0x362   : > { %v1720_v23 = vpack.c.bf16 %v1718_v20, %v1717_v17 }
 0x364   : > { %v1725_v26 = vsel %vm1656_vm10, %v1720_v23, 0 }
 0x365   : > { %1734 = vmatpush.bf16.xpose.msrb.mxu0 %v1725_v26 }
 0x36c   : > { %3626 = vmatmul.msk.bf16.vlgmr.msrb.gmra.mxu0 %vm1656_vm10, %v1719_v29 }
 0x36d   : > { %1859 = vmatpush.bf16.msra.mxu0 %v1846_v24 }
 0x37c   : > { %3639 = vmatmul.msk.bf16.vlgmr.msra.gmra.mxu0 %vm1524_vm2, %v4577_v9  ;;  %v1840_v9 = vpop.f32.mrf.mxu3 }
 0x37d   : > { %v1841_v45 = vadd.f32 %v3874_v34, %v1840_v9 }
 0x37f   : > { %v1899_v49 = vmul.f32 %v1841_v45, %v1841_v45 }
 0x381   : > { %v1903_v51 = vsel %vm1656_vm10, %v1899_v49, 0.0 }
 0x3e9   : > { %v1736_v32 = vpop.f32.mrf.mxu0 }
 0x3ea   : > { %v1747_v35 = vmul.f32 %v1745_v31, %v1736_v32 }
 0x3ec   : > { %v1751_v38 = vadd.f32 %v1749_v33, %v1747_v35  ;;  %v1870_v33 = vpop.xlane.xlu2 %1869 }
 0x3ed   : > { %v1874_v34 = vmax.f32 %v1870_v33, 1e-24 }
 0x3ee   : > { %v1753_v22 = vsel %vm1524_vm2, %v1751_v38, -inf }
 0x3ef   : > { %1754 = vmax.xlane.f32.xlu0 %v1753_v22  ;;  %vm1882_vm7 = vweird.f32 %v1874_v34 }
 0x3f1   : > { %v1738_v12 = vpop.f32.mrf.mxu0 }
 0x3f2   : > { %v1748_v42 = vmul.f32 %v1745_v31, %v1738_v12 }
 0x3f4   : > { %v1752_v44 = vadd.f32 %v1750_v41, %v1748_v42 }
 0x3f6   : > { %v1756_v47 = vsel %vm1524_vm2, %v1752_v44, -inf }
 0x3f7   : > { %1901 = vadd.xlane.f32.xlu0 %v1900_v46  ;;  %1757 = vmax.xlane.f32.xlu1 %v1756_v47 }
 0x3f9   : > { %v1861_v48 = vpop.f32.mrf.mxu0 }
 0x3fa   : > { %v1862_v53 = vadd.f32 %v3876_v50, %v1861_v48 }
 0x3ff   : > { %1904 = vadd.xlane.f32.xlu1 %v1903_v51 }
 0x401   : > { %v1863_v52 = vpop.f32.mrf.mxu0 }
 0x402   : > { %v1864_v54 = vadd.f32 %v3876_v50, %v1863_v52 }
 0x404   : > { %v1986_v55 = vpack.c.bf16 %v1864_v54, %v1862_v53 }
 0x406   : > { %1997 = vmatpush.bf16.msra.mxu2 %v1986_v55 }
 0x462   : > { %v1755_v56 = vpop.xlane.xlu0 %1754 }
 0x463   : > { %v1759_v57 = vsub.f32 %v1751_v38, %v1755_v56  ;;  %v4187_v38 = vmov 1  }
 0x464   : > { %3863 = vset.pattern.permute.xlu1 %v4187_v38 }
 0x465   : > { %v1761_v58 = vmul.f32 1.442695, %v1759_v57 }
 0x467   : > { %3922 = vpow2.f32 %v1761_v58 }
 0x46a   : > { %v1902_v59 = vpop.xlane.xlu0 %1901  ;;  %v1758_v60 = vpop.xlane.xlu1 %1757 }
 0x46b   : > { %v1906_v62 = vmax.f32 %v1902_v59, 1e-24  ;;  %v1760_v63 = vsub.f32 %v1752_v44, %v1758_v60 }
 0x46d   : > { %v3923_v0 = vpop.eup %3922  ;;  %3924 = vrsqrt.f32 %v1906_v62  ;;  %v1763_v1 = vmul.f32 1.442695, %v1760_v63  ;;  %vm1914_vm12 = vweird.f32 %v1906_v62 }
 0x46e   : > { %v1765_v3 = vsel %vm1524_vm2, %v3923_v0, 0.0 }
 0x46f   : > { %3926 = vpow2.f32 %v1763_v1  ;;  %1766 = vadd.xlane.f32.xlu0 %v1765_v3 }
 0x472   : > { %v1905_v4 = vpop.xlane.xlu1 %1904 }
 0x473   : > { %v3925_v6 = vpop.eup %3924  ;;  %v1907_v10 = vmax.f32 %v1905_v4, 1e-24 }
 0x474   : > { %v1909_v11 = vmul.f32 %v3925_v6, %v1906_v62  ;;  %vm1915_vm11 = vweird.f32 %v3925_v6  ;;  %v1796_v62 = vpack.c.bf16 %v1794_v61, %v1794_v61 }
 0x475   : > { %v3927_v13 = vpop.eup %3926  ;;  %3928 = vrsqrt.f32 %v1907_v10  ;;  %vm1916_vm14 = vmor %vm1914_vm12, %vm1915_vm11  ;;  %vm1924_vm15 = vweird.f32 %v1907_v10  ;;  %vm2011_vm11 = vcmask 1043456  }
 0x476   : > { %v1910_v14 = vmul.f32 %v3925_v6, %v1909_v11  ;;  %v1768_v16 = vsel %vm1524_vm2, %v3927_v13, 0.0  ;;  %3930 = vrsqrt.f32 %v1874_v34  ;;  %v2033_v63 = vsel %vm2011_vm11, %v1796_v62, 0 }
 0x477   : > { %1872 = vadd.xlane.f32.xlu0 %v1871_v15  ;;  %1769 = vadd.xlane.f32.xlu1 %v1768_v16 }
 0x478   : > { %v1911_v37 = vmul.f32 0.5, %v1910_v14  ;;  %2042 = vmatpush.bf16.msrb.mxu0 %v2033_v63 }
 0x47a   : > { %v1912_v20 = vsub.f32 1.5, %v1911_v37 }
 0x47b   : > { %v3929_v17 = vpop.eup %3928 }
 0x47c   : > { %v1919_v21 = vmul.f32 %v3929_v17, %v1907_v10  ;;  %v1913_v24 = vmul.f32 %v3925_v6, %v1912_v20  ;;  %vm1925_vm13 = vweird.f32 %v3929_v17  ;;  %v3931_v22 = vpop.eup %3930 }
 0x47d   : > { %vm1926_vm3 = vmor %vm1924_vm15, %vm1925_vm13  ;;  %v1877_v42 = vmul.f32 %v3931_v22, %v1874_v34  ;;  %vm1883_vm5 = vweird.f32 %v3931_v22 }
 0x47e   : > { %v1920_v23 = vmul.f32 %v3929_v17, %v1919_v21  ;;  %v1917_v27 = vsel %vm1916_vm14, %v3925_v6, %v1913_v24  ;;  %vm1884_vm9 = vmor %vm1882_vm7, %vm1883_vm5  ;;  %vm2167_vm5 = vcmask 261120  }
 0x47f   : > { %v1928_v29 = vmul.f32 %v1917_v27, %v4637_v40  ;;  %v1878_v9 = vmul.f32 %v3931_v22, %v1877_v42 }
 0x480   : > { %v1921_v25 = vmul.f32 0.5, %v1920_v23 }
 0x481   : > { %v1879_v48 = vmul.f32 0.5, %v1878_v9 }
 0x482   : > { %v1922_v26 = vsub.f32 1.5, %v1921_v25 }
 0x484   : > { %v1923_v28 = vmul.f32 %v3929_v17, %v1922_v26 }
 0x486   : > { %v1927_v18 = vsel %vm1926_vm3, %v3929_v17, %v1923_v28 }
 0x487   : > { %v1929_v30 = vmul.f32 %v1927_v18, %v1841_v45 }
 0x489   : > { %v1931_v31 = vpack.c.bf16 %v1929_v30, %v1928_v29 }
 0x48b   : > { %v1936_v32 = vsel %vm1656_vm10, %v1931_v31, 0 }
 0x48c   : > { %1945 = vmatpush.bf16.xpose.msra.mxu1 %v1936_v32 }
 0x490   : > { %1953 = vperm.xlu1 %3863, %v4613_v36   ;;  %v1880_v36 = vsub.f32 1.5, %v1879_v48 }
 0x492   : > { %v1881_v54 = vmul.f32 %v3931_v22, %v1880_v36 }
 0x494   : > { %v1885_v57 = vsel %vm1884_vm9, %v3931_v22, %v1881_v54 }
 0x495   : > { %v1896_v59 = vmul.f32 %v1885_v57, %v4620_v39 }
 0x4e2   : > { %v1767_v35 = vpop.xlane.xlu0 %1766 }
 0x4e3   : > { %3932 = vrcp.f32 %v1767_v35  ;;  %v3644_v35 = vld [vmem:[%s5065_s6 + $0x8] sm:$0xff] }
 0x4e4   : > { %v2007_v38 = vpack.c.bf16 %v3644_v35, %v3644_v35  ;;  %v2158_v35 = vld [vmem:[%s5084_s22 + $0x10] sm:$0xff] }
 0x4e6   : > { %v2013_v22 = vsel %vm2011_vm11, %v2007_v38, 0  ;;  %v2159_v38 = vld [vmem:[%s5084_s22 + $0x18] sm:$0xff] }
 0x4e7   : > { %2022 = vmatpush.bf16.msra.mxu3 %v2013_v22  ;;  %v2162_v22 = vpack.c.bf16 %v2159_v38, %v2158_v35 }
 0x4e9   : > { %v3933_v40 = vpop.eup %3932  ;;  %2177 = vmatpush.bf16.msrb.mxu2 %v2162_v22 }
 0x4ea   : > { %v1873_v12 = vpop.xlane.xlu0 %1872  ;;  %v1770_v41 = vpop.xlane.xlu1 %1769  ;;  %v1773_v45 = vmul.f32 %v3933_v40, %v3923_v0  ;;  %v3877_v40 = vld [vmem:[%s5080_s28] ss:$0 sm:$0xff]  ;;  %s5091_s28 = sld [smem:[#allocation26_spill]] }
 0x4eb   : > { %v1875_v43 = vmax.f32 %v1873_v12, 1e-24  ;;  %3934 = vrcp.f32 %v1770_v41 }
 0x4ed   : > { %3936 = vrsqrt.f32 %v1875_v43  ;;  %vm1892_vm6 = vweird.f32 %v1875_v43 }
 0x4f1   : > { %v3935_v44 = vpop.eup %3934 }
 0x4f2   : > { %v1774_v46 = vmul.f32 %v3935_v44, %v3927_v13  ;;  %v3642_v13 = vld [vmem:[%s4259_s30 + $0x18] sm:$0xff] }
 0x4f3   : > { %v3937_v47 = vpop.eup %3936 }
 0x4f4   : > { %v1887_v49 = vmul.f32 %v3937_v47, %v1875_v43  ;;  %v1775_v50 = vpack.c.bf16 %v1774_v46, %v1773_v45  ;;  %vm1893_vm4 = vweird.f32 %v3937_v47 }
 0x4f5   : > { %vm1894_vm8 = vmor %vm1892_vm6, %vm1893_vm4 }
 0x4f6   : > { %v1888_v51 = vmul.f32 %v3937_v47, %v1887_v49  ;;  %3627 = vmatmul.msk.bf16.vlgmr.msrb.gmra.mxu1 %vm1524_vm2, %v1775_v50 }
 0x4f8   : > { %v1889_v52 = vmul.f32 0.5, %v1888_v51 }
 0x4fa   : > { %v1890_v53 = vsub.f32 1.5, %v1889_v52 }
 0x4fc   : > { %v1891_v55 = vmul.f32 %v3937_v47, %v1890_v53 }
 0x4fe   : > { %v1895_v56 = vsel %vm1894_vm8, %v3937_v47, %v1891_v55 }
 0x4ff   : > { %v1897_v58 = vmul.f32 %v1895_v56, %v4648_v2  ;;  %v3641_v2 = vld [vmem:[%s4259_s30 + $0x10] sm:$0xff] }
 0x501   : > { %v1930_v60 = vpack.c.bf16 %v1897_v58, %v1896_v59 }
 0x502   : > { %v1954_v4 = vpop.permute.xlu1 %1953 }
 0x506   : > { %3640 = vmatmul.msk.bf16.vlgmr.msra.gmra.mxu1 %vm1656_vm10, %v1930_v60 }
 0x573   : > { %v1789_v0 = vpop.f32.mrf.mxu1 }
 0x57b   : > { %v1791_v1 = vpop.f32.mrf.mxu1 }
 0x57c   : > { %v1795_v3 = vpack.c.bf16 %v1791_v1, %v1789_v0  ;;  %v2113_v0 = vld [vmem:[%s5081_s1] sm:$0xff]  ;;  %v2114_v1 = vld [vmem:[%s5081_s1 + $0x8] sm:$0xff]  ;;  %s5100_s1 = sld [smem:[#allocation32_spill]] }
 0x57e   : > { %3646 = vmatmul.msk.bf16.vlgmr.msrb.gmra.mxu0 %vm1656_vm10, %v1795_v3  ;;  %v2116_v3 = vpack.c.bf16 %v2114_v1, %v2113_v0 }
 0x580   : > { %2131 = vmatpush.bf16.msrb.mxu1 %v2116_v3 }
 0x583   : > { %v1947_v5 = vpop.f32.mrf.mxu1 }
 0x584   : > { %v1956_v6 = vmul.f32 %v1954_v4, %v1947_v5 }
 0x586   : > { %v1961_v39 = vadd.f32 %v3641_v2, %v1956_v6 }
 0x588   : > { %v1963_v10 = vsel %vm1524_vm2, %v1961_v39, -inf }
 0x589   : > { %1964 = vmax.xlane.f32.xlu0 %v1963_v10 }
 0x58b   : > { %v1949_v11 = vpop.f32.mrf.mxu1 }
 0x58c   : > { %v1957_v14 = vmul.f32 %v1954_v4, %v1949_v11 }
 0x58e   : > { %v1962_v15 = vadd.f32 %v3642_v13, %v1957_v14 }
 0x590   : > { %v1966_v16 = vsel %vm1524_vm2, %v1962_v15, -inf }
 0x591   : > { %1967 = vmax.xlane.f32.xlu0 %v1966_v16 }
 0x5fb   : > { %v2044_v43 = vpop.f32.mrf.mxu0 }
 0x5fc   : > { %v1965_v37 = vpop.xlane.xlu0 %1964 }
 0x5fd   : > { %v1969_v17 = vsub.f32 %v1961_v39, %v1965_v37 }
 0x5ff   : > { %v1971_v20 = vmul.f32 1.442695, %v1969_v17 }
 0x601   : > { %3938 = vpow2.f32 %v1971_v20 }
 0x603   : > { %v2046_v47 = vpop.f32.mrf.mxu0 }
 0x604   : > { %v1968_v21 = vpop.xlane.xlu0 %1967 }
 0x605   : > { %v1970_v23 = vsub.f32 %v1962_v15, %v1968_v21  ;;  %v3878_v21 = vld [vmem:[%s5082_s2] ss:$0 sm:$0xff]  ;;  %s5092_s2 = sld [smem:[#allocation35_spill]] }
 0x607   : > { %v3939_v24 = vpop.eup %3938  ;;  %v1973_v25 = vmul.f32 1.442695, %v1970_v23 }
 0x608   : > { %v1975_v26 = vsel %vm1524_vm2, %v3939_v24, 0.0 }
 0x609   : > { %3940 = vpow2.f32 %v1973_v25  ;;  %1976 = vadd.xlane.f32.xlu0 %v1975_v26  ;;  %v3879_v26 = vld [vmem:[%s5083_s23] ss:$0 sm:$0xff]  ;;  %s5093_s23 = sld [smem:[#allocation29_spill]] }
 0x60f   : > { %v3941_v27 = vpop.eup %3940 }
 0x610   : > { %v1978_v28 = vsel %vm1524_vm2, %v3941_v27, 0.0 }
 0x611   : > { %1979 = vadd.xlane.f32.xlu1 %v1978_v28 }
 0x67c   : > { %v1977_v18 = vpop.xlane.xlu0 %1976 }
 0x67d   : > { %3942 = vrcp.f32 %v1977_v18 }
 0x683   : > { %v3943_v30 = vpop.eup %3942 }
 0x684   : > { %v1980_v29 = vpop.xlane.xlu1 %1979  ;;  %v1983_v32 = vmul.f32 %v3943_v30, %v3939_v24 }
 0x685   : > { %3944 = vrcp.f32 %v1980_v29 }
 0x68b   : > { %v3945_v31 = vpop.eup %3944 }
 0x68c   : > { %v1984_v33 = vmul.f32 %v3945_v31, %v3941_v27 }
 0x68e   : > { %v1985_v34 = vpack.c.bf16 %v1984_v33, %v1983_v32 }
 0x690   : > { %3643 = vmatmul.msk.bf16.vlgmr.msra.gmra.mxu2 %vm1524_vm2, %v1985_v34 }
 0x713   : > { %v1999_v12 = vpop.f32.mrf.mxu2 }
 0x71b   : > { %v2001_v41 = vpop.f32.mrf.mxu2 }
 0x71c   : > { %v2006_v42 = vpack.c.bf16 %v2001_v41, %v1999_v12  ;;  %v2156_v12 = vld [vmem:[%s5084_s22] sm:$0xff]  ;;  %v2157_v41 = vld [vmem:[%s5084_s22 + $0x8] sm:$0xff] }
 0x71e   : > { %3645 = vmatmul.msk.bf16.vlgmr.msra.gmra.mxu3 %vm1656_vm10, %v2006_v42  ;;  %v3880_v42 = vld [vmem:[%s5085_s16] ss:$0 sm:$0xff]  ;;  %s5094_s16 = sld [smem:[#allocation31_spill]] }
 0x7a1   : > { %v2024_v9 = vpop.f32.mrf.mxu3 }
 0x7a2   : > { %v2045_v44 = vadd.f32 %v2044_v43, %v2024_v9  ;;  %v2161_v43 = vpack.c.bf16 %v2157_v41, %v2156_v12  ;;  %v3882_v41 = vld [vmem:[%s5087_s7] ss:$0 sm:$0xff]  ;;  %s5096_s7 = sld [smem:[#allocation27_spill]] }
 0x7a4   : > { %v2053_v45 = vadd.f32 %v3877_v40, %v2045_v44  ;;  %2178 = vmatpush.bf16.msrb.mxu2 %v2161_v43 }
 0x7a6   : > { %v2057_v46 = vsel %vm1524_vm2, %v2053_v45, 0.0 }
 0x7a7   : > { %2058 = vadd.xlane.f32.xlu0 %v2057_v46 }
 0x7a9   : > { %v2026_v48 = vpop.f32.mrf.mxu3 }
 0x7aa   : > { %v2047_v49 = vadd.f32 %v2046_v47, %v2026_v48 }
 0x7ac   : > { %v2054_v50 = vadd.f32 %v3877_v40, %v2047_v49 }
 0x7ae   : > { %v2060_v51 = vsel %vm1524_vm2, %v2054_v50, 0.0 }
 0x7af   : > { %2061 = vadd.xlane.f32.xlu2 %v2060_v51 }
 0x81a   : > { %v2059_v36 = vpop.xlane.xlu0 %2058 }
 0x81b   : > { %v2063_v52 = vmul.f32 %v2059_v36, %v4551_v19 }
 0x81d   : > { %v2065_v53 = vsub.f32 %v2053_v45, %v2063_v52 }
 0x81f   : > { %v2067_v54 = vmul.f32 %v2065_v53, %v2065_v53 }
 0x821   : > { %v2069_v55 = vsel %vm1524_vm2, %v2067_v54, 0.0 }
 0x822   : > { %2070 = vadd.xlane.f32.xlu0 %v2069_v55  ;;  %v2062_v56 = vpop.xlane.xlu2 %2061 }
 0x823   : > { %v2064_v57 = vmul.f32 %v2062_v56, %v4551_v19 }
 0x825   : > { %v2066_v58 = vsub.f32 %v2054_v50, %v2064_v57 }
 0x827   : > { %v2068_v59 = vmul.f32 %v2066_v58, %v2066_v58 }
 0x829   : > { %v2072_v60 = vsel %vm1524_vm2, %v2068_v59, 0.0 }
 0x82a   : > { %2073 = vadd.xlane.f32.xlu2 %v2072_v60 }
 0x895   : > { %v2071_v61 = vpop.xlane.xlu0 %2070 }
 0x896   : > { %v2075_v62 = vmul.f32 %v2071_v61, %v4551_v19 }
 0x898   : > { %v2077_v63 = vadd.f32 1e-05, %v2075_v62  ;;  %v3881_v62 = vld [vmem:[%s5086_s18] ss:$0 sm:$0xff]  ;;  %s5095_s18 = sld [smem:[#allocation33_spill]] }
 0x89a   : > { %3946 = vrsqrt.f32 %v2077_v63  ;;  %vm2085_vm13 = vweird.f32 %v2077_v63 }
 0x89d   : > { %v2074_v4 = vpop.xlane.xlu2 %2073 }
 0x89e   : > { %v2076_v5 = vmul.f32 %v2074_v4, %v4551_v19 }
 0x8a0   : > { %v3947_v2 = vpop.eup %3946  ;;  %v2078_v6 = vadd.f32 1e-05, %v2076_v5 }
 0x8a1   : > { %v2080_v39 = vmul.f32 %v3947_v2, %v2077_v63  ;;  %vm2086_vm12 = vweird.f32 %v3947_v2 }
 0x8a2   : > { %3948 = vrsqrt.f32 %v2078_v6  ;;  %vm2087_vm14 = vmor %vm2085_vm13, %vm2086_vm12  ;;  %vm2095_vm3 = vweird.f32 %v2078_v6 }
 0x8a3   : > { %v2081_v10 = vmul.f32 %v3947_v2, %v2080_v39 }
 0x8a5   : > { %v2082_v11 = vmul.f32 0.5, %v2081_v10 }
 0x8a7   : > { %v2083_v13 = vsub.f32 1.5, %v2082_v11 }
 0x8a8   : > { %v3949_v14 = vpop.eup %3948 }
 0x8a9   : > { %v2084_v15 = vmul.f32 %v3947_v2, %v2083_v13  ;;  %v2090_v16 = vmul.f32 %v3949_v14, %v2078_v6  ;;  %vm2096_vm15 = vweird.f32 %v3949_v14 }
 0x8aa   : > { %vm2097_vm4 = vmor %vm2095_vm3, %vm2096_vm15 }
 0x8ab   : > { %v2088_v37 = vsel %vm2087_vm14, %v3947_v2, %v2084_v15  ;;  %v2091_v17 = vmul.f32 %v3949_v14, %v2090_v16  ;;  %vm2267_vm14 = vcmask 125952  }
 0x8ac   : > { %v2099_v23 = vmul.f32 %v2088_v37, %v2065_v53 }
 0x8ad   : > { %v2092_v20 = vmul.f32 0.5, %v2091_v17 }
 0x8ae   : > { %v2104_v27 = vmul.f32 %v3878_v21, %v2099_v23 }
 0x8af   : > { %v2093_v24 = vsub.f32 1.5, %v2092_v20 }
 0x8b0   : > { %v2109_v29 = vadd.f32 %v3879_v26, %v2104_v27 }
 0x8b1   : > { %v2094_v25 = vmul.f32 %v3949_v14, %v2093_v24 }
 0x8b2   : > { %v4689_v32 = vadd.f32 %v2109_v29, %v4571_v7 }
 0x8b3   : > { %v2098_v28 = vsel %vm2097_vm4, %v3949_v14, %v2094_v25  ;;  %vm2566_vm4 = vcmask 60416  }
 0x8b4   : > { %v2100_v18 = vmul.f32 %v2098_v28, %v2066_v58 }
 0x8b6   : > { %v2105_v30 = vmul.f32 %v3878_v21, %v2100_v18 }
 0x8b8   : > { %v2110_v31 = vadd.f32 %v3879_v26, %v2105_v30 }
 0x8ba   : > { %v4692_v33 = vadd.f32 %v2110_v31, %v4573_v8 }
 0x8bc   : > { %v2115_v34 = vpack.c.bf16 %v4692_v33, %v4689_v32 }
 0x8be   : > { %3647 = vmatmul.msk.bf16.vlgmr.msrb.gmra.mxu1 %vm1524_vm2, %v2115_v34 }
 0x93b   : > { %v2133_v40 = vpop.f32.mrf.mxu1 }
 0x93c   : > { %v2134_v7 = vadd.f32 %v3880_v42, %v2133_v40 }
 0x93e   : > { %v2140_v9 = vmul.f32 0.044715, %v2134_v7  ;;  %v2138_v56 = vmul.f32 0.5, %v2134_v7 }
 0x940   : > { %v2142_v44 = vmul.f32 %v2140_v9, %v2134_v7 }
 0x942   : > { %v2144_v8 = vmul.f32 %v2142_v44, %v2134_v7 }
 0x943   : > { %v2135_v45 = vpop.f32.mrf.mxu1 }
 0x944   : > { %v2146_v46 = vadd.f32 %v2144_v8, %v2134_v7  ;;  %v2136_v47 = vadd.f32 %v3880_v42, %v2135_v45  ;;  %v3883_v7 = vld [vmem:[%s5088_s11] ss:$0 sm:$0xff]  ;;  %s5097_s11 = sld [smem:[#allocation28_spill]] }
 0x946   : > { %v2141_v48 = vmul.f32 0.044715, %v2136_v47  ;;  %v2148_v49 = vmul.f32 0.7978846, %v2146_v46  ;;  %v2139_v57 = vmul.f32 0.5, %v2136_v47 }
 0x948   : > { %v2143_v50 = vmul.f32 %v2141_v48, %v2136_v47  ;;  %3950 = vtanh.f32 %v2148_v49  ;;  %v2243_v48 = vld [vmem:[%s5089_s15] sm:$0xf]  ;;  %v3656_v49 = vld [vmem:[%s5090_s26 + $0x8] sm:$0xf]  ;;  %s5098_s15 = sld [smem:[#allocation30_spill]] }
 0x94a   : > { %v2145_v51 = vmul.f32 %v2143_v50, %v2136_v47  ;;  %v2277_v50 = vld [vmem:[%s5091_s28] sm:$0xff] }
 0x94c   : > { %v2147_v36 = vadd.f32 %v2145_v51, %v2136_v47  ;;  %v2278_v51 = vld [vmem:[%s5091_s28 + $0x8] sm:$0xff] }
 0x94e   : > { %v2149_v52 = vmul.f32 0.7978846, %v2147_v36  ;;  %v3951_v53 = vpop.eup %3950  ;;  %v3658_v36 = vld [vmem:[%s5091_s28 + $0x20] sm:$0xff] }
 0x94f   : > { %v2152_v54 = vadd.f32 1.0, %v3951_v53  ;;  %v3659_v53 = vld [vmem:[%s5091_s28 + $0x28] sm:$0xff] }
 0x950   : > { %3952 = vtanh.f32 %v2149_v52  ;;  %v2280_v52 = vpack.c.bf16 %v2278_v51, %v2277_v50 }
 0x951   : > { %v2154_v59 = vmul.f32 %v2152_v54, %v2138_v56  ;;  %v2390_v54 = vpack.c.bf16 %v3659_v53, %v3658_v36  ;;  %v3653_v56 = vld [vmem:[%s5091_s28 + $0x18] sm:$0xff] }
 0x952   : > { %2346 = vmatpush.bf16.msra.mxu1 %v2280_v52 }
 0x956   : > { %v3953_v55 = vpop.eup %3952 }
 0x957   : > { %v2153_v58 = vadd.f32 1.0, %v3953_v55  ;;  %v3652_v55 = vld [vmem:[%s5091_s28 + $0x10] sm:$0xff] }
 0x959   : > { %v2155_v60 = vmul.f32 %v2153_v58, %v2139_v57  ;;  %v2319_v57 = vpack.c.bf16 %v3653_v56, %v3652_v55  ;;  %v3663_v58 = vld [vmem:[%s5091_s28 + $0x30] sm:$0xff]  ;;  %v3674_v56 = vld [vmem:[%s5093_s23 + $0x38] sm:$0xff] }
 0x95a   : > { %v3673_v55 = vld [vmem:[%s5093_s23 + $0x30] sm:$0xff] }
 0x95b   : > { %v2160_v61 = vpack.c.bf16 %v2155_v60, %v2154_v59  ;;  %2330 = vmatpush.bf16.msra.mxu0 %v2319_v57  ;;  %v3664_v59 = vld [vmem:[%s5091_s28 + $0x38] sm:$0xff]  ;;  %v3679_v57 = vld [vmem:[%s5094_s16 + $0x30] sm:$0xff] }
 0x95c   : > { %v2446_v60 = vpack.c.bf16 %v3664_v59, %v3663_v58 }
 0x95d   : > { %3648 = vmatmul.msk.bf16.vlgmr.msrb.gmra.mxu2 %vm2167_vm5, %v2160_v61 }
 0x95f   : > { %2457 = vmatpush.bf16.msrb.mxu0 %v2446_v60  ;;  %v2670_v60 = vpack.c.bf16 %v3674_v56, %v3673_v55 }
 0x9e0   : > { %v2180_v63 = vpop.f32.mrf.mxu2 }
 0x9e1   : > { %v2181_v0 = vadd.f32 %v3881_v62, %v2180_v63 }
 0x9e3   : > { %v2187_v1 = vsel %vm1524_vm2, %v2181_v0, 0.0 }
 0x9e4   : > { %2188 = vadd.xlane.f32.xlu2 %v2187_v1 }
 0x9e8   : > { %v2182_v3 = vpop.f32.mrf.mxu2 }
 0x9e9   : > { %v2183_v4 = vadd.f32 %v3881_v62, %v2182_v3 }
 0x9eb   : > { %v2190_v5 = vsel %vm1524_vm2, %v2183_v4, 0.0 }
 0x9ec   : > { %2191 = vadd.xlane.f32.xlu0 %v2190_v5 }
 0xa57   : > { %v2189_v2 = vpop.xlane.xlu2 %2188 }
 0xa58   : > { %v2193_v6 = vmul.f32 %v2189_v2, %v4551_v19 }
 0xa5a   : > { %v2195_v39 = vsub.f32 %v2181_v0, %v2193_v6 }
 0xa5c   : > { %v2197_v10 = vmul.f32 %v2195_v39, %v2195_v39 }
 0xa5e   : > { %v2199_v11 = vsel %vm1524_vm2, %v2197_v10, 0.0 }
 0xa5f   : > { %v2192_v13 = vpop.xlane.xlu0 %2191  ;;  %2200 = vadd.xlane.f32.xlu2 %v2199_v11 }
 0xa60   : > { %v2194_v14 = vmul.f32 %v2192_v13, %v4551_v19 }
 0xa62   : > { %v2196_v15 = vsub.f32 %v2183_v4, %v2194_v14 }
 0xa64   : > { %v2198_v16 = vmul.f32 %v2196_v15, %v2196_v15 }
 0xa66   : > { %v2202_v37 = vsel %vm1524_vm2, %v2198_v16, 0.0 }
 0xa67   : > { %2203 = vadd.xlane.f32.xlu0 %v2202_v37 }
 0xad2   : > { %v2201_v17 = vpop.xlane.xlu2 %2200 }
 0xad3   : > { %v2205_v20 = vmul.f32 %v2201_v17, %v4551_v19 }
 0xad5   : > { %v2207_v21 = vadd.f32 1e-05, %v2205_v20 }
 0xad7   : > { %3954 = vrsqrt.f32 %v2207_v21  ;;  %vm2215_vm7 = vweird.f32 %v2207_v21 }
 0xada   : > { %v2204_v23 = vpop.xlane.xlu0 %2203 }
 0xadb   : > { %v2206_v24 = vmul.f32 %v2204_v23, %v4551_v19 }
 0xadd   : > { %v3955_v25 = vpop.eup %3954  ;;  %v2208_v26 = vadd.f32 1e-05, %v2206_v24 }
 0xade   : > { %v2210_v27 = vmul.f32 %v3955_v25, %v2207_v21  ;;  %vm2216_vm6 = vweird.f32 %v3955_v25  ;;  %v4745_v21 = vld [vmem:[%s5092_s2] ss:$0 sm:$0xff]  ;;  %s5099_s2 = smov %s5098_s15 }
 0xadf   : > { %3956 = vrsqrt.f32 %v2208_v26  ;;  %vm2217_vm8 = vmor %vm2215_vm7, %vm2216_vm6  ;;  %vm2225_vm12 = vweird.f32 %v2208_v26 }
 0xae0   : > { %v2211_v28 = vmul.f32 %v3955_v25, %v2210_v27 }
 0xae2   : > { %v2212_v18 = vmul.f32 0.5, %v2211_v28 }
 0xae4   : > { %v2213_v29 = vsub.f32 1.5, %v2212_v18 }
 0xae5   : > { %v3957_v30 = vpop.eup %3956 }
 0xae6   : > { %v2214_v31 = vmul.f32 %v3955_v25, %v2213_v29  ;;  %v2220_v34 = vmul.f32 %v3957_v30, %v2208_v26  ;;  %vm2226_vm9 = vweird.f32 %v3957_v30 }
 0xae7   : > { %vm2227_vm13 = vmor %vm2225_vm12, %vm2226_vm9 }
 0xae8   : > { %v2221_v35 = vmul.f32 %v3957_v30, %v2220_v34  ;;  %v2218_v38 = vsel %vm2217_vm8, %v3955_v25, %v2214_v31  ;;  %v2495_v31 = vld [vmem:[%s5093_s23 + $0x18] sm:$0xff]  ;;  %v2521_v34 = vld [vmem:[%s5094_s16 + $0x10] sm:$0xff] }
 0xae9   : > { %v2229_v19 = vmul.f32 %v2218_v38, %v2195_v39  ;;  %v2522_v38 = vld [vmem:[%s5094_s16 + $0x18] sm:$0xff] }
 0xaea   : > { %v2222_v22 = vmul.f32 0.5, %v2221_v35 }
 0xaeb   : > { %v2234_v9 = vmul.f32 %v3882_v41, %v2229_v19  ;;  %v2524_v19 = vpack.c.bf16 %v2522_v38, %v2521_v34 }
 0xaec   : > { %v2223_v12 = vsub.f32 1.5, %v2222_v22  ;;  %v2544_v22 = vld [vmem:[%s5095_s18 + $0x10] sm:$0xff] }
 0xaed   : > { %v2239_v45 = vadd.f32 %v3883_v7, %v2234_v9 }
 0xaee   : > { %v2224_v42 = vmul.f32 %v3957_v30, %v2223_v12  ;;  %v2545_v12 = vld [vmem:[%s5095_s18 + $0x18] sm:$0xff] }
 0xaef   : > { %v2241_v47 = vadd.f32 %v2239_v45, %v4689_v32  ;;  %v3661_v32 = vld [vmem:[%s5090_s26 + $0xc] sm:$0xf]  ;;  %v2519_v45 = vld [vmem:[%s5094_s16] sm:$0xff] }
 0xaf0   : > { %v2228_v43 = vsel %vm2227_vm13, %v3957_v30, %v2224_v42  ;;  %v2494_v30 = vld [vmem:[%s5093_s23 + $0x10] sm:$0xff] }
 0xaf1   : > { %v2230_v40 = vmul.f32 %v2228_v43, %v2196_v15  ;;  %v2498_v35 = vpack.c.bf16 %v2495_v31, %v2494_v30 }
 0xaf3   : > { %v2235_v44 = vmul.f32 %v3882_v41, %v2230_v40  ;;  %v2547_v41 = vpack.c.bf16 %v2545_v12, %v2544_v22  ;;  %2512 = vmatpush.bf16.msrb.mxu1 %v2498_v35  ;;  %v3887_v35 = vld [vmem:[%s5098_s15] ss:$0 sm:$0xff]  ;;  %s5106_s15 = sld [smem:[#allocation38_spill]] }
 0xaf4   : > { %v3888_v12 = vld [vmem:[%s5100_s1] ss:$0 sm:$0xff] }
 0xaf5   : > { %v2240_v8 = vadd.f32 %v3883_v7, %v2235_v44  ;;  %v2492_v44 = vld [vmem:[%s5093_s23] sm:$0xff] }
 0xaf7   : > { %v2242_v46 = vadd.f32 %v2240_v8, %v4692_v33  ;;  %v3650_v33 = vld [vmem:[%s5090_s26 + $0x4] sm:$0xf]  ;;  %v2493_v8 = vld [vmem:[%s5093_s23 + $0x8] sm:$0xff] }
 0xaf9   : > { %2261 = vmatpush.msrb.mxu3 %v2242_v46  ;;  %2371 = vmatpush.msra.mxu2 %v2242_v46 }
 0xafb   : > { %2262 = vmatpush.msrb.mxu3 %v2241_v47  ;;  %2372 = vmatpush.msra.mxu2 %v2241_v47 }
 0xafc   : > { %3649 = vmatmul.msk.f32.vlgmr.msrb.gmra.mxu3 %vm1524_vm2, %v2243_v48  ;;  %3657 = vmatmul.msk.f32.vlgmr.msra.gmra.mxu2 %vm1524_vm2, %v3656_v49  ;;  %v2520_v48 = vld [vmem:[%s5094_s16 + $0x8] sm:$0xff]  ;;  %v2542_v49 = vld [vmem:[%s5095_s18] sm:$0xff] }
 0xafd   : > { %2300 = vmatpush.msra.mxu3 %v2242_v46  ;;  %2427 = vmatpush.msrb.mxu2 %v2242_v46  ;;  %v2523_v52 = vpack.c.bf16 %v2520_v48, %v2519_v45 }
 0xaff   : > { %2301 = vmatpush.msra.mxu3 %v2241_v47  ;;  %2428 = vmatpush.msrb.mxu2 %v2241_v47  ;;  %v2497_v47 = vpack.c.bf16 %v2493_v8, %v2492_v44 }
 0xb01   : > { %2401 = vmatpush.bf16.msrb.mxu3 %v2390_v54  ;;  %2535 = vmatpush.bf16.msra.mxu2 %v2524_v19 }
 0xb02   : > { %2513 = vmatpush.bf16.msrb.mxu1 %v2497_v47 }
 0xb04   : > { %3651 = vmatmul.msk.f32.vlgmr.msra.gmra.mxu3 %vm1524_vm2, %v3650_v33  ;;  %3662 = vmatmul.msk.f32.vlgmr.msrb.gmra.mxu2 %vm1524_vm2, %v3661_v32  ;;  %v2543_v33 = vld [vmem:[%s5095_s18 + $0x8] sm:$0xff] }
 0xb05   : > { %2558 = vmatpush.bf16.msra.mxu3 %v2547_v41  ;;  %v2546_v53 = vpack.c.bf16 %v2543_v33, %v2542_v49  ;;  %2536 = vmatpush.bf16.msra.mxu2 %v2523_v52  ;;  %v3889_v41 = vld [vmem:[%s5101_s3] ss:$0 sm:$0xff]  ;;  %v3891_v33 = vld [vmem:[%s5100_s1 + $0x1] ss:$0 sm:$0xff] }
 0xb09   : > { %2559 = vmatpush.bf16.msra.mxu3 %v2546_v53  ;;  %2682 = vmatpush.bf16.msrb.mxu2 %v2670_v60 }
 0xb7f   : > { %v2264_v61 = vpop.f32.mrf.mxu3  ;;  %v2374_v62 = vpop.f32.mrf.mxu2 }
 0xb80   : > { %v2279_v63 = vpack.c.bf16 %v2264_v61, %v2264_v61  ;;  %v2389_v0 = vpack.c.bf16 %v2374_v62, %v2374_v62  ;;  %v2377_v1 = vsel %vm2267_vm14, %v2374_v62, 0.0  ;;  %v2272_v3 = vmul.f32 %v2264_v61, %v2264_v61 }
 0xb81   : > { %2378 = vadd.xlane.f32.xlu2 %v2377_v1  ;;  %v2268_v4 = vsel %vm2267_vm14, %v2264_v61, 0.0  ;;  %v2381_v2 = vmul.f32 %v2374_v62, %v2374_v62  ;;  %v3680_v61 = vld [vmem:[%s5094_s16 + $0x38] sm:$0xff]  ;;  %v3671_v62 = vld [vmem:[%s5093_s23 + $0x20] sm:$0xff] }
 0xb82   : > { %3655 = vmatmul.msk.bf16.vlgmr.msra.gmra.mxu1 %vm1524_vm2, %v2279_v63  ;;  %3660 = vmatmul.msk.bf16.vlgmr.msrb.gmra.mxu3 %vm1524_vm2, %v2389_v0  ;;  %v2273_v5 = vsel %vm2267_vm14, %v2272_v3, 0.0  ;;  %v3672_v63 = vld [vmem:[%s5093_s23 + $0x28] sm:$0xff]  ;;  %v2695_v0 = vpack.c.bf16 %v3680_v61, %v3679_v57  ;;  %v3677_v1 = vld [vmem:[%s5094_s16 + $0x20] sm:$0xff] }
 0xb83   : > { %2274 = vadd.xlane.f32.xlu1 %v2273_v5  ;;  %2269 = vadd.xlane.f32.xlu0 %v2268_v4  ;;  %v2382_v14 = vsel %vm2267_vm14, %v2381_v2, 0.0  ;;  %v3678_v3 = vld [vmem:[%s5094_s16 + $0x28] sm:$0xff]  ;;  %v2669_v2 = vpack.c.bf16 %v3672_v63, %v3671_v62 }
 0xb84   : > { %2707 = vmatpush.bf16.msrb.mxu3 %v2695_v0 }
 0xb85   : > { %2683 = vmatpush.bf16.msrb.mxu2 %v2669_v2 }
 0xb87   : > { %v2303_v6 = vpop.f32.mrf.mxu3  ;;  %v2430_v39 = vpop.f32.mrf.mxu2 }
 0xb88   : > { %v2318_v10 = vpack.c.bf16 %v2303_v6, %v2303_v6  ;;  %v2306_v11 = vsel %vm2267_vm14, %v2303_v6, 0.0  ;;  %v2310_v13 = vmul.f32 %v2303_v6, %v2303_v6  ;;  %v2437_v16 = vmul.f32 %v2430_v39, %v2430_v39 }
 0xb89   : > { %2307 = vadd.xlane.f32.xlu2 %v2306_v11  ;;  %v2433_v17 = vsel %vm2267_vm14, %v2430_v39, 0.0  ;;  %v2445_v20 = vpack.c.bf16 %v2430_v39, %v2430_v39  ;;  %v2694_v6 = vpack.c.bf16 %v3678_v3, %v3677_v1 }
 0xb8a   : > { %3654 = vmatmul.msk.bf16.vlgmr.msra.gmra.mxu0 %vm1524_vm2, %v2318_v10  ;;  %v2311_v15 = vsel %vm2267_vm14, %v2310_v13, 0.0  ;;  %v2438_v37 = vsel %vm2267_vm14, %v2437_v16, 0.0 }
 0xb8b   : > { %2383 = vadd.xlane.f32.xlu1 %v2382_v14  ;;  %2312 = vadd.xlane.f32.xlu0 %v2311_v15 }
 0xb8c   : > { %2708 = vmatpush.bf16.msrb.mxu3 %v2694_v6 }
 0xb91   : > { %2439 = vadd.xlane.f32.xlu2 %v2438_v37  ;;  %v3885_v37 = vld [vmem:[%s5096_s7] ss:$0 sm:$0xff]  ;;  %s5102_s7 = sld [smem:[#allocation36_spill]] }
 0xb93   : > { %2434 = vadd.xlane.f32.xlu0 %v2433_v17 }
 0xb97   : > { %s5103_s5 = smov %s5102_s7 }
 0xb9a   : > { %3665 = vmatmul.msk.bf16.vlgmr.msrb.gmra.mxu0 %vm1524_vm2, %v2445_v20 }
 0xba9   : > { %2622 = vperm.xlu2 %3862, %v4745_v21  }
 0xbf4   : > { %v2379_v23 = vpop.xlane.xlu2 %2378 }
 0xbf6   : > { %v2270_v24 = vpop.xlane.xlu0 %2269  ;;  %v2275_v25 = vpop.xlane.xlu1 %2274 }
 0xbfc   : > { %v2308_v26 = vpop.xlane.xlu2 %2307 }
 0xbfd   : > { %v2309_v18 = vadd.f32 %v2308_v26, %v2270_v24 }
 0xbfe   : > { %v2313_v27 = vpop.xlane.xlu0 %2312  ;;  %v2384_v42 = vpop.xlane.xlu1 %2383 }
 0xbff   : > { %v2348_v28 = vpop.f32.mrf.mxu1  ;;  %v2314_v29 = vadd.f32 %v2313_v27, %v2275_v25  ;;  %v2380_v9 = vadd.f32 %v2379_v23, %v2309_v18 }
 0xc01   : > { %v2385_v40 = vadd.f32 %v2384_v42, %v2314_v29  ;;  %v3886_v29 = vld [vmem:[%s5097_s11] ss:$0 sm:$0xff]  ;;  %s5104_s11 = sld [smem:[#allocation37_spill]] }
 0xc04   : > { %v2440_v43 = vpop.xlane.xlu2 %2439 }
 0xc05   : > { %v2403_v7 = vpop.f32.mrf.mxu3  ;;  %v2441_v32 = vadd.f32 %v2440_v43, %v2385_v40 }
 0xc06   : > { %v2435_v46 = vpop.xlane.xlu0 %2434 }
 0xc07   : > { %v2436_v50 = vadd.f32 %v2435_v46, %v2380_v9  ;;  %v2332_v51 = vpop.f32.mrf.mxu0  ;;  %v2350_v36 = vpop.f32.mrf.mxu1  ;;  %v2465_v58 = vmul.f32 0.015625, %v2441_v32  ;;  %s5105_s6 = smov %s5104_s11 }
 0xc08   : > { %v2349_v13 = vadd.f32 %v2348_v28, %v2332_v51  ;;  %v3890_v51 = vld [vmem:[%s5099_s2 + $0x1] ss:$0 sm:$0xff] }
 0xc09   : > { %v2464_v54 = vmul.f32 0.015625, %v2436_v50 }
 0xc0a   : > { %v2407_v17 = vadd.f32 %v2403_v7, %v2349_v13 }
 0xc0b   : > { %v2466_v59 = vmul.f32 %v2464_v54, %v2464_v54  ;;  %v2483_v25 = vmul.f32 %v3885_v37, %v2464_v54  ;;  %v3685_v37 = vld [vmem:[%s5095_s18 + $0x30] sm:$0xff] }
 0xc0d   : > { %v2467_v4 = vsub.f32 %v2465_v58, %v2466_v59  ;;  %v2405_v5 = vpop.f32.mrf.mxu3 }
 0xc0f   : > { %v2468_v39 = vadd.f32 1e-05, %v2467_v4  ;;  %v2334_v10 = vpop.f32.mrf.mxu0 }
 0xc11   : > { %3958 = vrsqrt.f32 %v2468_v39  ;;  %vm2475_vm15 = vweird.f32 %v2468_v39 }
 0xc17   : > { %v3959_v11 = vpop.eup %3958  ;;  %v2459_v14 = vpop.f32.mrf.mxu0 }
 0xc18   : > { %v2470_v15 = vmul.f32 %v3959_v11, %v2468_v39  ;;  %v2463_v23 = vadd.f32 %v2459_v14, %v2407_v17  ;;  %vm2476_vm2 = vweird.f32 %v3959_v11  ;;  %v3686_v17 = vld [vmem:[%s5095_s18 + $0x38] sm:$0xff] }
 0xc19   : > { %vm2477_vm3 = vmor %vm2475_vm15, %vm2476_vm2 }
 0xc1a   : > { %v2471_v16 = vmul.f32 %v3959_v11, %v2470_v15  ;;  %v2484_v18 = vsub.f32 %v2463_v23, %v2483_v25 }
 0xc1c   : > { %v2472_v20 = vmul.f32 0.5, %v2471_v16 }
 0xc1e   : > { %v2473_v24 = vsub.f32 1.5, %v2472_v20 }
 0xc1f   : > { %v2461_v26 = vpop.f32.mrf.mxu0 }
 0xc20   : > { %v2474_v27 = vmul.f32 %v3959_v11, %v2473_v24  ;;  %v2720_v24 = vpack.c.bf16 %v3686_v17, %v3685_v37  ;;  %v3683_v26 = vld [vmem:[%s5095_s18 + $0x20] sm:$0xff] }
 0xc21   : > { %v2661_v17 = vld [vmem:[%s5104_s11] sm:$0xff]  ;;  %s5109_s11 = sld [smem:[#allocation39_spill]] }
 0xc22   : > { %v2478_v28 = vsel %vm2477_vm3, %v3959_v11, %v2474_v27  ;;  %v3684_v27 = vld [vmem:[%s5095_s18 + $0x28] sm:$0xff]  ;;  %vm2628_vm3 = vcmask 27648  }
 0xc23   : > { %v2485_v30 = vmul.f32 %v2484_v18, %v2478_v28 }
 0xc25   : > { %v4770_v31 = vadd.f32 %v3886_v29, %v2485_v30 }
 0xc27   : > { %v4774_v34 = vpack.c.bf16 %v4770_v31, %v4770_v31 }
 0xc29   : > { %3666 = vmatmul.msk.bf16.vlgmr.msrb.gmra.mxu1 %vm2167_vm5, %v4774_v34  ;;  %3667 = vmatmul.msk.bf16.vlgmr.msra.gmra.mxu2 %vm2167_vm5, %v4774_v34 }
 0xc2a   : > { %3668 = vmatmul.msk.bf16.vlgmr.msra.gmra.mxu3 %vm2167_vm5, %v4774_v34 }
 0xc39   : > { %3676 = vmatmul.msk.bf16.vlgmr.msrb.gmra.mxu2 %vm2167_vm5, %v4774_v34 }
 0xc3a   : > { %3682 = vmatmul.msk.bf16.vlgmr.msrb.gmra.mxu3 %vm2167_vm5, %v4774_v34 }
 0xca6   : > { %v2515_v38 = vpop.f32.mrf.mxu1 }
 0xca7   : > { %v4787_v22 = vadd.f32 %v3887_v35, %v2515_v38  ;;  %v2719_v35 = vpack.c.bf16 %v3684_v27, %v3683_v26 }
 0xca9   : > { %v2565_v19 = vmul.f32 %v4787_v22, %v4787_v22 }
 0xcab   : > { %v2567_v42 = vsel %vm2566_vm4, %v2565_v19, 0.0 }
 0xcac   : > { %v2538_v43 = vpop.f32.mrf.mxu2  ;;  %2568 = vadd.xlane.f32.xlu0 %v2567_v42 }
 0xcad   : > { %v2539_v40 = vadd.f32 %v3888_v12, %v2538_v43  ;;  %v2561_v7 = vpop.f32.mrf.mxu3 }
 0xcae   : > { %v2562_v9 = vadd.f32 %v3889_v41, %v2561_v7  ;;  %v2517_v44 = vpop.f32.mrf.mxu1 }
 0xcaf   : > { %v2582_v8 = vmul.f32 %v2539_v40, %v2539_v40 }
 0xcb0   : > { %v2641_v45 = vpack.c.bf16 %v2562_v9, %v2562_v9  ;;  %v2623_v9 = vpop.permute.xlu2 %2622 }
 0xcb1   : > { %v2583_v46 = vsel %vm2566_vm4, %v2582_v8, 0.0  ;;  %v2626_v8 = vld [vmem:[%s5102_s7] sm:$0xf]  ;;  %s5107_s7 = sld [smem:[#allocation41_spill]] }
 0xcb2   : > { %v2646_v47 = vsel %vm1504_vm0, %v2641_v45, 0  ;;  %2584 = vadd.xlane.f32.xlu1 %v2583_v46 }
 0xcb3   : > { %2655 = vmatpush.bf16.msra.mxu1 %v2646_v47 }
 0xcb4   : > { %v2540_v48 = vpop.f32.mrf.mxu2 }
 0xcb5   : > { %v2563_v49 = vpop.f32.mrf.mxu3 }
 0xcb6   : > { %v3892_v49 = vld [vmem:[%s5101_s3 + $0x1] ss:$0 sm:$0xff] }
 0xcbc   : > { %v2685_v32 = vpop.f32.mrf.mxu2 }
 0xcbd   : > { %v2710_v50 = vpop.f32.mrf.mxu3  ;;  %v4802_v53 = vadd.f32 %v3890_v51, %v2685_v32 }
 0xcbe   : > { %v4798_v36 = vadd.f32 %v3891_v33, %v2710_v50 }
 0xcbf   : > { %v2739_v57 = vmul.f32 %v4802_v53, %v4802_v53 }
 0xcc0   : > { %v2755_v52 = vmul.f32 %v4798_v36, %v4798_v36 }
 0xcc1   : > { %v2740_v58 = vsel %vm2566_vm4, %v2739_v57, 0.0 }
 0xcc2   : > { %v2756_v54 = vsel %vm2566_vm4, %v2755_v52, 0.0 }
 0xcc3   : > { %2757 = vadd.xlane.f32.xlu0 %v2756_v54 }
 0xcc4   : > { %v2687_v55 = vpop.f32.mrf.mxu2 }
 0xcc5   : > { %v2712_v56 = vpop.f32.mrf.mxu3 }
 0xccb   : > { %2741 = vadd.xlane.f32.xlu0 %v2740_v58 }
 0xd1f   : > { %v2569_v59 = vpop.xlane.xlu0 %2568 }
 0xd20   : > { %v2570_v60 = vmax.f32 %v2569_v59, 1e-24 }
 0xd22   : > { %3960 = vrsqrt.f32 %v2570_v60  ;;  %vm2577_vm12 = vweird.f32 %v2570_v60 }
 0xd25   : > { %v2585_v61 = vpop.xlane.xlu1 %2584 }
 0xd26   : > { %v2586_v62 = vmax.f32 %v2585_v61, 1e-24 }
 0xd28   : > { %v3961_v63 = vpop.eup %3960  ;;  %3962 = vrsqrt.f32 %v2586_v62  ;;  %vm2593_vm7 = vweird.f32 %v2586_v62 }
 0xd29   : > { %v2572_v0 = vmul.f32 %v3961_v63, %v2570_v60  ;;  %vm2578_vm9 = vweird.f32 %v3961_v63 }
 0xd2a   : > { %vm2579_vm13 = vmor %vm2577_vm12, %vm2578_vm9 }
 0xd2b   : > { %v2573_v1 = vmul.f32 %v3961_v63, %v2572_v0  ;;  %v3697_v0 = vld [vmem:[%s5093_s23 + $0x50] sm:$0xff] }
 0xd2d   : > { %v2574_v5 = vmul.f32 0.5, %v2573_v1  ;;  %v3698_v1 = vld [vmem:[%s5093_s23 + $0x58] sm:$0xff] }
 0xd2e   : > { %v3963_v3 = vpop.eup %3962 }
 0xd2f   : > { %v2588_v4 = vmul.f32 %v3963_v3, %v2586_v62  ;;  %v2575_v39 = vsub.f32 1.5, %v2574_v5  ;;  %vm2594_vm6 = vweird.f32 %v3963_v3 }
 0xd30   : > { %vm2595_vm8 = vmor %vm2593_vm7, %vm2594_vm6 }
 0xd31   : > { %v2589_v2 = vmul.f32 %v3963_v3, %v2588_v4  ;;  %v2576_v15 = vmul.f32 %v3961_v63, %v2575_v39  ;;  %v3695_v39 = vld [vmem:[%s5093_s23 + $0x40] sm:$0xff] }
 0xd33   : > { %v2590_v6 = vmul.f32 0.5, %v2589_v2  ;;  %v2580_v25 = vsel %vm2579_vm13, %v3961_v63, %v2576_v15  ;;  %v2880_v2 = vpack.c.bf16 %v3698_v1, %v3697_v0  ;;  %v3718_v0 = vld [vmem:[%s5093_s23 + $0x60] sm:$0xff]  ;;  %v3719_v1 = vld [vmem:[%s5093_s23 + $0x68] sm:$0xff] }
 0xd34   : > { %v2581_v28 = vmul.f32 %v2580_v25, %v4787_v22 }
 0xd35   : > { %v2591_v10 = vsub.f32 1.5, %v2590_v6 }
 0xd36   : > { %v2758_v11 = vpop.xlane.xlu0 %2757  ;;  %v2598_v12 = vpack.c.bf16 %v2581_v28, %v2581_v28 }
 0xd37   : > { %v2592_v13 = vmul.f32 %v3963_v3, %v2591_v10  ;;  %v2759_v14 = vmax.f32 %v2758_v11, 1e-24  ;;  %v3696_v10 = vld [vmem:[%s5093_s23 + $0x48] sm:$0xff] }
 0xd39   : > { %3964 = vrsqrt.f32 %v2759_v14  ;;  %v2596_v16 = vsel %vm2595_vm8, %v3963_v3, %v2592_v13  ;;  %vm2766_vm2 = vweird.f32 %v2759_v14  ;;  %v2879_v13 = vpack.c.bf16 %v3696_v10, %v3695_v39 }
 0xd3a   : > { %v2597_v20 = vmul.f32 %v2596_v16, %v2539_v40 }
 0xd3c   : > { %v2599_v23 = vpack.c.bf16 %v2597_v20, %v2597_v20  ;;  %v2663_v20 = vpack.c.bf16 %v2661_v17, %v2661_v17 }
 0xd3e   : > { %v2604_v18 = vsel %vm1656_vm10, %v2599_v23, 0  ;;  %v2742_v58 = vpop.xlane.xlu0 %2741  ;;  %v2859_v23 = vsel %vm2011_vm11, %v2663_v20, 0 }
 0xd3f   : > { %v3965_v29 = vpop.eup %3964  ;;  %2613 = vmatpush.bf16.xpose.msra.mxu0 %v2604_v18  ;;  %v2743_v59 = vmax.f32 %v2742_v58, 1e-24 }
 0xd40   : > { %v2761_v30 = vmul.f32 %v3965_v29, %v2759_v14  ;;  %vm2767_vm14 = vweird.f32 %v3965_v29 }
 0xd41   : > { %vm2768_vm15 = vmor %vm2766_vm2, %vm2767_vm14  ;;  %vm2750_vm7 = vweird.f32 %v2743_v59 }
 0xd42   : > { %v2762_v38 = vmul.f32 %v3965_v29, %v2761_v30 }
 0xd44   : > { %v2763_v19 = vmul.f32 0.5, %v2762_v38 }
 0xd46   : > { %v2764_v41 = vsub.f32 1.5, %v2763_v19  ;;  %3669 = vmatmul.msk.bf16.vlgmr.msra.gmra.mxu0 %vm1656_vm10, %v2598_v12 }
 0xd47   : > { %2732 = vmatpush.bf16.msrb.mxu0 %v2720_v24 }
 0xd48   : > { %v2765_v42 = vmul.f32 %v3965_v29, %v2764_v41 }
 0xd4a   : > { %v2769_v43 = vsel %vm2768_vm15, %v3965_v29, %v2765_v42  ;;  %v3690_v29 = vld [vmem:[%s5103_s5 + $0x4] sm:$0xf] }
 0xd4b   : > { %2733 = vmatpush.bf16.msrb.mxu0 %v2719_v35  ;;  %v2770_v40 = vmul.f32 %v2769_v43, %v4798_v36 }
 0xd4d   : > { %v2772_v22 = vpack.c.bf16 %v2770_v40, %v2770_v40 }
 0xd4f   : > { %v2777_v7 = vsel %vm1656_vm10, %v2772_v22, 0  ;;  %2868 = vmatpush.bf16.msra.mxu0 %v2859_v23 }
 0xd50   : > { %2786 = vmatpush.bf16.xpose.msrb.mxu1 %v2777_v7 }
 0xd56   : > { %3688 = vmatmul.msk.bf16.vlgmr.msrb.gmra.mxu0 %vm2167_vm5, %v4774_v34 }
 0xdc3   : > { %v2615_v44 = vpop.f32.mrf.mxu0 }
 0xdc4   : > { %v2625_v45 = vmul.f32 %v2623_v9, %v2615_v44  ;;  %v3703_v9 = vld [vmem:[%s5094_s16 + $0x50] sm:$0xff]  ;;  %v3704_v44 = vld [vmem:[%s5094_s16 + $0x58] sm:$0xff] }
 0xdc6   : > { %v2627_v46 = vadd.f32 %v2626_v8, %v2625_v45  ;;  %v3701_v8 = vld [vmem:[%s5094_s16 + $0x40] sm:$0xff]  ;;  %v2905_v45 = vpack.c.bf16 %v3704_v44, %v3703_v9  ;;  %v3726_v9 = vld [vmem:[%s5094_s16 + $0x70] sm:$0xff]  ;;  %v3727_v44 = vld [vmem:[%s5094_s16 + $0x78] sm:$0xff] }
 0xdc8   : > { %v2629_v47 = vsel %vm2628_vm3, %v2627_v46, -inf }
 0xdc9   : > { %2630 = vmax.xlane.f32.xlu1 %v2629_v47 }
 0xdcb   : > { %v2617_v48 = vpop.f32.mrf.mxu0 }
 0xdd3   : > { %v2735_v33 = vpop.f32.mrf.mxu0 }
 0xdd4   : > { %v2736_v32 = vadd.f32 %v3892_v49, %v2735_v33 }
 0xdd6   : > { %v2812_v50 = vpack.c.bf16 %v2736_v32, %v2736_v32 }
 0xdd8   : > { %v2817_v51 = vsel %vm1504_vm0, %v2812_v50, 0  ;;  %v3692_v50 = vld [vmem:[%s5105_s6 + $0x8] sm:$0xff] }
 0xdd9   : > { %2826 = vmatpush.bf16.msra.mxu2 %v2817_v51  ;;  %v2835_v51 = vpack.c.bf16 %v3692_v50, %v3692_v50 }
 0xddb   : > { %v2737_v36 = vpop.f32.mrf.mxu0 }
 0xddc   : > { %v2840_v36 = vsel %vm2011_vm11, %v2835_v51, 0 }
 0xddd   : > { %2917 = vmatpush.bf16.msrb.mxu2 %v2905_v45  ;;  %2849 = vmatpush.bf16.msra.mxu3 %v2840_v36 }
 0xe3c   : > { %v2631_v52 = vpop.xlane.xlu1 %2630 }
 0xe3d   : > { %v2632_v54 = vsub.f32 %v2627_v46, %v2631_v52  ;;  %v3702_v46 = vld [vmem:[%s5094_s16 + $0x48] sm:$0xff]  ;;  %v3709_v52 = vld [vmem:[%s5095_s18 + $0x50] sm:$0xff] }
 0xe3e   : > { %v2904_v47 = vpack.c.bf16 %v3702_v46, %v3701_v8 }
 0xe3f   : > { %v2633_v55 = vmul.f32 1.442695, %v2632_v54  ;;  %v3710_v54 = vld [vmem:[%s5095_s18 + $0x58] sm:$0xff] }
 0xe40   : > { %2918 = vmatpush.bf16.msrb.mxu2 %v2904_v47 }
 0xe41   : > { %3966 = vpow2.f32 %v2633_v55  ;;  %v2930_v55 = vpack.c.bf16 %v3710_v54, %v3709_v52 }
 0xe42   : > { %3968 = vrsqrt.f32 %v2743_v59 }
 0xe43   : > { %2942 = vmatpush.bf16.msrb.mxu3 %v2930_v55 }
 0xe47   : > { %v3967_v56 = vpop.eup %3966 }
 0xe48   : > { %v2635_v57 = vsel %vm2628_vm3, %v3967_v56, 0.0  ;;  %v3969_v60 = vpop.eup %3968 }
 0xe49   : > { %2636 = vadd.xlane.f32.xlu1 %v2635_v57  ;;  %v2745_v61 = vmul.f32 %v3969_v60, %v2743_v59  ;;  %vm2751_vm6 = vweird.f32 %v3969_v60  ;;  %v3708_v57 = vld [vmem:[%s5095_s18 + $0x48] sm:$0xff]  ;;  %v3720_v59 = vld [vmem:[%s5093_s23 + $0x70] sm:$0xff] }
 0xe4a   : > { %vm2752_vm8 = vmor %vm2750_vm7, %vm2751_vm6 }
 0xe4b   : > { %v2746_v63 = vmul.f32 %v3969_v60, %v2745_v61 }
 0xe4d   : > { %v2747_v4 = vmul.f32 0.5, %v2746_v63 }
 0xe4f   : > { %v2748_v11 = vsub.f32 1.5, %v2747_v4 }
 0xe51   : > { %v2749_v14 = vmul.f32 %v3969_v60, %v2748_v11 }
 0xe53   : > { %v2753_v15 = vsel %vm2752_vm8, %v3969_v60, %v2749_v14  ;;  %v3721_v60 = vld [vmem:[%s5093_s23 + $0x78] sm:$0xff] }
 0xe54   : > { %v2754_v16 = vmul.f32 %v2753_v15, %v4802_v53 }
 0xe56   : > { %v2771_v37 = vpack.c.bf16 %v2754_v16, %v2754_v16 }
 0xe62   : > { %2793 = vperm.xlu1 %3863, %v4745_v21  }
 0xebc   : > { %v2637_v62 = vpop.xlane.xlu1 %2636 }
 0xebd   : > { %3970 = vrcp.f32 %v2637_v62  ;;  %v3072_v62 = vpack.c.bf16 %v3721_v60, %v3720_v59  ;;  %v3714_v60 = vld [vmem:[%s5103_s5 + $0x8] sm:$0xf] }
 0xec3   : > { %v3971_v3 = vpop.eup %3970 }
 0xec4   : > { %v2639_v5 = vmul.f32 %v3971_v3, %v3967_v56  ;;  %v3707_v56 = vld [vmem:[%s5095_s18 + $0x40] sm:$0xff]  ;;  %v3071_v3 = vpack.c.bf16 %v3719_v1, %v3718_v0 }
 0xec5   : > { %v2929_v58 = vpack.c.bf16 %v3708_v57, %v3707_v56  ;;  %v3897_v1 = vld [vmem:[%s5100_s1 + $0x3] ss:$0 sm:$0xff] }
 0xec6   : > { %v2640_v6 = vpack.c.bf16 %v2639_v5, %v2639_v5  ;;  %v3894_v5 = vld [vmem:[%s5100_s1 + $0x2] ss:$0 sm:$0xff]  ;;  %s5108_s1 = smov %s5107_s7 }
 0xec7   : > { %2943 = vmatpush.bf16.msrb.mxu3 %v2929_v58 }
 0xec8   : > { %3670 = vmatmul.msk.bf16.vlgmr.msra.gmra.mxu1 %vm1500_vm1, %v2640_v6  ;;  %v3893_v6 = vld [vmem:[%s5099_s2 + $0x2] ss:$0 sm:$0xff] }
 0xec9   : > { %2892 = vmatpush.bf16.msra.mxu1 %v2880_v2 }
 0xecd   : > { %2893 = vmatpush.bf16.msra.mxu1 %v2879_v13 }
 0xed4   : > { %v2794_v27 = vpop.permute.xlu1 %2793 }
 0xed8   : > { %3689 = vmatmul.msk.bf16.vlgmr.msrb.gmra.mxu1 %vm1656_vm10, %v2771_v37 }
 0xee8   : > { %3700 = vmatmul.msk.bf16.vlgmr.msra.gmra.mxu1 %vm2167_vm5, %v4774_v34 }
 0xf45   : > { %v2657_v24 = vpop.f32.mrf.mxu1 }
 0xf46   : > { %v2662_v25 = vpack.c.bf16 %v2657_v24, %v2657_v24  ;;  %v4188_v24 = vmov 2  }
 0xf47   : > { %3864 = vset.pattern.permute.xlu1 %v4188_v24 }
 0xf48   : > { %3694 = vmatmul.msk.bf16.vlgmr.msra.gmra.mxu0 %vm1656_vm10, %v2662_v25  ;;  %3003 = vperm.xlu1 %3864, %v4745_v21  }
 0xf4d   : > { %v2659_v26 = vpop.f32.mrf.mxu1 }
 0xf55   : > { %v2788_v18 = vpop.f32.mrf.mxu1 }
 0xf56   : > { %v2796_v53 = vmul.f32 %v2794_v27, %v2788_v18 }
 0xf58   : > { %v2799_v28 = vadd.f32 %v3690_v29, %v2796_v53  ;;  %v3895_v29 = vld [vmem:[%s5101_s3 + $0x2] ss:$0 sm:$0xff] }
 0xf5a   : > { %v2800_v30 = vsel %vm2628_vm3, %v2799_v28, -inf }
 0xf5b   : > { %2801 = vmax.xlane.f32.xlu0 %v2800_v30 }
 0xf5d   : > { %v2790_v35 = vpop.f32.mrf.mxu1 }
 0xf65   : > { %v2895_v38 = vpop.f32.mrf.mxu1 }
 0xf66   : > { %v2896_v11 = vadd.f32 %v3893_v6, %v2895_v38 }
 0xf68   : > { %v2949_v15 = vmul.f32 %v2896_v11, %v2896_v11 }
 0xf6a   : > { %v2950_v16 = vsel %vm2566_vm4, %v2949_v15, 0.0 }
 0xf6d   : > { %v2897_v12 = vpop.f32.mrf.mxu1 }
 0xfba   : > { %v3004_v58 = vpop.permute.xlu1 %3003 }
 0xfc5   : > { %v4839_v19 = vpop.f32.mrf.mxu0 }
 0xfcd   : > { %v2872_v41 = vpop.f32.mrf.mxu0 }
 0xfce   : > { %v2802_v42 = vpop.xlane.xlu0 %2801 }
 0xfcf   : > { %v2803_v43 = vsub.f32 %v2799_v28, %v2802_v42 }
 0xfd1   : > { %v2804_v40 = vmul.f32 1.442695, %v2803_v43 }
 0xfd3   : > { %3972 = vpow2.f32 %v2804_v40 }
 0xfd9   : > { %v3973_v22 = vpop.eup %3972 }
 0xfda   : > { %v2806_v7 = vsel %vm2628_vm3, %v3973_v22, 0.0 }
 0xfdb   : > { %2807 = vadd.xlane.f32.xlu2 %v2806_v7 }
0x104e   : > { %v2808_v48 = vpop.xlane.xlu2 %2807 }
0x104f   : > { %3974 = vrcp.f32 %v2808_v48  ;;  %v3097_v48 = vpack.c.bf16 %v3727_v44, %v3726_v9  ;;  %v3731_v9 = vld [vmem:[%s5095_s18 + $0x68] sm:$0xff] }
0x1055   : > { %v3975_v49 = vpop.eup %3974 }
0x1056   : > { %v2810_v33 = vmul.f32 %v3975_v49, %v3973_v22 }
0x1058   : > { %v2811_v32 = vpack.c.bf16 %v2810_v33, %v2810_v33  ;;  %v3724_v33 = vld [vmem:[%s5094_s16 + $0x60] sm:$0xff] }
0x105a   : > { %3691 = vmatmul.msk.bf16.vlgmr.msra.gmra.mxu2 %vm1500_vm1, %v2811_v32  ;;  %v3725_v32 = vld [vmem:[%s5094_s16 + $0x68] sm:$0xff] }
0x105b   : > { %v3096_v36 = vpack.c.bf16 %v3725_v32, %v3724_v33 }
0x106a   : > { %3706 = vmatmul.msk.bf16.vlgmr.msrb.gmra.mxu2 %vm2167_vm5, %v4774_v34 }
0x10dd   : > { %v2828_v61 = vpop.f32.mrf.mxu2 }
0x10de   : > { %v2834_v63 = vpack.c.bf16 %v2828_v61, %v2828_v61 }
0x10e0   : > { %3693 = vmatmul.msk.bf16.vlgmr.msra.gmra.mxu3 %vm1656_vm10, %v2834_v63 }
0x10e1   : > { %3084 = vmatpush.bf16.msra.mxu3 %v3072_v62 }
0x10e5   : > { %v2830_v4 = vpop.f32.mrf.mxu2  ;;  %3085 = vmatpush.bf16.msra.mxu3 %v3071_v3 }
0x10e6   : > { %v3896_v4 = vld [vmem:[%s5099_s2 + $0x3] ss:$0 sm:$0xff]  ;;  %s5111_s2 = sld [smem:[#allocation43_spill]] }
0x10ed   : > { %v2920_v2 = vpop.f32.mrf.mxu2 }
0x10ee   : > { %v2921_v39 = vadd.f32 %v3894_v5, %v2920_v2 }
0x10f0   : > { %3712 = vmatmul.msk.bf16.vlgmr.msrb.gmra.mxu3 %vm2167_vm5, %v4774_v34  ;;  %v2965_v10 = vmul.f32 %v2921_v39, %v2921_v39 }
0x10f2   : > { %v2966_v13 = vsel %vm2566_vm4, %v2965_v10, 0.0 }
0x10f3   : > { %2967 = vadd.xlane.f32.xlu0 %v2966_v13 }
0x10f5   : > { %v2922_v14 = vpop.f32.mrf.mxu2 }
0x10fb   : > { %2951 = vadd.xlane.f32.xlu0 %v2950_v16 }
0x1100   : > { %3723 = vmatmul.msk.bf16.vlgmr.msra.gmra.mxu3 %vm2167_vm5, %v4774_v34 }
0x1163   : > { %v4868_v37 = vpop.f32.mrf.mxu3 }
0x1166   : > { %v2968_v17 = vpop.xlane.xlu0 %2967 }
0x1167   : > { %v2969_v20 = vmax.f32 %v2968_v17, 1e-24  ;;  %v3716_v17 = vld [vmem:[%s5105_s6 + $0x10] sm:$0xff] }
0x1169   : > { %3976 = vrsqrt.f32 %v2969_v20  ;;  %vm2976_vm12 = vweird.f32 %v2969_v20 }
0x116b   : > { %v2853_v23 = vpop.f32.mrf.mxu3 }
0x116e   : > { %v2952_v25 = vpop.xlane.xlu0 %2951 }
0x116f   : > { %v3977_v26 = vpop.eup %3976  ;;  %v2953_v27 = vmax.f32 %v2952_v25, 1e-24 }
0x1170   : > { %v2971_v18 = vmul.f32 %v3977_v26, %v2969_v20  ;;  %vm2977_vm9 = vweird.f32 %v3977_v26  ;;  %v3045_v20 = vpack.c.bf16 %v3716_v17, %v3716_v17 }
0x1171   : > { %3978 = vrsqrt.f32 %v2953_v27  ;;  %vm2978_vm13 = vmor %vm2976_vm12, %vm2977_vm9  ;;  %vm2960_vm2 = vweird.f32 %v2953_v27 }
0x1172   : > { %v2972_v53 = vmul.f32 %v3977_v26, %v2971_v18  ;;  %v3050_v23 = vsel %vm2011_vm11, %v3045_v20, 0 }
0x1173   : > { %v2945_v28 = vpop.f32.mrf.mxu3  ;;  %3059 = vmatpush.bf16.msra.mxu2 %v3050_v23 }
0x1174   : > { %v2973_v30 = vmul.f32 0.5, %v2972_v53  ;;  %v2946_v35 = vadd.f32 %v3895_v29, %v2945_v28 }
0x1176   : > { %v2974_v38 = vsub.f32 1.5, %v2973_v30  ;;  %v3022_v12 = vpack.c.bf16 %v2946_v35, %v2946_v35 }
0x1177   : > { %v3979_v41 = vpop.eup %3978 }
0x1178   : > { %v2975_v42 = vmul.f32 %v3977_v26, %v2974_v38  ;;  %v2955_v43 = vmul.f32 %v3979_v41, %v2953_v27  ;;  %v3027_v40 = vsel %vm1504_vm0, %v3022_v12, 0  ;;  %vm2961_vm14 = vweird.f32 %v3979_v41 }
0x1179   : > { %3036 = vmatpush.bf16.msrb.mxu1 %v3027_v40  ;;  %vm2962_vm15 = vmor %vm2960_vm2, %vm2961_vm14  ;;  %v3733_v40 = vld [vmem:[%s5095_s18 + $0x78] sm:$0xff] }
0x117a   : > { %v2956_v22 = vmul.f32 %v3979_v41, %v2955_v43  ;;  %v2979_v7 = vsel %vm2978_vm13, %v3977_v26, %v2975_v42  ;;  %v3732_v43 = vld [vmem:[%s5095_s18 + $0x70] sm:$0xff]  ;;  %vm3357_vm13 = vcmask 523264  }
0x117b   : > { %v2947_v8 = vpop.f32.mrf.mxu3  ;;  %v2980_v45 = vmul.f32 %v2979_v7, %v2921_v39  ;;  %v3122_v7 = vpack.c.bf16 %v3733_v40, %v3732_v43  ;;  %v4190_v43 = vmov 32.0  }
0x117c   : > { %v2957_v46 = vmul.f32 0.5, %v2956_v22  ;;  %v3730_v22 = vld [vmem:[%s5095_s18 + $0x60] sm:$0xff] }
0x117d   : > { %v2982_v47 = vpack.c.bf16 %v2980_v45, %v2980_v45  ;;  %3134 = vmatpush.bf16.msra.mxu1 %v3122_v7  ;;  %v3121_v44 = vpack.c.bf16 %v3731_v9, %v3730_v22 }
0x117e   : > { %v2958_v49 = vsub.f32 1.5, %v2957_v46 }
0x117f   : > { %v2987_v50 = vsel %vm1656_vm10, %v2982_v47, 0 }
0x1180   : > { %v2959_v51 = vmul.f32 %v3979_v41, %v2958_v49  ;;  %2996 = vmatpush.bf16.xpose.msrb.mxu0 %v2987_v50  ;;  %v4189_v50 = vmov 3  }
0x1181   : > { %3135 = vmatpush.bf16.msra.mxu1 %v3121_v44  ;;  %3865 = vset.pattern.permute.xlu2 %v4189_v50 }
0x1182   : > { %v2963_v52 = vsel %vm2962_vm15, %v3979_v41, %v2959_v51  ;;  %3866 = vset.pattern.permute.xlu0 %v4189_v50  ;;  %3195 = vperm.xlu2 %3865, %v4745_v21  }
0x1183   : > { %v2964_v54 = vmul.f32 %v2963_v52, %v2896_v11  ;;  %v3087_v55 = vpop.f32.mrf.mxu3 }
0x1184   : > { %v4885_v6 = vadd.f32 %v3896_v4, %v3087_v55 }
0x1185   : > { %v2981_v56 = vpack.c.bf16 %v2964_v54, %v2964_v54 }
0x1186   : > { %v3141_v11 = vmul.f32 %v4885_v6, %v4885_v6 }
0x1187   : > { %3713 = vmatmul.msk.bf16.vlgmr.msrb.gmra.mxu0 %vm1656_vm10, %v2981_v56 }
0x1188   : > { %3109 = vmatpush.bf16.msra.mxu0 %v3097_v48  ;;  %v3142_v13 = vsel %vm2566_vm4, %v3141_v11, 0.0 }
0x118b   : > { %v3089_v57 = vpop.f32.mrf.mxu3 }
0x118c   : > { %3110 = vmatpush.bf16.msra.mxu0 %v3096_v36 }
0x1197   : > { %3729 = vmatmul.msk.bf16.vlgmr.msra.gmra.mxu0 %vm2167_vm5, %v4774_v34 }
0x1204   : > { %v2998_v59 = vpop.f32.mrf.mxu0 }
0x1205   : > { %v3006_v61 = vmul.f32 %v3004_v58, %v2998_v59  ;;  %v3898_v59 = vld [vmem:[%s5101_s3 + $0x3] ss:$0 sm:$0xff] }
0x1207   : > { %v3009_v62 = vadd.f32 %v3714_v60, %v3006_v61 }
0x1209   : > { %v3010_v63 = vsel %vm2628_vm3, %v3009_v62, -inf }
0x120a   : > { %3011 = vmax.xlane.f32.xlu0 %v3010_v63 }
0x120c   : > { %v3000_v0 = vpop.f32.mrf.mxu0 }
0x1214   : > { %v3112_v3 = vpop.f32.mrf.mxu0 }
0x1215   : > { %v3113_v5 = vadd.f32 %v3897_v1, %v3112_v3  ;;  %v2871_v1 = vadd.f32 %v4839_v19, %v4868_v37 }
0x1217   : > { %v3157_v2 = vmul.f32 %v3113_v5, %v3113_v5 }
0x1219   : > { %v3158_v39 = vsel %vm2566_vm4, %v3157_v2, 0.0  ;;  %v3196_v2 = vpop.permute.xlu2 %3195 }
0x121a   : > { %3159 = vadd.xlane.f32.xlu0 %v3158_v39  ;;  %v3737_v39 = vld [vmem:[%s5103_s5 + $0xc] sm:$0xf] }
0x121c   : > { %v3114_v10 = vpop.f32.mrf.mxu0 }
0x1222   : > { %3143 = vadd.xlane.f32.xlu0 %v3142_v13 }
0x127d   : > { %v3012_v14 = vpop.xlane.xlu0 %3011 }
0x127e   : > { %v3013_v15 = vsub.f32 %v3009_v62, %v3012_v14 }
0x1280   : > { %v3014_v16 = vmul.f32 1.442695, %v3013_v15 }
0x1282   : > { %3980 = vpow2.f32 %v3014_v16 }
0x1288   : > { %v3981_v24 = vpop.eup %3980 }
0x1289   : > { %v3016_v25 = vsel %vm2628_vm3, %v3981_v24, 0.0 }
0x128a   : > { %3017 = vadd.xlane.f32.xlu1 %v3016_v25 }
0x128d   : > { %v3160_v26 = vpop.xlane.xlu0 %3159 }
0x128e   : > { %v3161_v27 = vmax.f32 %v3160_v26, 1e-24  ;;  %v3739_v26 = vld [vmem:[%s5105_s6 + $0x18] sm:$0xff] }
0x1290   : > { %3982 = vrsqrt.f32 %v3161_v27  ;;  %vm3168_vm6 = vweird.f32 %v3161_v27 }
0x1295   : > { %v3144_v48 = vpop.xlane.xlu0 %3143 }
0x1296   : > { %v3983_v18 = vpop.eup %3982  ;;  %v3145_v49 = vmax.f32 %v3144_v48, 1e-24 }
0x1297   : > { %v3163_v29 = vmul.f32 %v3983_v18, %v3161_v27  ;;  %vm3169_vm4 = vweird.f32 %v3983_v18  ;;  %v3237_v27 = vpack.c.bf16 %v3739_v26, %v3739_v26 }
0x1298   : > { %vm3170_vm7 = vmor %vm3168_vm6, %vm3169_vm4  ;;  %vm3152_vm9 = vweird.f32 %v3145_v49 }
0x1299   : > { %v3164_v53 = vmul.f32 %v3983_v18, %v3163_v29 }
0x129b   : > { %v3165_v28 = vmul.f32 0.5, %v3164_v53 }
0x129d   : > { %v3166_v30 = vsub.f32 1.5, %v3165_v28 }
0x129f   : > { %v3167_v35 = vmul.f32 %v3983_v18, %v3166_v30  ;;  %v3899_v30 = vld [vmem:[%s5106_s15] ss:$0 sm:$0xff]  ;;  %s5110_s15 = sld [smem:[#allocation40_spill]] }
0x12a1   : > { %v3171_v38 = vsel %vm3170_vm7, %v3983_v18, %v3167_v35  ;;  %v3242_v18 = vsel %vm2011_vm11, %v3237_v27, 0 }
0x12a2   : > { %v3172_v12 = vmul.f32 %v3171_v38, %v3113_v5  ;;  %3251 = vmatpush.bf16.msrb.mxu0 %v3242_v18 }
0x12a4   : > { %v3174_v41 = vpack.c.bf16 %v3172_v12, %v3172_v12 }
0x12a6   : > { %v3179_v42 = vsel %vm1656_vm10, %v3174_v41, 0 }
0x12a7   : > { %3188 = vmatpush.bf16.xpose.msrb.mxu2 %v3179_v42 }
0x12fd   : > { %v3018_v8 = vpop.xlane.xlu1 %3017 }
0x12fe   : > { %3984 = vrcp.f32 %v3018_v8 }
0x12ff   : > { %3986 = vrsqrt.f32 %v3145_v49 }
0x1304   : > { %v3985_v45 = vpop.eup %3984 }
0x1305   : > { %v3020_v46 = vmul.f32 %v3985_v45, %v3981_v24  ;;  %v3987_v33 = vpop.eup %3986 }
0x1306   : > { %v3147_v32 = vmul.f32 %v3987_v33, %v3145_v49  ;;  %vm3153_vm8 = vweird.f32 %v3987_v33 }
0x1307   : > { %v3021_v47 = vpack.c.bf16 %v3020_v46, %v3020_v46  ;;  %vm3154_vm12 = vmor %vm3152_vm9, %vm3153_vm8  ;;  %vm3471_vm8 = vcmask 57344  }
0x1308   : > { %v3148_v51 = vmul.f32 %v3987_v33, %v3147_v32  ;;  %v3307_v32 = vld [vmem:[%s5108_s1 + $0x18] sm:$0xff] }
0x1309   : > { %3715 = vmatmul.msk.bf16.vlgmr.msrb.gmra.mxu1 %vm1500_vm1, %v3021_v47 }
0x130a   : > { %v3149_v36 = vmul.f32 0.5, %v3148_v51  ;;  %v3304_v51 = vld [vmem:[%s5108_s1] sm:$0xff] }
0x130c   : > { %v3150_v55 = vsub.f32 1.5, %v3149_v36  ;;  %v3305_v36 = vld [vmem:[%s5108_s1 + $0x8] sm:$0xff] }
0x130e   : > { %v3151_v56 = vmul.f32 %v3987_v33, %v3150_v55 }
0x1310   : > { %v3155_v57 = vsel %vm3154_vm12, %v3987_v33, %v3151_v56  ;;  %v3306_v33 = vld [vmem:[%s5107_s7 + $0x10] sm:$0xff]  ;;  %s5112_s7 = sld [smem:[#allocation42_spill]] }
0x1311   : > { %v3156_v58 = vmul.f32 %v3155_v57, %v4885_v6  ;;  %v3310_v50 = vpack.c.bf16 %v3307_v32, %v3306_v33 }
0x1313   : > { %v3173_v61 = vpack.c.bf16 %v3156_v58, %v3156_v58  ;;  %3324 = vmatpush.bf16.msrb.mxu1 %v3310_v50 }
0x1319   : > { %3735 = vmatmul.msk.bf16.vlgmr.msra.gmra.mxu1 %vm2167_vm5, %v4774_v34 }
0x1386   : > { %v3038_v52 = vpop.f32.mrf.mxu1 }
0x1387   : > { %v3044_v54 = vpack.c.bf16 %v3038_v52, %v3038_v52  ;;  %v3309_v52 = vpack.c.bf16 %v3305_v36, %v3304_v51 }
0x1389   : > { %3717 = vmatmul.msk.bf16.vlgmr.msra.gmra.mxu2 %vm1656_vm10, %v3044_v54  ;;  %3325 = vmatpush.bf16.msrb.mxu1 %v3309_v52 }
0x138e   : > { %v3040_v34 = vpop.f32.mrf.mxu1 }
0x1396   : > { %v3137_v60 = vpop.f32.mrf.mxu1 }
0x1397   : > { %v3138_v62 = vadd.f32 %v3898_v59, %v3137_v60 }
0x1399   : > { %v3214_v21 = vpack.c.bf16 %v3138_v62, %v3138_v62  ;;  %3736 = vmatmul.msk.bf16.vlgmr.msrb.gmra.mxu2 %vm1656_vm10, %v3173_v61  ;;  %v3900_v62 = vld [vmem:[%s5109_s11] ss:$0 sm:$0xff]  ;;  %s5113_s11 = sld [smem:[#allocation44_spill]] }
0x139b   : > { %v3219_v63 = vsel %vm1504_vm0, %v3214_v21, 0  ;;  %vm3265_vm0 = vcmask 257024  }
0x139c   : > { %3228 = vmatpush.bf16.msrb.mxu3 %v3219_v63  ;;  %v3901_v63 = vld [vmem:[%s5110_s15] ss:$0 sm:$0xff]  ;;  %s5114_s15 = sld [smem:[#allocation45_spill]] }
0x139e   : > { %v3139_v0 = vpop.f32.mrf.mxu1 }
0x13a2   : > { %v3904_v52 = vld [vmem:[%s5114_s15] ss:$0 sm:$0xff]  ;;  %s1483_s15 = sand.u32 1, %s4124_s10  }
0x13a3   : > { %s1484_s1 = scalar_lea.vmem [#allocation7], %s1483_s15  ;;  %s3474_s5 = scalar_lea.sflag [#allocation4], %s1483_s15 }
0x140c   : > { %v3061_v3 = vpop.f32.mrf.mxu2 }
0x140d   : > { %v3065_v4 = vadd.f32 %v3061_v3, %v2871_v1 }
0x1414   : > { %v3063_v5 = vpop.f32.mrf.mxu2 }
0x141c   : > { %v3190_v6 = vpop.f32.mrf.mxu2 }
0x141d   : > { %v3198_v10 = vmul.f32 %v3196_v2, %v3190_v6  ;;  %v3346_v2 = vld [vmem:[%s5111_s2 + $0x30] sm:$0xff]  ;;  %v3347_v6 = vld [vmem:[%s5111_s2 + $0x38] sm:$0xff] }
0x141f   : > { %v3201_v11 = vadd.f32 %v3737_v39, %v3198_v10  ;;  %v3352_v39 = vpack.c.bf16 %v3347_v6, %v3346_v2  ;;  %v3344_v10 = vld [vmem:[%s5111_s2 + $0x20] sm:$0xff] }
0x1421   : > { %v3202_v13 = vsel %vm2628_vm3, %v3201_v11, -inf  ;;  %3365 = vmatpush.bf16.msra.mxu2 %v3352_v39 }
0x1422   : > { %3203 = vmax.xlane.f32.xlu0 %v3202_v13 }
0x1424   : > { %v3192_v14 = vpop.f32.mrf.mxu2 }
0x1425   : > { %v3342_v14 = vld [vmem:[%s5111_s2 + $0x10] sm:$0xff] }
0x1495   : > { %v3204_v15 = vpop.xlane.xlu0 %3203 }
0x1496   : > { %v3205_v16 = vsub.f32 %v3201_v11, %v3204_v15  ;;  %v3345_v11 = vld [vmem:[%s5111_s2 + $0x28] sm:$0xff]  ;;  %v3343_v15 = vld [vmem:[%s5111_s2 + $0x18] sm:$0xff] }
0x1497   : > { %v3351_v13 = vpack.c.bf16 %v3345_v11, %v3344_v10 }
0x1498   : > { %v3206_v17 = vmul.f32 1.442695, %v3205_v16  ;;  %v3350_v16 = vpack.c.bf16 %v3343_v15, %v3342_v14 }
0x1499   : > { %3366 = vmatpush.bf16.msra.mxu2 %v3351_v13 }
0x149a   : > { %3988 = vpow2.f32 %v3206_v17  ;;  %v3340_v17 = vld [vmem:[%s5111_s2] sm:$0xff] }
0x149d   : > { %3367 = vmatpush.bf16.msra.mxu2 %v3350_v16 }
0x14a0   : > { %v3989_v20 = vpop.eup %3988 }
0x14a1   : > { %v3208_v19 = vsel %vm2628_vm3, %v3989_v20, 0.0 }
0x14a2   : > { %3209 = vadd.xlane.f32.xlu0 %v3208_v19  ;;  %v3902_v19 = vld [vmem:[%s5112_s7] ss:$0 sm:$0xff]  ;;  %s5115_s7 = sld [smem:[#allocation46_spill]] }
0x1515   : > { %v3210_v37 = vpop.xlane.xlu0 %3209 }
0x1516   : > { %3990 = vrcp.f32 %v3210_v37 }
0x1517   : > { %3992 = vrcp.f32 %v4190_v43 }
0x151c   : > { %v3991_v23 = vpop.eup %3990 }
0x151d   : > { %v3212_v24 = vmul.f32 %v3991_v23, %v3989_v20  ;;  %v3993_v40 = vpop.eup %3992 }
0x151e   : > { %v3270_v22 = vmul.f32 32.0, %v3993_v40 }
0x151f   : > { %v3213_v25 = vpack.c.bf16 %v3212_v24, %v3212_v24 }
0x1520   : > { %v3271_v7 = vsub.f32 1.0, %v3270_v22 }
0x1521   : > { %3738 = vmatmul.msk.bf16.vlgmr.msrb.gmra.mxu3 %vm1500_vm1, %v3213_v25  ;;  %vm3274_vm1 = vweird.f32 %v3993_v40 }
0x1522   : > { %v3272_v9 = vmul.f32 %v3993_v40, %v3271_v7 }
0x1524   : > { %v3273_v44 = vadd.f32 %v3993_v40, %v3272_v9 }
0x1526   : > { %v4919_v8 = vsel %vm3274_vm1, %v3993_v40, %v3273_v44 }
0x15a4   : > { %v3230_v29 = vpop.f32.mrf.mxu3 }
0x15a5   : > { %v3236_v53 = vpack.c.bf16 %v3230_v29, %v3230_v29 }
0x15a7   : > { %3740 = vmatmul.msk.bf16.vlgmr.msrb.gmra.mxu0 %vm1656_vm10, %v3236_v53 }
0x15ac   : > { %v3232_v28 = vpop.f32.mrf.mxu3 }
0x1624   : > { %v3253_v35 = vpop.f32.mrf.mxu0 }
0x1625   : > { %v3257_v38 = vadd.f32 %v3253_v35, %v3065_v4 }
0x1627   : > { %v3262_v12 = vadd.f32 %v3899_v30, %v3257_v38 }
0x1629   : > { %v3266_v41 = vsel %vm3265_vm0, %v3262_v12, 0.0 }
0x162a   : > { %3267 = vadd.xlane.f32.xlu0 %v3266_v41 }
0x162c   : > { %v3255_v42 = vpop.f32.mrf.mxu0 }
0x169d   : > { %v3268_v45 = vpop.xlane.xlu0 %3267 }
0x169e   : > { %v3276_v46 = vmul.f32 %v4919_v8, %v3268_v45 }
0x16a0   : > { %v3277_v47 = vsub.f32 %v3262_v12, %v3276_v46  ;;  %v3903_v12 = vld [vmem:[%s5113_s11] ss:$0 sm:$0xff]  ;;  %s5116_s11 = sld [smem:[#allocation47_spill]] }
0x16a2   : > { %v3278_v48 = vmul.f32 %v3277_v47, %v3277_v47 }
0x16a4   : > { %v3279_v49 = vsel %vm3265_vm0, %v3278_v48, 0.0 }
0x16a5   : > { %3280 = vadd.xlane.f32.xlu2 %v3279_v49 }
0x1718   : > { %v3281_v54 = vpop.xlane.xlu2 %3280 }
0x1719   : > { %v3282_v55 = vmul.f32 %v3281_v54, %v4919_v8 }
0x171b   : > { %v3283_v56 = vadd.f32 1e-05, %v3282_v55 }
0x171d   : > { %3994 = vrsqrt.f32 %v3283_v56  ;;  %vm3290_vm11 = vweird.f32 %v3283_v56 }
0x1723   : > { %v3995_v34 = vpop.eup %3994 }
0x1724   : > { %v3285_v57 = vmul.f32 %v3995_v34, %v3283_v56  ;;  %vm3291_vm10 = vweird.f32 %v3995_v34  ;;  %v3905_v56 = vld [vmem:[%s5115_s7] ss:$0 sm:$0xff]  ;;  %s3482_s7 = scalar_lea.hbm %s4444_s4, %s4467_s0  ;;  %s4082_s0 = scalar_lea.hbm %s4444_s4, 2 }
0x1725   : > { %vm3292_vm3 = vmor %vm3290_vm11, %vm3291_vm10  ;;  %s3486_s3 = sshll.u32 %s3482_s7, 4  ;;  %s3487_s3 = int_to_ptr.hbm [resolvable:$true] %s3486_s3 }
0x1726   : > { %v3286_v58 = vmul.f32 %v3995_v34, %v3285_v57  ;;  %s4076_s6 = sshra.s32 %s3487_s3, 4  ;;  %s4077_s6 = int_to_ptr.hbm [resolvable:$true] %s4076_s6 }
0x1727   : > { %s4078_s8 = scalar_lea.hbm %s4077_s6, 1  ;;  %p4083_p8 = scmp.lt.s32.totalorder %s4077_s6, %s4444_s4 }
0x1728   : > { %v3287_v59 = vmul.f32 0.5, %v3286_v58  ;;  %p4079_p9 = scmp.ne.s32.totalorder %s4077_s6, %s4078_s8  ;;  %p4084_p11 = scmp.lt.s32.totalorder %s4082_s0, %s4078_s8 }
0x172a   : > { %v3288_v60 = vsub.f32 1.5, %v3287_v59  ;;  %p4080_p10 = pnand %p4079_p9, %p4484_p5  ;;  %p4085_p13 = por %p4084_p11, %p4083_p8 }
0x172c   : > { %v3289_v61 = vmul.f32 %v3995_v34, %v3288_v60  ;;  %p4081_p0 = pneg %p4080_p10 }
0x172e   : > { %v3293_v21 = vsel %vm3292_vm3, %v3995_v34, %v3289_v61  ;;  %p4086_p1 = pnand %p4085_p13, %p4081_p0 }
0x172f   : > { %v3294_v0 = vmul.f32 %v3293_v21, %v3277_v47 }
0x1731   : > { %v3298_v1 = vmul.f32 %v3900_v62, %v3294_v0 }
0x1733   : > { %v3302_v3 = vadd.f32 %v3901_v63, %v3298_v1  ;;  %v3449_v1 = vld [vmem:[%s4434_s20 + $0x10] sm:$0xff] }
0x1735   : > { %v4931_v4 = vadd.f32 %v3302_v3, %v4770_v31  ;;  %v3341_v31 = vld [vmem:[%s5111_s2 + $0x8] sm:$0xff]  ;;  %v3450_v3 = vld [vmem:[%s4434_s20 + $0x18] sm:$0xff]  ;;  %s3484_s2 = sshll.u32 %s1484_s1, 4  ;;  %s3485_s2 = int_to_ptr.vmem [resolvable:$true] %s3484_s2 }
0x1736   : > { %v3349_v20 = vpack.c.bf16 %v3341_v31, %v3340_v17  ;;  %v3453_v6 = vpack.c.bf16 %v3450_v3, %v3449_v1  ;;  %v3906_v31 = vld [vmem:[%s5116_s11] ss:$0 sm:$0xff] }
0x1737   : > { %v3308_v5 = vpack.c.bf16 %v4931_v4, %v4931_v4 }
0x1738   : > { %3368 = vmatpush.bf16.msra.mxu2 %v3349_v20  ;;  %3464 = vmatpush.bf16.msra.mxu3 %v3453_v6  ;;  %v3907_v20 = vld [vmem:[#allocation2] ss:$0 sm:$0xff] }
0x1739   : > { %3741 = vmatmul.msk.bf16.vlgmr.msrb.gmra.mxu1 %vm2167_vm5, %v3308_v5  ;;  %v3447_v5 = vld [vmem:[%s4434_s20] sm:$0xff] }
0x17b6   : > { %v3327_v37 = vpop.f32.mrf.mxu1 }
0x17b7   : > { %v3328_v23 = vadd.f32 %v3902_v19, %v3327_v37 }
0x17b9   : > { %v3332_v24 = vmul.f32 0.044715, %v3328_v23  ;;  %v3331_v28 = vmul.f32 0.5, %v3328_v23 }
0x17bb   : > { %v3333_v25 = vmul.f32 %v3332_v24, %v3328_v23 }
0x17bd   : > { %v3334_v26 = vmul.f32 %v3333_v25, %v3328_v23 }
0x17be   : > { %v3329_v27 = vpop.f32.mrf.mxu1 }
0x17bf   : > { %v3335_v18 = vadd.f32 %v3334_v26, %v3328_v23 }
0x17c1   : > { %v3336_v29 = vmul.f32 0.7978846, %v3335_v18 }
0x17c3   : > { %3996 = vtanh.f32 %v3336_v29 }
0x17c9   : > { %v3997_v53 = vpop.eup %3996 }
0x17ca   : > { %v3338_v30 = vadd.f32 1.0, %v3997_v53 }
0x17cc   : > { %v3339_v35 = vmul.f32 %v3338_v30, %v3331_v28 }
0x17ce   : > { %v3348_v38 = vpack.c.bf16 %v3339_v35, %v3339_v35  ;;  %v3454_v35 = vld [vmem:[#allocation5] sm:$0x1] }
0x17d0   : > { %3742 = vmatmul.msk.bf16.vlgmr.msra.gmra.mxu2 %vm3357_vm13, %v3348_v38 }
0x1853   : > { %v3370_v41 = vpop.f32.mrf.mxu2 }
0x1854   : > { %v3371_v42 = vadd.f32 %v3903_v12, %v3370_v41 }
0x1856   : > { %v3376_v43 = vsel %vm3265_vm0, %v3371_v42, 0.0 }
0x1857   : > { %3377 = vadd.xlane.f32.xlu1 %v3376_v43 }
0x185b   : > { %v3372_v40 = vpop.f32.mrf.mxu2 }
0x18ca   : > { %v3378_v22 = vpop.xlane.xlu1 %3377 }
0x18cb   : > { %v3379_v7 = vmul.f32 %v3378_v22, %v4919_v8 }
0x18cd   : > { %v3380_v9 = vsub.f32 %v3371_v42, %v3379_v7 }
0x18cf   : > { %v3381_v44 = vmul.f32 %v3380_v9, %v3380_v9 }
0x18d1   : > { %v3382_v45 = vsel %vm3265_vm0, %v3381_v44, 0.0 }
0x18d2   : > { %3383 = vadd.xlane.f32.xlu0 %v3382_v45 }
0x1945   : > { %v3384_v46 = vpop.xlane.xlu0 %3383 }
0x1946   : > { %v3385_v47 = vmul.f32 %v3384_v46, %v4919_v8 }
0x1948   : > { %v3386_v48 = vadd.f32 1e-05, %v3385_v47 }
0x194a   : > { %3998 = vrsqrt.f32 %v3386_v48  ;;  %vm3393_vm2 = vweird.f32 %v3386_v48 }
0x1950   : > { %v3999_v49 = vpop.eup %3998 }
0x1951   : > { %v3388_v33 = vmul.f32 %v3999_v49, %v3386_v48  ;;  %vm3394_vm14 = vweird.f32 %v3999_v49 }
0x1952   : > { %vm3395_vm15 = vmor %vm3393_vm2, %vm3394_vm14 }
0x1953   : > { %v3389_v32 = vmul.f32 %v3999_v49, %v3388_v33 }
0x1955   : > { %v3390_v50 = vmul.f32 0.5, %v3389_v32 }
0x1957   : > { %v3391_v51 = vsub.f32 1.5, %v3390_v50 }
0x1959   : > { %v3392_v36 = vmul.f32 %v3999_v49, %v3391_v51 }
0x195b   : > { %v3396_v54 = vsel %vm3395_vm15, %v3999_v49, %v3392_v36 }
0x195c   : > { %v3397_v55 = vmul.f32 %v3396_v54, %v3380_v9 }
0x195e   : > { %v3401_v34 = vmul.f32 %v3904_v52, %v3397_v55 }
0x1960   : > { %v3405_v57 = vadd.f32 %v3905_v56, %v3401_v34 }
0x1962   : > { %v3406_v58 = vadd.f32 %v3405_v57, %v4931_v4  ;;  %v3448_v4 = vld [vmem:[%s4434_s20 + $0x8] sm:$0xff] }
0x1963   : > { %v3452_v10 = vpack.c.bf16 %v3448_v4, %v3447_v5 }
0x1964   : > { %v3409_v59 = vsel %vm3265_vm0, %v3406_v58, 0.0 }
0x1965   : > { %3410 = vadd.xlane.f32.xlu1 %v3409_v59  ;;  %3465 = vmatpush.bf16.msra.mxu3 %v3452_v10 }
0x19d8   : > { %v3411_v60 = vpop.xlane.xlu1 %3410 }
0x19d9   : > { %v3412_v61 = vmul.f32 %v3411_v60, %v4919_v8 }
0x19db   : > { %v3413_v62 = vsub.f32 %v3406_v58, %v3412_v61 }
0x19dd   : > { %v3414_v21 = vmul.f32 %v3413_v62, %v3413_v62 }
0x19df   : > { %v3415_v63 = vsel %vm3265_vm0, %v3414_v21, 0.0 }
0x19e0   : > { %3416 = vadd.xlane.f32.xlu0 %v3415_v63 }
0x1a53   : > { %v3417_v0 = vpop.xlane.xlu0 %3416 }
0x1a54   : > { %v3418_v2 = vmul.f32 %v3417_v0, %v4919_v8 }
0x1a56   : > { %v3419_v39 = vadd.f32 1e-05, %v3418_v2 }
0x1a58   : > { %4000 = vrsqrt.f32 %v3419_v39  ;;  %vm3426_vm6 = vweird.f32 %v3419_v39 }
0x1a5e   : > { %v4001_v11 = vpop.eup %4000 }
0x1a5f   : > { %v3421_v13 = vmul.f32 %v4001_v11, %v3419_v39  ;;  %vm3427_vm4 = vweird.f32 %v4001_v11 }
0x1a60   : > { %vm3428_vm7 = vmor %vm3426_vm6, %vm3427_vm4 }
0x1a61   : > { %v3422_v14 = vmul.f32 %v4001_v11, %v3421_v13 }
0x1a63   : > { %v3423_v15 = vmul.f32 0.5, %v3422_v14 }
0x1a65   : > { %v3424_v16 = vsub.f32 1.5, %v3423_v15 }
0x1a67   : > { %v3425_v17 = vmul.f32 %v4001_v11, %v3424_v16 }
0x1a69   : > { %v3429_v8 = vsel %vm3428_vm7, %v4001_v11, %v3425_v17 }
0x1a6a   : > { %v3430_v19 = vmul.f32 %v3429_v8, %v3413_v62 }
0x1a6c   : > { %v3434_v37 = vmul.f32 %v3906_v31, %v3430_v19 }
0x1a6e   : > { %v3438_v23 = vadd.f32 %v3907_v20, %v3434_v37 }
0x1a70   : > { %v3439_v24 = vsel %vm3265_vm0, %v3438_v23, 0.0 }
0x1a71   : > { %v3440_v25 = vrot.slane %v3439_v24, 4 }
0x1a73   : > { %v3441_v26 = vadd.f32 %v3440_v25, %v3439_v24 }
0x1a75   : > { %v3442_v27 = vrot.slane %v3441_v26, 2 }
0x1a77   : > { %v3443_v18 = vadd.f32 %v3442_v27, %v3441_v26 }
0x1a79   : > { %v3444_v29 = vrot.slane %v3443_v18, 1 }
0x1a7b   : > { %v3445_v53 = vadd.f32 %v3444_v29, %v3443_v18 }
0x1a7d   : > { %v3446_v28 = vmul.f32 0.25, %v3445_v53 }
0x1a7f   : > { %v3451_v30 = vpack.c.bf16 %v3446_v28, %v3446_v28 }
0x1a81   : > { %3743 = vmatmul.msk.bf16.vlgmr.msra.gmra.mxu3 %vm2167_vm5, %v3451_v30 }
0x1b04   : > { %v3467_v38 = vpop.f32.mrf.mxu3 }
0x1b05   : > { %v3468_v12 = vadd.f32 %v3467_v38, %v3454_v35 }
0x1b07   : > { %3472 = vst.msk [vmem:[%s1484_s1] sm:$0x1] %vm3471_vm8, %v3468_v12 }
0x1b08   : > { %4089 = shalt.err (!%p4086_p1)
}
0x1b09   : > { %3755 = dma.vmem_to_hbm [thread:$0]  (%p4484_p5), %s3485_s2, 16, %s3487_s3, %s3474_s5  }
0x1b0c   : > { %v3469_v41 = vpop.f32.mrf.mxu3 }
0x1b0d PF: > { %s5118_s1 = sld [smem:[#allocation51_spill]] }
0x1b0e   : > { %s5119_s15 = sld [smem:[#allocation49_spill]] }
0x1b13   : > { %p3772_p2 = scmp.ge.s32.totalorder %s5118_s1, 2 }
0x1b14   : > { %s3498_s9 = sand.u32 1, %s5119_s15  }
0x1b15   : > { %p3765_p3 = pnand %p3772_p2, %p4488_p6  ;;  %s3499_s12 = scalar_lea.sflag [#allocation4], %s3498_s9 }
0x1b17   : > { %p3766_p4 = pneg %p3765_p3 }
0x1b19   : > { %4115 = dma.done.wait (%p3766_p4), %s3499_s12, 16  }
0x1b1a   : > { %4117 = vsyncadd (%p3766_p4), %s3499_s12, 4294967280  ;;  %s5121_s15 = sld [smem:[#allocation52_spill]]  ;;  %s5124_s7 = smov %s4124_s10 }
0x1b1b   : > { %s5122_s8 = sld [smem:[#allocation50_spill]] }
0x1b1c   : > { %s5123_s11 = sld [smem:[#allocation53_spill]] }
0x1b20   : > { %p111_p7 = scmp.ge.s32.totalorder %s5121_s15, 4  }
0x1b21   : > { %s5125_s10 = smov %s5122_s8 }
0x1b22   :  { %113 = sbr.rel (!%p111_p7) target bundleno = 111 (0x6f), region = 347 }
0x1b27   :  { %3504 = vsyncpa [#allocation3], 1 }
0x1b28   :  { %3506 = vsyncpa [#allocation3 + $0x1], 1 }
0x1b29   :  { %3507 = vsyncpa [#allocation6], 1 }
0x1b2a   :  { %3508 = vsyncpa [#allocation4], 1 }
0x1b2b   :  { %3510 = vsyncpa [#allocation4 + $0x1], 1 }

</bundles_post_ra>
